<compile_context>
chip_gen: v5e
topology: v5e:2x2
jax: 0.10.0
libtpu: 0.0.40
codegen_flags: <defaults>
</compile_context>

<pallas_src>
import math

import jax
import jax.numpy as jnp
from jax import lax
from jax.experimental import pallas as pl
from jax.experimental.pallas import tpu as pltpu


def _bilinear_matrix(in_size: int, out_size: int) -> jnp.ndarray:
    """1-D interpolation matrix matching torch.nn.Upsample(mode='bilinear',
    align_corners=False) along one spatial axis. Shape (out_size, in_size)."""
    scale = in_size / out_size
    out_idx = jnp.arange(out_size, dtype=jnp.float32)
    src = (out_idx + 0.5) * scale - 0.5
    src = jnp.maximum(src, 0.0)                       # PyTorch clamps negatives
    i0 = jnp.clip(jnp.floor(src).astype(jnp.int32), 0, in_size - 1)
    i1 = jnp.minimum(i0 + 1, in_size - 1)
    frac = src - i0.astype(jnp.float32)
    rows = jnp.arange(out_size)
    w = jnp.zeros((out_size, in_size), jnp.float32)
    w = w.at[rows, i0].add(1.0 - frac)
    w = w.at[rows, i1].add(frac)
    return w


def _make_kernel(C: int, N_in: int, W_out: int, N_out: int, bt: int):
    taps = [(dy, dx) for dy in (-1, 0, 1) for dx in (-1, 0, 1)]

    def kernel(xt_ref, wt_ref, mcat_ref, mask_ref, bias_ref, o_ref, tap_ref):
        # xt_ref:   (bt, C, N_in)    bf16  channel-major patch embeddings
        # wt_ref:   (N_in, N_out)    bf16  transposed kron(Wy, Wx)
        # mcat_ref: (C, 9*C)         bf16  [P@diag(dw_0) | ... | P@diag(dw_8)]
        # mask_ref: (9, 1, N_out)    f32   combined (dy,dx) boundary mask per tap
        # bias_ref: (C, 1)           f32   fused bias  P @ b_dw + b_pw
        # o_ref:    (bt, C, N_out)   f32   channel-major output (lane-dense)
        # tap_ref:  (9*C, bt*N_out)  bf16  VMEM scratch of stacked shifted taps

        # Bilinear upsample for all bt images: ONE lane-dense bf16 MXU matmul.
        x2d = xt_ref[...].reshape(bt * C, N_in)
        u_all = jnp.dot(x2d, wt_ref[...], preferred_element_type=jnp.float32)

        # Stream the nine depthwise taps straight into the bf16 scratch.
        # Wanted: tap_k[:, l] = u[:, l + s] with zero fill outside the image,
        # where s = dy*W_out + dx.  pltpu.roll(u, -s) (== jnp.roll) wraps; the
        # precomputed per-tap mask zeroes exactly the wrapped / out-of-image
        # lanes, which IS the 3x3 conv's zero padding.  Rolls are per-image so
        # a shift never bleeds across the batch.
        for b in range(bt):
            u = u_all[b * C:(b + 1) * C, :]                   # (C, N_out) f32
            for k, (dy, dx) in enumerate(taps):
                s = dy * W_out + dx
                if s == 0:
                    tap = u                                   # centre tap: mask == 1
                else:
                    tap = pltpu.roll(u, (-s) % N_out, axis=1) * mask_ref[k]
                tap_ref[k * C:(k + 1) * C, b * N_out:(b + 1) * N_out] = (
                    tap.astype(jnp.bfloat16))

        # Fused depthwise-3x3 + pointwise-1x1: ONE K = 9C bf16 MXU matmul
        # with f32 accumulation, then a single exact f32 bias add.
        acc = jnp.dot(mcat_ref[...], tap_ref[...],
                      preferred_element_type=jnp.float32)      # (C, bt*N_out)
        acc = acc + bias_ref[...]
        for b in range(bt):
            o_ref[b] = acc[:, b * N_out:(b + 1) * N_out]

    return kernel


def interpolation_upsampler(x, dw_w, dw_b, pw_w, pw_b, output_size: int,
                            images_per_step: int | None = None):
    """Pallas forward pass of InterpolationUpSampler.

    Args (PyTorch-native parameter layouts):
      x:    (B, nb_patch, C) f32 patch embeddings.
      dw_w: (C, 1, 3, 3) depthwise Conv2d weight,  dw_b: (C,) its bias.
      pw_w: (C, C, 1, 1) pointwise Conv2d weight,  pw_b: (C,) its bias.
    Returns (B, output_size, output_size, C) f32 (the module's output after
    its final .permute(0, 2, 3, 1)).
    """
    B, N_in, C = x.shape
    input_size = int(math.sqrt(N_in))
    assert input_size in (14, 16), "nb_patch must be 196 or 256"
    H_out = W_out = output_size
    N_out = H_out * W_out

    # ---- choose how many images to process per grid step ----
    if images_per_step is None:
        kind = jax.devices()[0].device_kind.lower()
        # v2..v6 have one TensorCore per chip -> merge the batch into one step
        # to amortize per-step overhead; anything newer/unknown is treated as
        # dual-core (v7x), where the grid must keep >= 2 steps.
        single_tc = any(v in kind for v in ("v2", "v3", "v4", "v5", "v6"))
        num_tc = 1 if single_tc else 2
        bt = B // num_tc if (num_tc <= B and B % num_tc == 0) else 1
        bt = max(1, min(bt, 8))               # keep per-step VMEM modest
        while B % bt:
            bt -= 1
    else:
        bt = images_per_step
    assert B % bt == 0, "images_per_step must divide the batch"

    # ---- parameter preprocessing (layout plumbing, done once) ----
    # Combined bilinear weights, transposed so the channel-major matmul
    # x^T @ W^T yields a lane-dense (C, N_out) tile in a single MXU pass.
    wy = _bilinear_matrix(input_size, H_out)
    wx = _bilinear_matrix(input_size, W_out)
    w_t = jnp.kron(wy, wx).T.astype(jnp.bfloat16)                 # (N_in, N_out)

    # Fuse depthwise per-channel scales and both biases into the 1x1 conv,
    # concatenated tap-major so a single K=9C matmul consumes the scratch:
    #   M_cat[:, k*C:(k+1)*C] = P @ diag(dw_k)
    pw = pw_w.reshape(C, C).astype(jnp.float32)                   # (C_out, C_in)
    dw = dw_w.reshape(C, 9).astype(jnp.float32)                   # (C, ky*3+kx)
    m9 = pw[None, :, :] * dw.T[:, None, :]                        # (9, C_out, C_in)
    m_cat = jnp.transpose(m9, (1, 0, 2)).reshape(C, 9 * C).astype(jnp.bfloat16)
    b_fused = (pw @ dw_b.reshape(C) + pw_b.reshape(C)).reshape(C, 1)
    b_fused = b_fused.astype(jnp.float32)

    # Combined boundary mask per tap: 1 iff the tap reads inside the image.
    l_idx = jnp.arange(N_out, dtype=jnp.int32)
    h_idx = l_idx // W_out
    w_idx = l_idx % W_out
    masks = []
    for dy in (-1, 0, 1):
        for dx in (-1, 0, 1):
            valid = ((h_idx + dy >= 0) & (h_idx + dy < H_out)
                     & (w_idx + dx >= 0) & (w_idx + dx < W_out))
            masks.append(valid)
    mask = jnp.stack(masks).astype(jnp.float32).reshape(9, 1, N_out)

    # Channel-major bf16 input (B, C, N_in).
    x_t = jnp.transpose(x, (0, 2, 1)).astype(jnp.bfloat16)

    # Grid-invariant operands: single-buffer them once the kron weight is big
    # enough that default double-buffering would pressure v7x's 64 MiB VMEM
    # (output_size >= ~112).  At the demo size the default is harmless.
    big_invariants = (N_in * N_out * 2) > (4 << 20)

    def inv_spec(block_shape):
        idx = lambda i: (0,) * len(block_shape)
        if big_invariants:
            return pl.BlockSpec(block_shape, idx, pipeline_mode=pl.Buffered(1))
        return pl.BlockSpec(block_shape, idx)

    grid = (B // bt,)
    out_cm = pl.pallas_call(
        _make_kernel(C, N_in, W_out, N_out, bt),
        out_shape=jax.ShapeDtypeStruct((B, C, N_out), jnp.float32),
        grid=grid,
        in_specs=[
            pl.BlockSpec((bt, C, N_in), lambda i: (i, 0, 0)),
            inv_spec((N_in, N_out)),
            inv_spec((C, 9 * C)),
            inv_spec((9, 1, N_out)),
            inv_spec((C, 1)),
        ],
        out_specs=pl.BlockSpec((bt, C, N_out), lambda i: (i, 0, 0)),
        scratch_shapes=[pltpu.VMEM((9 * C, bt * N_out), jnp.bfloat16)],
        compiler_params=pltpu.CompilerParams(
            dimension_semantics=("parallel",)),
    )(x_t, w_t, m_cat, mask, b_fused)

    # Channel-major -> NHWC (cheap XLA relayout outside the kernel; skip it if
    # a downstream consumer can take channel-major directly).
    return jnp.transpose(out_cm.reshape(B, C, H_out, W_out), (0, 2, 3, 1))


def _reference(x, dw_w, dw_b, pw_w, pw_b, output_size):
    """Pure-JAX reference consuming the PyTorch-native parameter layouts and
    using XLA convolutions (independent of the kernel's fused math)."""
    B, N_in, C = x.shape
    input_size = int(math.sqrt(N_in))
    x4 = x.reshape(B, input_size, input_size, C)                  # NHWC
    wy = _bilinear_matrix(input_size, output_size)
    wx = _bilinear_matrix(input_size, output_size)
    u = jnp.einsum('yh,bhwc->bywc', wy, x4)
    u = jnp.einsum('xw,bhwc->bhxc', wx, u)                        # (B,Ho,Wo,C)
    dw_hwio = jnp.transpose(dw_w, (2, 3, 1, 0))                   # (3,3,1,C)
    y = lax.conv_general_dilated(
        u, dw_hwio, window_strides=(1, 1), padding='SAME',
        dimension_numbers=('NHWC', 'HWIO', 'NHWC'),
        feature_group_count=C) + dw_b.reshape(1, 1, 1, C)
    out = jnp.einsum('bhwc,oc->bhwo', y, pw_w.reshape(C, C))
    return out + pw_b.reshape(1, 1, 1, C)


if __name__ == "__main__":
    # nb_patch must be 196 or 256 -> input_size 14 or 16.  Use 256 (16x16),
    # a small embed_dim, and a modest output_size.
    B, nb_patch, embed_dim, output_size = 2, 256, 32, 32

    key = jax.random.PRNGKey(0)
    k1, k2, k3, k4, k5 = jax.random.split(key, 5)
    x = jax.random.normal(k1, (B, nb_patch, embed_dim), jnp.float32)
    # synthetic parameters in the PyTorch module's *native* layouts
    dw_w = jax.random.normal(k2, (embed_dim, 1, 3, 3), jnp.float32) * 0.1
    dw_b = jax.random.normal(k3, (embed_dim,), jnp.float32) * 0.1
    pw_w = jax.random.normal(k4, (embed_dim, embed_dim, 1, 1), jnp.float32) * 0.1
    pw_b = jax.random.normal(k5, (embed_dim,), jnp.float32) * 0.1

    out = interpolation_upsampler(x, dw_w, dw_b, pw_w, pw_b, output_size)
    out = jax.block_until_ready(out)

    assert out.shape == (B, output_size, output_size, embed_dim)
    ref = _reference(x, dw_w, dw_b, pw_w, pw_b, output_size)
    assert jnp.all(jnp.isfinite(out))
    max_err = float(jnp.max(jnp.abs(out - ref)))
    assert jnp.allclose(out, ref, rtol=2e-2, atol=2e-2), max_err
    print("KERNEL_OK")
</pallas_src>

<mosaic_0001>
module attributes {stable_mosaic.version = 11 : i64} {
  func.func @kernel(%arg0: i32, %arg1: memref<1x32x256xbf16, #tpu.memory_space<vmem>>, %arg2: memref<256x1024xbf16, #tpu.memory_space<vmem>>, %arg3: memref<32x288xbf16, #tpu.memory_space<vmem>>, %arg4: memref<9x1x1024xf32, #tpu.memory_space<vmem>>, %arg5: memref<32x1xf32, #tpu.memory_space<vmem>>, %arg6: memref<1x32x1024xf32, #tpu.memory_space<vmem>>, %arg7: memref<288x1024xbf16, #tpu.memory_space<vmem>>) attributes {dimension_semantics = [#tpu.dimension_semantics<parallel>], iteration_bounds = array<i64: 2>, scalar_prefetch = 0 : i64, scratch_operands = 1 : i64, tpu.core_type = #tpu.core_type<tc>, window_params = [{transform_indices = @transform_0, window_bounds = array<i64: 1, 32, 256>}, {pipeline_mode = #tpu.pipeline_mode<synchronous>, transform_indices = @transform_1, window_bounds = array<i64: 256, 1024>}, {pipeline_mode = #tpu.pipeline_mode<synchronous>, transform_indices = @transform_2, window_bounds = array<i64: 32, 288>}, {pipeline_mode = #tpu.pipeline_mode<synchronous>, transform_indices = @transform_3, window_bounds = array<i64: 9, 1, 1024>}, {pipeline_mode = #tpu.pipeline_mode<synchronous>, transform_indices = @transform_4, window_bounds = array<i64: 32, 1>}, {transform_indices = @transform_5, window_bounds = array<i64: 1, 32, 1024>}]} {
    %c0 = arith.constant 0 : index
    %c0_0 = arith.constant 0 : index
    %c0_1 = arith.constant 0 : index
    %0 = vector.load %arg1[%c0, %c0_0, %c0_1] : memref<1x32x256xbf16, #tpu.memory_space<vmem>>, vector<1x32x256xbf16>
    %1 = vector.shape_cast %0 : vector<1x32x256xbf16> to vector<32x256xbf16>
    %c0_2 = arith.constant 0 : index
    %c0_3 = arith.constant 0 : index
    %2 = vector.load %arg2[%c0_2, %c0_3] : memref<256x1024xbf16, #tpu.memory_space<vmem>>, vector<256x1024xbf16>
    %cst = arith.constant dense<0.000000e+00> : vector<32x1024xf32>
    %3 = tpu.matmul %1, %2, %cst {dimension_numbers = #tpu.dot_dimension_numbers<[1], [0], [0], [1], [0, 0, 1, 1], [], []>} : vector<32x256xbf16>, vector<256x1024xbf16>, vector<32x1024xf32> -> vector<32x1024xf32>
    %c33_i32 = arith.constant 33 : i32
    %4 = tpu.dynamic_rotate %3 by %c33_i32 dim 1 : vector<32x1024xf32>, i32 -> vector<32x1024xf32>
    %c0_4 = arith.constant 0 : index
    %c0_5 = arith.constant 0 : index
    %c0_6 = arith.constant 0 : index
    %5 = vector.load %arg4[%c0_4, %c0_5, %c0_6] : memref<9x1x1024xf32, #tpu.memory_space<vmem>>, vector<1x1x1024xf32>
    %6 = vector.shape_cast %5 : vector<1x1x1024xf32> to vector<1x1024xf32>
    %7 = vector.broadcast %6 : vector<1x1024xf32> to vector<32x1024xf32>
    %8 = arith.mulf %4, %7 : vector<32x1024xf32>
    %9 = arith.truncf %8 : vector<32x1024xf32> to vector<32x1024xbf16>
    %c0_7 = arith.constant 0 : index
    %c0_8 = arith.constant 0 : index
    %10 = vector.load %arg7[%c0_7, %c0_8] : memref<288x1024xbf16, #tpu.memory_space<vmem>>, vector<32x1024xbf16>
    tpu.vector_store %arg7[%c0_7, %c0_8], %9 {strides = array<i32>} : memref<288x1024xbf16, #tpu.memory_space<vmem>>, vector<32x1024xbf16>,
    %c32_i32 = arith.constant 32 : i32
    %11 = tpu.dynamic_rotate %3 by %c32_i32 dim 1 : vector<32x1024xf32>, i32 -> vector<32x1024xf32>
    %c1 = arith.constant 1 : index
    %c0_9 = arith.constant 0 : index
    %c0_10 = arith.constant 0 : index
    %12 = vector.load %arg4[%c1, %c0_9, %c0_10] : memref<9x1x1024xf32, #tpu.memory_space<vmem>>, vector<1x1x1024xf32>
    %13 = vector.shape_cast %12 : vector<1x1x1024xf32> to vector<1x1024xf32>
    %14 = vector.broadcast %13 : vector<1x1024xf32> to vector<32x1024xf32>
    %15 = arith.mulf %11, %14 : vector<32x1024xf32>
    %16 = arith.truncf %15 : vector<32x1024xf32> to vector<32x1024xbf16>
    %c32 = arith.constant 32 : index
    %c0_11 = arith.constant 0 : index
    %17 = vector.load %arg7[%c32, %c0_11] : memref<288x1024xbf16, #tpu.memory_space<vmem>>, vector<32x1024xbf16>
    tpu.vector_store %arg7[%c32, %c0_11], %16 {strides = array<i32>} : memref<288x1024xbf16, #tpu.memory_space<vmem>>, vector<32x1024xbf16>,
    %c31_i32 = arith.constant 31 : i32
    %18 = tpu.dynamic_rotate %3 by %c31_i32 dim 1 : vector<32x1024xf32>, i32 -> vector<32x1024xf32>
    %c2 = arith.constant 2 : index
    %c0_12 = arith.constant 0 : index
    %c0_13 = arith.constant 0 : index
    %19 = vector.load %arg4[%c2, %c0_12, %c0_13] : memref<9x1x1024xf32, #tpu.memory_space<vmem>>, vector<1x1x1024xf32>
    %20 = vector.shape_cast %19 : vector<1x1x1024xf32> to vector<1x1024xf32>
    %21 = vector.broadcast %20 : vector<1x1024xf32> to vector<32x1024xf32>
    %22 = arith.mulf %18, %21 : vector<32x1024xf32>
    %23 = arith.truncf %22 : vector<32x1024xf32> to vector<32x1024xbf16>
    %c64 = arith.constant 64 : index
    %c0_14 = arith.constant 0 : index
    %24 = vector.load %arg7[%c64, %c0_14] : memref<288x1024xbf16, #tpu.memory_space<vmem>>, vector<32x1024xbf16>
    tpu.vector_store %arg7[%c64, %c0_14], %23 {strides = array<i32>} : memref<288x1024xbf16, #tpu.memory_space<vmem>>, vector<32x1024xbf16>,
    %c1_i32 = arith.constant 1 : i32
    %25 = tpu.dynamic_rotate %3 by %c1_i32 dim 1 : vector<32x1024xf32>, i32 -> vector<32x1024xf32>
    %c3 = arith.constant 3 : index
    %c0_15 = arith.constant 0 : index
    %c0_16 = arith.constant 0 : index
    %26 = vector.load %arg4[%c3, %c0_15, %c0_16] : memref<9x1x1024xf32, #tpu.memory_space<vmem>>, vector<1x1x1024xf32>
    %27 = vector.shape_cast %26 : vector<1x1x1024xf32> to vector<1x1024xf32>
    %28 = vector.broadcast %27 : vector<1x1024xf32> to vector<32x1024xf32>
    %29 = arith.mulf %25, %28 : vector<32x1024xf32>
    %30 = arith.truncf %29 : vector<32x1024xf32> to vector<32x1024xbf16>
    %c96 = arith.constant 96 : index
    %c0_17 = arith.constant 0 : index
    %31 = vector.load %arg7[%c96, %c0_17] : memref<288x1024xbf16, #tpu.memory_space<vmem>>, vector<32x1024xbf16>
    tpu.vector_store %arg7[%c96, %c0_17], %30 {strides = array<i32>} : memref<288x1024xbf16, #tpu.memory_space<vmem>>, vector<32x1024xbf16>,
    %32 = arith.truncf %3 : vector<32x1024xf32> to vector<32x1024xbf16>
    %c128 = arith.constant 128 : index
    %c0_18 = arith.constant 0 : index
    %33 = vector.load %arg7[%c128, %c0_18] : memref<288x1024xbf16, #tpu.memory_space<vmem>>, vector<32x1024xbf16>
    tpu.vector_store %arg7[%c128, %c0_18], %32 {strides = array<i32>} : memref<288x1024xbf16, #tpu.memory_space<vmem>>, vector<32x1024xbf16>,
    %c1023_i32 = arith.constant 1023 : i32
    %34 = tpu.dynamic_rotate %3 by %c1023_i32 dim 1 : vector<32x1024xf32>, i32 -> vector<32x1024xf32>
    %c5 = arith.constant 5 : index
    %c0_19 = arith.constant 0 : index
    %c0_20 = arith.constant 0 : index
    %35 = vector.load %arg4[%c5, %c0_19, %c0_20] : memref<9x1x1024xf32, #tpu.memory_space<vmem>>, vector<1x1x1024xf32>
    %36 = vector.shape_cast %35 : vector<1x1x1024xf32> to vector<1x1024xf32>
    %37 = vector.broadcast %36 : vector<1x1024xf32> to vector<32x1024xf32>
    %38 = arith.mulf %34, %37 : vector<32x1024xf32>
    %39 = arith.truncf %38 : vector<32x1024xf32> to vector<32x1024xbf16>
    %c160 = arith.constant 160 : index
    %c0_21 = arith.constant 0 : index
    %40 = vector.load %arg7[%c160, %c0_21] : memref<288x1024xbf16, #tpu.memory_space<vmem>>, vector<32x1024xbf16>
    tpu.vector_store %arg7[%c160, %c0_21], %39 {strides = array<i32>} : memref<288x1024xbf16, #tpu.memory_space<vmem>>, vector<32x1024xbf16>,
    %c993_i32 = arith.constant 993 : i32
    %41 = tpu.dynamic_rotate %3 by %c993_i32 dim 1 : vector<32x1024xf32>, i32 -> vector<32x1024xf32>
    %c6 = arith.constant 6 : index
    %c0_22 = arith.constant 0 : index
    %c0_23 = arith.constant 0 : index
    %42 = vector.load %arg4[%c6, %c0_22, %c0_23] : memref<9x1x1024xf32, #tpu.memory_space<vmem>>, vector<1x1x1024xf32>
    %43 = vector.shape_cast %42 : vector<1x1x1024xf32> to vector<1x1024xf32>
    %44 = vector.broadcast %43 : vector<1x1024xf32> to vector<32x1024xf32>
    %45 = arith.mulf %41, %44 : vector<32x1024xf32>
    %46 = arith.truncf %45 : vector<32x1024xf32> to vector<32x1024xbf16>
    %c192 = arith.constant 192 : index
    %c0_24 = arith.constant 0 : index
    %47 = vector.load %arg7[%c192, %c0_24] : memref<288x1024xbf16, #tpu.memory_space<vmem>>, vector<32x1024xbf16>
    tpu.vector_store %arg7[%c192, %c0_24], %46 {strides = array<i32>} : memref<288x1024xbf16, #tpu.memory_space<vmem>>, vector<32x1024xbf16>,
    %c992_i32 = arith.constant 992 : i32
    %48 = tpu.dynamic_rotate %3 by %c992_i32 dim 1 : vector<32x1024xf32>, i32 -> vector<32x1024xf32>
    %c7 = arith.constant 7 : index
    %c0_25 = arith.constant 0 : index
    %c0_26 = arith.constant 0 : index
    %49 = vector.load %arg4[%c7, %c0_25, %c0_26] : memref<9x1x1024xf32, #tpu.memory_space<vmem>>, vector<1x1x1024xf32>
    %50 = vector.shape_cast %49 : vector<1x1x1024xf32> to vector<1x1024xf32>
    %51 = vector.broadcast %50 : vector<1x1024xf32> to vector<32x1024xf32>
    %52 = arith.mulf %48, %51 : vector<32x1024xf32>
    %53 = arith.truncf %52 : vector<32x1024xf32> to vector<32x1024xbf16>
    %c224 = arith.constant 224 : index
    %c0_27 = arith.constant 0 : index
    %54 = vector.load %arg7[%c224, %c0_27] : memref<288x1024xbf16, #tpu.memory_space<vmem>>, vector<32x1024xbf16>
    tpu.vector_store %arg7[%c224, %c0_27], %53 {strides = array<i32>} : memref<288x1024xbf16, #tpu.memory_space<vmem>>, vector<32x1024xbf16>,
    %c991_i32 = arith.constant 991 : i32
    %55 = tpu.dynamic_rotate %3 by %c991_i32 dim 1 : vector<32x1024xf32>, i32 -> vector<32x1024xf32>
    %c8 = arith.constant 8 : index
    %c0_28 = arith.constant 0 : index
    %c0_29 = arith.constant 0 : index
    %56 = vector.load %arg4[%c8, %c0_28, %c0_29] : memref<9x1x1024xf32, #tpu.memory_space<vmem>>, vector<1x1x1024xf32>
    %57 = vector.shape_cast %56 : vector<1x1x1024xf32> to vector<1x1024xf32>
    %58 = vector.broadcast %57 : vector<1x1024xf32> to vector<32x1024xf32>
    %59 = arith.mulf %55, %58 : vector<32x1024xf32>
    %60 = arith.truncf %59 : vector<32x1024xf32> to vector<32x1024xbf16>
    %c256 = arith.constant 256 : index
    %c0_30 = arith.constant 0 : index
    %61 = vector.load %arg7[%c256, %c0_30] : memref<288x1024xbf16, #tpu.memory_space<vmem>>, vector<32x1024xbf16>
    tpu.vector_store %arg7[%c256, %c0_30], %60 {strides = array<i32>} : memref<288x1024xbf16, #tpu.memory_space<vmem>>, vector<32x1024xbf16>,
    %c0_31 = arith.constant 0 : index
    %c0_32 = arith.constant 0 : index
    %62 = vector.load %arg3[%c0_31, %c0_32] : memref<32x288xbf16, #tpu.memory_space<vmem>>, vector<32x288xbf16>
    %c0_33 = arith.constant 0 : index
    %c0_34 = arith.constant 0 : index
    %63 = vector.load %arg7[%c0_33, %c0_34] : memref<288x1024xbf16, #tpu.memory_space<vmem>>, vector<288x1024xbf16>
    %cst_35 = arith.constant dense<0.000000e+00> : vector<32x1024xf32>
    %64 = tpu.matmul %62, %63, %cst_35 {dimension_numbers = #tpu.dot_dimension_numbers<[1], [0], [0], [1], [0, 0, 1, 1], [], []>} : vector<32x288xbf16>, vector<288x1024xbf16>, vector<32x1024xf32> -> vector<32x1024xf32>
    %c0_36 = arith.constant 0 : index
    %c0_37 = arith.constant 0 : index
    %65 = vector.load %arg5[%c0_36, %c0_37] : memref<32x1xf32, #tpu.memory_space<vmem>>, vector<32x1xf32>
    %66 = vector.broadcast %65 : vector<32x1xf32> to vector<32x1024xf32>
    %67 = arith.addf %64, %66 : vector<32x1024xf32>
    %c0_38 = arith.constant 0 : index
    %c0_39 = arith.constant 0 : index
    %c0_40 = arith.constant 0 : index
    %68 = vector.load %arg6[%c0_38, %c0_39, %c0_40] : memref<1x32x1024xf32, #tpu.memory_space<vmem>>, vector<1x32x1024xf32>
    %69 = vector.shape_cast %68 : vector<1x32x1024xf32> to vector<32x1024xf32>
    %70 = vector.shape_cast %67 : vector<32x1024xf32> to vector<1x32x1024xf32>
    tpu.vector_store %arg6[%c0_38, %c0_39, %c0_40], %70 {strides = array<i32>} : memref<1x32x1024xf32, #tpu.memory_space<vmem>>, vector<1x32x1024xf32>,
    return
  }
  func.func @transform_0(%arg0: i32) -> (i32, i32, i32) {
    %c0_i32 = arith.constant 0 : i32
    %c0_i32_0 = arith.constant 0 : i32
    %c0_i32_1 = arith.constant 0 : i32
    return %arg0, %c0_i32, %c0_i32_0 : i32, i32, i32
  }
  func.func @transform_1(%arg0: i32) -> (i32, i32) {
    %c0_i32 = arith.constant 0 : i32
    %c0_i32_0 = arith.constant 0 : i32
    %c0_i32_1 = arith.constant 0 : i32
    return %c0_i32, %c0_i32_0 : i32, i32
  }
  func.func @transform_2(%arg0: i32) -> (i32, i32) {
    %c0_i32 = arith.constant 0 : i32
    %c0_i32_0 = arith.constant 0 : i32
    %c0_i32_1 = arith.constant 0 : i32
    return %c0_i32, %c0_i32_0 : i32, i32
  }
  func.func @transform_3(%arg0: i32) -> (i32, i32, i32) {
    %c0_i32 = arith.constant 0 : i32
    %c0_i32_0 = arith.constant 0 : i32
    %c0_i32_1 = arith.constant 0 : i32
    %c0_i32_2 = arith.constant 0 : i32
    return %c0_i32, %c0_i32_0, %c0_i32_1 : i32, i32, i32
  }
  func.func @transform_4(%arg0: i32) -> (i32, i32) {
    %c0_i32 = arith.constant 0 : i32
    %c0_i32_0 = arith.constant 0 : i32
    %c0_i32_1 = arith.constant 0 : i32
    return %c0_i32, %c0_i32_0 : i32, i32
  }
  func.func @transform_5(%arg0: i32) -> (i32, i32, i32) {
    %c0_i32 = arith.constant 0 : i32
    %c0_i32_0 = arith.constant 0 : i32
    %c0_i32_1 = arith.constant 0 : i32
    return %arg0, %c0_i32, %c0_i32_0 : i32, i32, i32
  }
}

</mosaic_0001>

<bundles_post_ra>
// kernel: tpu_custom_call.1
= control target key start
LH: loop header
LB: loop body
LE: loop exit
PB: predicated region body
PF: predicated region fallthrough
CT: control target
= control target key end

     0   :  { %10 = vsyncpa [#allocation4], 0  ;;  %s8767_s0 = inlined_call_operand.hbm [shape: bf16[2,32,256], index: 0, kind: input, shape index: {}]   ;;  %s8768_s1 = inlined_call_operand.hbm [shape: bf16[256,1024], index: 1, kind: input, shape index: {}]   ;;  %s8769_s2 = inlined_call_operand.hbm [shape: bf16[32,288], index: 2, kind: input, shape index: {}]   ;;  %s8770_s3 = inlined_call_operand.hbm [shape: f32[9,1,1024], index: 3, kind: input, shape index: {}]   ;;  %s8771_s4 = inlined_call_operand.vmem [shape: f32[32,1], index: 4, kind: input, shape index: {}]   ;;  %s8772_s5 = inlined_call_operand.hbm [shape: f32[2,32,1024], index: 5, kind: output, shape index: {}]  }
   0x1   :  { %12 = vsyncpa [#allocation4 + $0x1], 0 }
   0x2   :  { %13 = vsyncpa [#allocation7], 0 }
   0x3   :  { %14 = vsyncpa [#allocation10], 0 }
   0x4   :  { %15 = vsyncpa [#allocation5], 0 }
   0x5   :  { %17 = vsyncpa [#allocation5 + $0x1], 0  ;;  %s6200_s18 = smov 0   ;;  %s6202_s19 = smov 0  }
   0x6   :  { %s6204_s20 = smov 0   ;;  %s6206_s21 = smov 0  }
   0x7 LB: > { %s6221_s22 = sadd.s32 4294967295, %s6148_s21   ;;  %s4404_s23 = sadd.s32 4294967294, %s6148_s21   ;;  %s6148_s21 = sphi %s6206_s21, %s8990_s21   ;;  %s6144_s20 = sphi %s6204_s20, %s8989_s20   ;;  %s6140_s19 = sphi %s6202_s19, %s8988_s19   ;;  %s6136_s18 = sphi %s6200_s18, %s8987_s18  }
   0x8   : > { %p43_p0 = scmp.ne.s32.totalorder %s6140_s19, %s6136_s18  ;;  %p44_p1 = scmp.eq.s32.totalorder %s6221_s22, 0 }
   0x9   : > { %p151_p2 = scmp.eq.s32.totalorder %s6221_s22, 1  ;;  %p157_p3 = scmp.eq.s32.totalorder %s4404_s23, 1 }
   0xa   : > { %p6230_p4 = por %p44_p1, %p43_p0  ;;  %p4405_p5 = scmp.ge.s32.totalorder %s6148_s21, 1 }
   0xb   : > { %p6235_p6 = por %p157_p3, %p43_p0  ;;  %p164_p7 = scmp.lt.s32.totalorder %s6148_s21, 3 }
   0xc   : > { %s175_s28 = sshll.u32 %s8768_s1, 4  ;;  %s6150_s30 = smov [#allocation6]   ;;  %s176_s28 = int_to_ptr.hbm [resolvable:$true] %s175_s28 }
   0xd   : > { %p6243_p8 = pnand %p4405_p5, %p164_p7  ;;  %s177_s6 = sshll.u32 %s6150_s30, 4  ;;  %s178_s6 = int_to_ptr.vmem [resolvable:$true] %s177_s6 }
   0xe   : > { %s189_s10 = sshll.u32 %s8769_s2, 4  ;;  %s6151_s11 = smov 512   ;;  %s190_s10 = int_to_ptr.hbm [resolvable:$true] %s189_s10 }
   0xf   : > { %p5868_p9 = pneg %p6243_p8  ;;  %s6152_s12 = smov 32  }
  0x10   : > { %s6153_s13 = smov [#allocation8]   ;;  %s6154_s15 = smov 192  }
  0x11   : > { %p6251_p10 = pnand %p5868_p9, %p44_p1  ;;  %s191_s14 = sshll.u32 %s6153_s13, 4  ;;  %s192_s14 = int_to_ptr.vmem [resolvable:$true] %s191_s14 }
  0x12   : > { %s6155_s16 = smov 12   ;;  %s203_s26 = sshll.u32 %s8770_s3, 4  ;;  %s204_s26 = int_to_ptr.hbm [resolvable:$true] %s203_s26 }
  0x13   : > { %5871 = dma.hbm_to_vmem [thread:$0]  (!%p6251_p10), %s176_s28, 16384, %s178_s6, [#allocation7], %s6151_s11, %s6151_s11, %s6152_s12  }
  0x14   : > { %5874 = dma.hbm_to_vmem [thread:$0]  (!%p6251_p10), %s190_s10, 768, %s192_s14, [#allocation7], %s6154_s15, %s6154_s15, %s6155_s16  }
  0x15   : > { %s6156_s27 = smov [#allocation9]   ;;  %s8773_s30 = smov 128  }
  0x16   : > { %s205_s28 = sshll.u32 %s6156_s27, 4  ;;  %s6158_s6 = smov 8   ;;  %s206_s28 = int_to_ptr.vmem [resolvable:$true] %s205_s28 }
  0x17   : > { %5877 = dma.hbm_to_vmem [thread:$0]  (!%p6251_p10), %s204_s26, 1152, %s206_s28, [#allocation10], %s8773_s30, %s8773_s30, %s6158_s6  }
  0x18   : > { %s6272_s8 = sadd.s32 1, %s6148_s21   ;;  %s30_s10 = sadd.s32 1, %s6144_s20 }
  0x19   : > { %s27_s9 = ssub.s32 %s6148_s21, %s6272_s8  ;;  %p37_p13 = scmp.ne.s32.totalorder %s6144_s20, %s6140_s19 }
  0x1a   : > { %p28_p12 = scmp.eq.s32.totalorder %s27_s9, 0  ;;  %p38_p0 = scmp.eq.s32.totalorder %s6148_s21, 0 }
  0x1b   : > { %p6285_p3 = por %p151_p2, %p37_p13  ;;  %p5889_p5 = scmp.lt.s32.totalorder %s6148_s21, 2 }
  0x1c   : > { %s6281_s11 = scalar_select %p28_p12, %s6144_s20, %s30_s10  }
  0x1d   : > { %s222_s7 = sand.u32 1, %s6144_s20   ;;  %s5568_s13 = sshll.u32 %s6148_s21, 5 }
  0x1e   : > { %p39_p7 = por %p38_p0, %p37_p13  ;;  %s4410_s14 = sshll.u32 %s222_s7, 5 }
  0x1f   : > { %s231_s17 = scalar_lea.hbm %s8767_s0, %s5568_s13  ;;  %s226_s26 = scalar_lea.vmem [#allocation3], %s4410_s14 }
  0x20   : > { %s232_s23 = sshll.u32 %s231_s17, 4  ;;  %s234_s27 = sshll.u32 %s226_s26, 4  ;;  %s233_s23 = int_to_ptr.hbm [resolvable:$true] %s232_s23  ;;  %s235_s27 = int_to_ptr.vmem [resolvable:$true] %s234_s27 }
  0x21   : > { %p6295_p9 = pnand %p5889_p5, %p39_p7  ;;  %s223_s9 = scalar_lea.sflag [#allocation4], %s222_s7 }
  0x22   : > { %s6044_s10 = sshra.s32 %s233_s23, 4  ;;  %s6051_s14 = scalar_lea.hbm %s8767_s0, 64  ;;  %s6045_s10 = int_to_ptr.hbm [resolvable:$true] %s6044_s10 }
  0x23   : > { %s6046_s30 = scalar_lea.hbm %s6045_s10, 32  ;;  %p6048_p10 = pneg %p6295_p9 }
  0x24   : > { %p6047_p2 = scmp.ne.s32.totalorder %s6045_s10, %s6046_s30  ;;  %p6052_p0 = scmp.lt.s32.totalorder %s6045_s10, %s8767_s0 }
  0x25   : > { %p6053_p5 = scmp.lt.s32.totalorder %s6051_s14, %s6046_s30 }
  0x26   : > { %p6049_p12 = pnand %p6048_p10, %p6047_p2 }
  0x27   : > { %p6054_p7 = por %p6053_p5, %p6052_p0 }
  0x28   : > { %p6050_p13 = pneg %p6049_p12 }
  0x2a   : > { %p6055_p11 = pnand %p6054_p7, %p6050_p13 }
  0x2c   : > { %6058 = shalt.err (!%p6055_p11)
}
  0x2d   : > { %s8863_s7 = smov 128   ;;  %246 = sbr.rel (%p6243_p8) target bundleno = 1229 (0x4cd), region = 40 }
  0x2e   : > { %5881 = dma.hbm_to_vmem [thread:$0]  (!%p6295_p9), %s233_s23, 512, %s235_s27, %s223_s9, %s8863_s7, %s8863_s7, %s6158_s6  }
  0x32   : > { %s6315_s26 = sand.u32 1, %s6140_s19  }
  0x33   : > { %s4414_s10 = sshll.u32 %s6315_s26, 5  ;;  %s249_s30 = scalar_lea.sflag [#allocation4], %s6315_s26 }
  0x34   : > { %s6319_s13 = scalar_lea.vmem [#allocation3], %s4414_s10 }
  0x35   : > { %6119 = dma.done.wait (%p6230_p4), %s249_s30, 512  }
  0x36   : > { %6121 = vsyncadd (%p6230_p4), %s249_s30, 4294966784 }
  0x37   : > { %6123 = dma.done.wait (%p44_p1), [#allocation7], 17152  }
  0x38   : > { %6125 = vsyncadd (%p44_p1), [#allocation7], 4294950144 }
  0x39   : > { %6127 = dma.done.wait (%p44_p1), [#allocation10], 1152  }
  0x3a   : > { %6129 = vsyncadd (%p44_p1), [#allocation10], 4294966144  ;;  %v4661_v0 = vld [vmem:[#allocation6 + $0x1c0] sm:$0xf]  ;;  %v5629_v5 = vld [vmem:[#allocation6 + $0x1c4] sm:$0xf] }
  0x3b   : > { %v5633_v1 = vld [vmem:[#allocation6 + $0x1dc] sm:$0xf0]  ;;  %v4663_v6 = vld [vmem:[#allocation6 + $0x1e0] sm:$0xf0]  ;;  %s6159_s24 = smov 31   ;;  %s6160_s29 = smov 32  }
  0x3c   : > { %v4917_v2 = vld [vmem:[#allocation6 + $0x3c0] sm:$0xf]  ;;  %v4662_v3 = vor.u32 %v5633_v1, %v4661_v0  ;;  %v4666_v8 = vor.u32 %v5629_v5, %v4663_v6  ;;  %v5693_v9 = vld [vmem:[#allocation6 + $0x3c4] sm:$0xf]  ;;  %s6161_s6 = smov 33   ;;  %s6162_s23 = smov 1  }
  0x3d   : > { %v5697_v4 = vld [vmem:[#allocation6 + $0x3dc] sm:$0xf0]  ;;  %v4919_v10 = vld [vmem:[#allocation6 + $0x3e0] sm:$0xf0]  ;;  %s6163_s27 = smov 127   ;;  %s6164_s28 = smov 96  }
  0x3e   : > { %v4918_v7 = vor.u32 %v5697_v4, %v4917_v2  ;;  %v4629_v11 = vld [vmem:[#allocation6 + $0x180] sm:$0xf]  ;;  %1088 = vmatpush.bf16.msra.mxu0 %v4662_v3  ;;  %v4922_v12 = vor.u32 %v5693_v9, %v4919_v10  ;;  %1126 = vmatpush.bf16.msra.mxu2 %v4666_v8  ;;  %v5621_v18 = vld [vmem:[#allocation6 + $0x184] sm:$0xf]  ;;  %s6165_s9 = smov 97   ;;  %s6166_s15 = smov 95  }
  0x3f   : > { %v5625_v13 = vld [vmem:[#allocation6 + $0x19c] sm:$0xf0]  ;;  %v4631_v19 = vld [vmem:[#allocation6 + $0x1a0] sm:$0xf0]  ;;  %vm3791_vm8 = vcmask 261120   ;;  %s6094_s30 = scalar_lea.hbm %s8772_s5, 512 }
  0x40   : > { %v4885_v14 = vld [vmem:[#allocation6 + $0x380] sm:$0xf]  ;;  %1107 = vmatpush.bf16.msra.mxu1 %v4918_v7  ;;  %v4630_v16 = vor.u32 %v5625_v13, %v4629_v11  ;;  %v5685_v20 = vld [vmem:[#allocation6 + $0x384] sm:$0xf]  ;;  %1145 = vmatpush.bf16.msra.mxu3 %v4922_v12  ;;  %v4634_v21 = vor.u32 %v5621_v18, %v4631_v19 }
  0x41   : > { %v5689_v15 = vld [vmem:[#allocation6 + $0x39c] sm:$0xf0]  ;;  %v4887_v22 = vld [vmem:[#allocation6 + $0x3a0] sm:$0xf0] }
  0x42   : > { %v4886_v17 = vor.u32 %v5689_v15, %v4885_v14  ;;  %v4597_v23 = vld [vmem:[#allocation6 + $0x140] sm:$0xf]  ;;  %v4890_v25 = vor.u32 %v5685_v20, %v4887_v22  ;;  %v5613_v28 = vld [vmem:[#allocation6 + $0x144] sm:$0xf]  ;;  %1089 = vmatpush.bf16.msra.mxu0 %v4630_v16  ;;  %1127 = vmatpush.bf16.msra.mxu2 %v4634_v21 }
  0x43   : > { %v5617_v24 = vld [vmem:[#allocation6 + $0x15c] sm:$0xf0]  ;;  %v4599_v30 = vld [vmem:[#allocation6 + $0x160] sm:$0xf0] }
  0x44   : > { %v4853_v26 = vld [vmem:[#allocation6 + $0x340] sm:$0xf]  ;;  %v4598_v29 = vor.u32 %v5617_v24, %v4597_v23  ;;  %v5677_v31 = vld [vmem:[#allocation6 + $0x344] sm:$0xf]  ;;  %1108 = vmatpush.bf16.msra.mxu1 %v4886_v17  ;;  %v4602_v34 = vor.u32 %v5613_v28, %v4599_v30  ;;  %1146 = vmatpush.bf16.msra.mxu3 %v4890_v25  ;;  %v4671_v30 = vld [vmem:[#allocation6 + $0x1e8] sm:$0xf0] }
  0x45   : > { %v5681_v27 = vld [vmem:[#allocation6 + $0x35c] sm:$0xf0]  ;;  %v4855_v32 = vld [vmem:[#allocation6 + $0x360] sm:$0xf0] }
  0x46   : > { %v4854_v33 = vor.u32 %v5681_v27, %v4853_v26  ;;  %v4565_v35 = vld [vmem:[#allocation6 + $0x100] sm:$0xf]  ;;  %v4858_v38 = vor.u32 %v5677_v31, %v4855_v32  ;;  %v5605_v40 = vld [vmem:[#allocation6 + $0x104] sm:$0xf]  ;;  %1090 = vmatpush.bf16.msra.mxu0 %v4598_v29  ;;  %1128 = vmatpush.bf16.msra.mxu2 %v4602_v34  ;;  %v5630_v29 = vld [vmem:[#allocation6 + $0x1cc] sm:$0xf] }
  0x47   : > { %v5609_v36 = vld [vmem:[#allocation6 + $0x11c] sm:$0xf0]  ;;  %v4567_v41 = vld [vmem:[#allocation6 + $0x120] sm:$0xf0]  ;;  %v5570_v32 = vld [vmem:[%s6319_s13 + $0x4] sm:$0xf0] }
  0x48   : > { %v4821_v37 = vld [vmem:[#allocation6 + $0x300] sm:$0xf]  ;;  %v5669_v42 = vld [vmem:[#allocation6 + $0x304] sm:$0xf]  ;;  %v4566_v44 = vor.u32 %v5609_v36, %v4565_v35  ;;  %1109 = vmatpush.bf16.msra.mxu1 %v4854_v33  ;;  %v4570_v46 = vor.u32 %v5605_v40, %v4567_v41  ;;  %1147 = vmatpush.bf16.msra.mxu3 %v4858_v38  ;;  %v5694_v33 = vld [vmem:[#allocation6 + $0x3cc] sm:$0xf]  ;;  %v4674_v40 = vor.u32 %v5630_v29, %v4671_v30 }
  0x49   : > { %v5673_v39 = vld [vmem:[#allocation6 + $0x31c] sm:$0xf0]  ;;  %v4823_v43 = vld [vmem:[#allocation6 + $0x320] sm:$0xf0]  ;;  %v4927_v34 = vld [vmem:[#allocation6 + $0x3e8] sm:$0xf0] }
  0x4a   : > { %v4822_v45 = vor.u32 %v5673_v39, %v4821_v37  ;;  %v4533_v47 = vld [vmem:[#allocation6 + $0xc0] sm:$0xf]  ;;  %v4826_v50 = vor.u32 %v5669_v42, %v4823_v43  ;;  %v5597_v52 = vld [vmem:[#allocation6 + $0xc4] sm:$0xf]  ;;  %1091 = vmatpush.bf16.msra.mxu0 %v4566_v44  ;;  %1129 = vmatpush.bf16.msra.mxu2 %v4570_v46  ;;  %v4423_v38 = vld [vmem:[%s6319_s13 + $0x8] sm:$0xf0] }
  0x4b   : > { %v5601_v48 = vld [vmem:[#allocation6 + $0xdc] sm:$0xf0]  ;;  %v4535_v53 = vld [vmem:[#allocation6 + $0xe0] sm:$0xf0]  ;;  %v5622_v41 = vld [vmem:[#allocation6 + $0x18c] sm:$0xf] }
  0x4c   : > { %v4789_v49 = vld [vmem:[#allocation6 + $0x2c0] sm:$0xf]  ;;  %v5661_v54 = vld [vmem:[#allocation6 + $0x2c4] sm:$0xf]  ;;  %v4534_v56 = vor.u32 %v5601_v48, %v4533_v47  ;;  %1110 = vmatpush.bf16.msra.mxu1 %v4822_v45  ;;  %v4538_v58 = vor.u32 %v5597_v52, %v4535_v53  ;;  %1148 = vmatpush.bf16.msra.mxu3 %v4826_v50  ;;  %v4669_v42 = vld [vmem:[#allocation6 + $0x1c8] sm:$0xf]  ;;  %v4930_v45 = vor.u32 %v5694_v33, %v4927_v34 }
  0x4d   : > { %v5665_v51 = vld [vmem:[#allocation6 + $0x2dc] sm:$0xf0]  ;;  %v4791_v55 = vld [vmem:[#allocation6 + $0x2e0] sm:$0xf0]  ;;  %v5634_v43 = vld [vmem:[#allocation6 + $0x1e4] sm:$0xf0] }
  0x4e   : > { %v4790_v57 = vor.u32 %v5665_v51, %v4789_v49  ;;  %v4501_v59 = vld [vmem:[#allocation6 + $0x80] sm:$0xf]  ;;  %v4794_v62 = vor.u32 %v5661_v54, %v4791_v55  ;;  %v5589_v0 = vld [vmem:[#allocation6 + $0x84] sm:$0xf]  ;;  %1092 = vmatpush.bf16.msra.mxu0 %v4534_v56  ;;  %1130 = vmatpush.bf16.msra.mxu2 %v4538_v58  ;;  %v4639_v46 = vld [vmem:[#allocation6 + $0x1a8] sm:$0xf0]  ;;  %v4670_v52 = vor.u32 %v5634_v43, %v4669_v42 }
  0x4f   : > { %v5593_v60 = vld [vmem:[#allocation6 + $0x9c] sm:$0xf0]  ;;  %v4503_v1 = vld [vmem:[#allocation6 + $0xa0] sm:$0xf0]  ;;  %v4925_v47 = vld [vmem:[#allocation6 + $0x3c8] sm:$0xf]  ;;  %v4642_v53 = vor.u32 %v5622_v41, %v4639_v46 }
  0x50   : > { %v4757_v61 = vld [vmem:[#allocation6 + $0x280] sm:$0xf]  ;;  %v5653_v2 = vld [vmem:[#allocation6 + $0x284] sm:$0xf]  ;;  %v4502_v4 = vor.u32 %v5593_v60, %v4501_v59  ;;  %1111 = vmatpush.bf16.msra.mxu1 %v4790_v57  ;;  %v4506_v6 = vor.u32 %v5589_v0, %v4503_v1  ;;  %1149 = vmatpush.bf16.msra.mxu3 %v4794_v62  ;;  %v5698_v48 = vld [vmem:[#allocation6 + $0x3e4] sm:$0xf0] }
  0x51   : > { %v5657_v63 = vld [vmem:[#allocation6 + $0x29c] sm:$0xf0]  ;;  %v4759_v3 = vld [vmem:[#allocation6 + $0x2a0] sm:$0xf0]  ;;  %v5686_v50 = vld [vmem:[#allocation6 + $0x38c] sm:$0xf]  ;;  %v4926_v54 = vor.u32 %v5698_v48, %v4925_v47 }
  0x52   : > { %v4758_v5 = vor.u32 %v5657_v63, %v4757_v61  ;;  %v4469_v7 = vld [vmem:[#allocation6 + $0x40] sm:$0xf]  ;;  %v4762_v10 = vor.u32 %v5653_v2, %v4759_v3  ;;  %v5581_v12 = vld [vmem:[#allocation6 + $0x44] sm:$0xf]  ;;  %1093 = vmatpush.bf16.msra.mxu0 %v4502_v4  ;;  %1131 = vmatpush.bf16.msra.mxu2 %v4506_v6  ;;  %v4895_v51 = vld [vmem:[#allocation6 + $0x3a8] sm:$0xf0] }
  0x53   : > { %v5585_v8 = vld [vmem:[#allocation6 + $0x5c] sm:$0xf0]  ;;  %v4471_v13 = vld [vmem:[#allocation6 + $0x60] sm:$0xf0]  ;;  %v5614_v55 = vld [vmem:[#allocation6 + $0x14c] sm:$0xf]  ;;  %v4898_v58 = vor.u32 %v5686_v50, %v4895_v51 }
  0x54   : > { %v4725_v9 = vld [vmem:[#allocation6 + $0x240] sm:$0xf]  ;;  %v5645_v14 = vld [vmem:[#allocation6 + $0x244] sm:$0xf]  ;;  %v4470_v16 = vor.u32 %v5585_v8, %v4469_v7  ;;  %1112 = vmatpush.bf16.msra.mxu1 %v4758_v5  ;;  %v4474_v20 = vor.u32 %v5581_v12, %v4471_v13  ;;  %1150 = vmatpush.bf16.msra.mxu3 %v4762_v10  ;;  %v4637_v56 = vld [vmem:[#allocation6 + $0x188] sm:$0xf] }
  0x55   : > { %v5649_v11 = vld [vmem:[#allocation6 + $0x25c] sm:$0xf0]  ;;  %v4727_v15 = vld [vmem:[#allocation6 + $0x260] sm:$0xf0]  ;;  %v5626_v57 = vld [vmem:[#allocation6 + $0x1a4] sm:$0xf0] }
  0x56   : > { %v4437_v17 = vld [vmem:[#allocation6] sm:$0xf]  ;;  %v4726_v19 = vor.u32 %v5649_v11, %v4725_v9  ;;  %v5573_v23 = vld [vmem:[#allocation6 + $0x4] sm:$0xf]  ;;  %v4730_v24 = vor.u32 %v5645_v14, %v4727_v15  ;;  %1094 = vmatpush.bf16.msra.mxu0 %v4470_v16  ;;  %1132 = vmatpush.bf16.msra.mxu2 %v4474_v20  ;;  %v4607_v59 = vld [vmem:[#allocation6 + $0x168] sm:$0xf0]  ;;  %v4638_v0 = vor.u32 %v5626_v57, %v4637_v56 }
  0x57   : > { %v5577_v18 = vld [vmem:[#allocation6 + $0x1c] sm:$0xf0]  ;;  %v4439_v25 = vld [vmem:[#allocation6 + $0x20] sm:$0xf0]  ;;  %v4893_v60 = vld [vmem:[#allocation6 + $0x388] sm:$0xf]  ;;  %v4610_v1 = vor.u32 %v5614_v55, %v4607_v59 }
  0x58   : > { %v4693_v21 = vld [vmem:[#allocation6 + $0x200] sm:$0xf]  ;;  %v5637_v26 = vld [vmem:[#allocation6 + $0x204] sm:$0xf]  ;;  %v4438_v31 = vor.u32 %v5577_v18, %v4437_v17  ;;  %1113 = vmatpush.bf16.msra.mxu1 %v4726_v19  ;;  %v4442_v36 = vor.u32 %v5573_v23, %v4439_v25  ;;  %1151 = vmatpush.bf16.msra.mxu3 %v4730_v24  ;;  %v5690_v61 = vld [vmem:[#allocation6 + $0x3a4] sm:$0xf0] }
  0x59   : > { %v5641_v22 = vld [vmem:[#allocation6 + $0x21c] sm:$0xf0]  ;;  %v4695_v27 = vld [vmem:[#allocation6 + $0x220] sm:$0xf0]  ;;  %v5678_v62 = vld [vmem:[#allocation6 + $0x34c] sm:$0xf]  ;;  %v4894_v2 = vor.u32 %v5690_v61, %v4893_v60 }
  0x5a   : > { %v4421_v28 = vld [vmem:[%s6319_s13] sm:$0xf]  ;;  %v4694_v35 = vor.u32 %v5641_v22, %v4693_v21  ;;  %v5569_v37 = vld [vmem:[%s6319_s13 + $0x4] sm:$0xf]  ;;  %v4698_v39 = vor.u32 %v5637_v26, %v4695_v27  ;;  %1095 = vmatpush.bf16.msra.mxu0 %v4438_v31  ;;  %1133 = vmatpush.bf16.msra.mxu2 %v4442_v36  ;;  %v4863_v63 = vld [vmem:[#allocation6 + $0x368] sm:$0xf0] }
  0x5b   : > { %v6337_v44 = vor.u32 %v5570_v32, %v4421_v28  ;;  %v6339_v49 = vor.u32 %v5569_v37, %v4423_v38  ;;  %v5606_v3 = vld [vmem:[#allocation6 + $0x10c] sm:$0xf]  ;;  %v4605_v4 = vld [vmem:[#allocation6 + $0x148] sm:$0xf]  ;;  %v4866_v6 = vor.u32 %v5678_v62, %v4863_v63  ;;  %v4429_v22 = vld [vmem:[%s6319_s13 + $0x10] sm:$0xf] }
  0x5c   : > { %1114 = vmatpush.bf16.msra.mxu1 %v4694_v35  ;;  %1152 = vmatpush.bf16.msra.mxu3 %v4698_v39  ;;  %v5618_v5 = vld [vmem:[#allocation6 + $0x164] sm:$0xf0]  ;;  %v4575_v7 = vld [vmem:[#allocation6 + $0x128] sm:$0xf0]  ;;  %v5572_v25 = vld [vmem:[%s6319_s13 + $0x14] sm:$0xf0] }
  0x5d   : > { %1096 = vmatmul.bf16.vlgmr.msra.gmra.mxu0 %v6337_v44  ;;  %1134 = vmatmul.bf16.vlgmr.msra.gmra.mxu2 %v6337_v44  ;;  %v4861_v8 = vld [vmem:[#allocation6 + $0x348] sm:$0xf]  ;;  %v5670_v10 = vld [vmem:[#allocation6 + $0x30c] sm:$0xf]  ;;  %v4606_v12 = vor.u32 %v5618_v5, %v4605_v4  ;;  %v4578_v13 = vor.u32 %v5606_v3, %v4575_v7  ;;  %v5571_v26 = vld [vmem:[%s6319_s13 + $0x14] sm:$0xf]  ;;  %v6349_v38 = vor.u32 %v5572_v25, %v4429_v22 }
  0x5e   : > { %1202 = vmatpush.bf16.msrb.mxu2 %v4674_v40  ;;  %1164 = vmatpush.bf16.msrb.mxu0 %v4670_v52  ;;  %v5682_v9 = vld [vmem:[#allocation6 + $0x364] sm:$0xf0]  ;;  %v4831_v11 = vld [vmem:[#allocation6 + $0x328] sm:$0xf0]  ;;  %v4431_v27 = vld [vmem:[%s6319_s13 + $0x18] sm:$0xf0] }
  0x5f   : > { %1115 = vmatmul.bf16.vlgmr.msra.gmra.mxu1 %v6339_v49  ;;  %1153 = vmatmul.bf16.vlgmr.msra.gmra.mxu3 %v6339_v49  ;;  %v4862_v14 = vor.u32 %v5682_v9, %v4861_v8  ;;  %v5598_v15 = vld [vmem:[#allocation6 + $0xcc] sm:$0xf]  ;;  %v4573_v16 = vld [vmem:[#allocation6 + $0x108] sm:$0xf]  ;;  %v4834_v18 = vor.u32 %v5670_v10, %v4831_v11  ;;  %v6351_v41 = vor.u32 %v5571_v26, %v4431_v27  ;;  %v5631_v4 = vld [vmem:[#allocation6 + $0x1d4] sm:$0xf] }
  0x60   : > { %1221 = vmatpush.bf16.msrb.mxu3 %v4930_v45  ;;  %1183 = vmatpush.bf16.msrb.mxu1 %v4926_v54  ;;  %v5610_v17 = vld [vmem:[#allocation6 + $0x124] sm:$0xf0]  ;;  %v4543_v19 = vld [vmem:[#allocation6 + $0xe8] sm:$0xf0]  ;;  %v4679_v5 = vld [vmem:[#allocation6 + $0x1f0] sm:$0xf0] }
  0x61   : > { %v4829_v20 = vld [vmem:[#allocation6 + $0x308] sm:$0xf]  ;;  %v5662_v23 = vld [vmem:[#allocation6 + $0x2cc] sm:$0xf]  ;;  %v4574_v28 = vor.u32 %v5610_v17, %v4573_v16  ;;  %v4546_v29 = vor.u32 %v5598_v15, %v4543_v19  ;;  %v5695_v7 = vld [vmem:[#allocation6 + $0x3d4] sm:$0xf]  ;;  %v4682_v16 = vor.u32 %v5631_v4, %v4679_v5 }
  0x62   : > { %1203 = vmatpush.bf16.msrb.mxu2 %v4642_v53  ;;  %1165 = vmatpush.bf16.msrb.mxu0 %v4638_v0  ;;  %v5674_v21 = vld [vmem:[#allocation6 + $0x324] sm:$0xf0]  ;;  %v4799_v24 = vld [vmem:[#allocation6 + $0x2e8] sm:$0xf0]  ;;  %v4935_v8 = vld [vmem:[#allocation6 + $0x3f0] sm:$0xf0] }
  0x63   : > { %v4830_v30 = vor.u32 %v5674_v21, %v4829_v20  ;;  %v5590_v31 = vld [vmem:[#allocation6 + $0x8c] sm:$0xf]  ;;  %v4541_v32 = vld [vmem:[#allocation6 + $0xc8] sm:$0xf]  ;;  %v4802_v34 = vor.u32 %v5662_v23, %v4799_v24  ;;  %v4938_v17 = vor.u32 %v5695_v7, %v4935_v8  ;;  %v5623_v20 = vld [vmem:[#allocation6 + $0x194] sm:$0xf] }
  0x64   : > { %1222 = vmatpush.bf16.msrb.mxu3 %v4898_v58  ;;  %1184 = vmatpush.bf16.msrb.mxu1 %v4894_v2  ;;  %v5602_v33 = vld [vmem:[#allocation6 + $0xe4] sm:$0xf0]  ;;  %v4511_v35 = vld [vmem:[#allocation6 + $0xa8] sm:$0xf0]  ;;  %v4647_v21 = vld [vmem:[#allocation6 + $0x1b0] sm:$0xf0] }
  0x65   : > { %v4797_v36 = vld [vmem:[#allocation6 + $0x2c8] sm:$0xf]  ;;  %v5654_v39 = vld [vmem:[#allocation6 + $0x28c] sm:$0xf]  ;;  %v4542_v42 = vor.u32 %v5602_v33, %v4541_v32  ;;  %v4514_v43 = vor.u32 %v5590_v31, %v4511_v35  ;;  %v5687_v22 = vld [vmem:[#allocation6 + $0x394] sm:$0xf]  ;;  %v4650_v23 = vor.u32 %v5623_v20, %v4647_v21 }
  0x66   : > { %1204 = vmatpush.bf16.msrb.mxu2 %v4610_v1  ;;  %1166 = vmatpush.bf16.msrb.mxu0 %v4606_v12  ;;  %v5666_v37 = vld [vmem:[#allocation6 + $0x2e4] sm:$0xf0]  ;;  %v4767_v40 = vld [vmem:[#allocation6 + $0x2a8] sm:$0xf0]  ;;  %v4903_v24 = vld [vmem:[#allocation6 + $0x3b0] sm:$0xf0] }
  0x67   : > { %v4798_v45 = vor.u32 %v5666_v37, %v4797_v36  ;;  %v5582_v46 = vld [vmem:[#allocation6 + $0x4c] sm:$0xf]  ;;  %v4509_v47 = vld [vmem:[#allocation6 + $0x88] sm:$0xf]  ;;  %v4770_v50 = vor.u32 %v5654_v39, %v4767_v40  ;;  %v4906_v25 = vor.u32 %v5687_v22, %v4903_v24  ;;  %v4677_v26 = vld [vmem:[#allocation6 + $0x1d0] sm:$0xf] }
  0x68   : > { %1223 = vmatpush.bf16.msrb.mxu3 %v4866_v6  ;;  %1185 = vmatpush.bf16.msrb.mxu1 %v4862_v14  ;;  %v5594_v48 = vld [vmem:[#allocation6 + $0xa4] sm:$0xf0]  ;;  %v4479_v51 = vld [vmem:[#allocation6 + $0x68] sm:$0xf0]  ;;  %v5635_v27 = vld [vmem:[#allocation6 + $0x1ec] sm:$0xf0] }
  0x69   : > { %v4765_v52 = vld [vmem:[#allocation6 + $0x288] sm:$0xf]  ;;  %v5646_v54 = vld [vmem:[#allocation6 + $0x24c] sm:$0xf]  ;;  %v4510_v56 = vor.u32 %v5594_v48, %v4509_v47  ;;  %v4482_v58 = vor.u32 %v5582_v46, %v4479_v51  ;;  %v5615_v32 = vld [vmem:[#allocation6 + $0x154] sm:$0xf] }
  0x6a   : > { %1205 = vmatpush.bf16.msrb.mxu2 %v4578_v13  ;;  %1167 = vmatpush.bf16.msrb.mxu0 %v4574_v28  ;;  %v5658_v53 = vld [vmem:[#allocation6 + $0x2a4] sm:$0xf0]  ;;  %v4735_v55 = vld [vmem:[#allocation6 + $0x268] sm:$0xf0]  ;;  %v4933_v28 = vld [vmem:[#allocation6 + $0x3d0] sm:$0xf] }
  0x6b   : > { %v5574_v57 = vld [vmem:[#allocation6 + $0xc] sm:$0xf]  ;;  %v4766_v59 = vor.u32 %v5658_v53, %v4765_v52  ;;  %v4477_v61 = vld [vmem:[#allocation6 + $0x48] sm:$0xf]  ;;  %v4738_v63 = vor.u32 %v5646_v54, %v4735_v55  ;;  %v4615_v33 = vld [vmem:[#allocation6 + $0x170] sm:$0xf0] }
  0x6c   : > { %1224 = vmatpush.bf16.msrb.mxu3 %v4834_v18  ;;  %1186 = vmatpush.bf16.msrb.mxu1 %v4830_v30  ;;  %v4447_v60 = vld [vmem:[#allocation6 + $0x28] sm:$0xf0]  ;;  %v5586_v62 = vld [vmem:[#allocation6 + $0x64] sm:$0xf0]  ;;  %v5699_v30 = vld [vmem:[#allocation6 + $0x3ec] sm:$0xf0]  ;;  %v4618_v35 = vor.u32 %v5615_v32, %v4615_v33 }
  0x6d   : > { %1101 = vmatmul.bf16.gmra.mxu0 %v6349_v38  ;;  %1139 = vmatmul.bf16.gmra.mxu2 %v6349_v38  ;;  %v5638_v0 = vld [vmem:[#allocation6 + $0x20c] sm:$0xf]  ;;  %v4733_v1 = vld [vmem:[#allocation6 + $0x248] sm:$0xf]  ;;  %v4478_v6 = vor.u32 %v5586_v62, %v4477_v61  ;;  %v4450_v9 = vor.u32 %v5574_v57, %v4447_v60  ;;  %v4934_v31 = vor.u32 %v5699_v30, %v4933_v28  ;;  %v4871_v36 = vld [vmem:[#allocation6 + $0x370] sm:$0xf0] }
  0x6e   : > { %1206 = vmatpush.bf16.msrb.mxu2 %v4546_v29  ;;  %1168 = vmatpush.bf16.msrb.mxu0 %v4542_v42  ;;  %v5650_v2 = vld [vmem:[#allocation6 + $0x264] sm:$0xf0]  ;;  %v4703_v3 = vld [vmem:[#allocation6 + $0x228] sm:$0xf0]  ;;  %v4678_v29 = vor.u32 %v5635_v27, %v4677_v26  ;;  %v4645_v39 = vld [vmem:[#allocation6 + $0x190] sm:$0xf] }
  0x6f   : > { %1120 = vmatmul.bf16.gmra.mxu1 %v6351_v41  ;;  %1158 = vmatmul.bf16.gmra.mxu3 %v6351_v41  ;;  %v4734_v10 = vor.u32 %v5650_v2, %v4733_v1  ;;  %v4445_v11 = vld [vmem:[#allocation6 + $0x8] sm:$0xf]  ;;  %v4706_v13 = vor.u32 %v5638_v0, %v4703_v3  ;;  %v5627_v40 = vld [vmem:[#allocation6 + $0x1ac] sm:$0xf0]  ;;  %v5607_v47 = vld [vmem:[#allocation6 + $0x114] sm:$0xf] }
  0x70   : > { %1225 = vmatpush.bf16.msrb.mxu3 %v4802_v34  ;;  %1187 = vmatpush.bf16.msrb.mxu1 %v4798_v45  ;;  %v5578_v12 = vld [vmem:[#allocation6 + $0x24] sm:$0xf0]  ;;  %v5679_v34 = vld [vmem:[#allocation6 + $0x354] sm:$0xf]  ;;  %v4901_v42 = vld [vmem:[#allocation6 + $0x390] sm:$0xf] }
  0x71   : > { %v4701_v14 = vld [vmem:[#allocation6 + $0x208] sm:$0xf]  ;;  %v4446_v18 = vor.u32 %v5578_v12, %v4445_v11  ;;  %v4874_v37 = vor.u32 %v5679_v34, %v4871_v36  ;;  %v5691_v45 = vld [vmem:[#allocation6 + $0x3ac] sm:$0xf0]  ;;  %v4583_v48 = vld [vmem:[#allocation6 + $0x130] sm:$0xf0] }
  0x72   : > { %1207 = vmatpush.bf16.msrb.mxu2 %v4514_v43  ;;  %1169 = vmatpush.bf16.msrb.mxu0 %v4510_v56  ;;  %v5642_v15 = vld [vmem:[#allocation6 + $0x224] sm:$0xf0]  ;;  %v4646_v43 = vor.u32 %v5627_v40, %v4645_v39  ;;  %v4902_v46 = vor.u32 %v5691_v45, %v4901_v42  ;;  %v4586_v51 = vor.u32 %v5607_v47, %v4583_v48  ;;  %v4839_v52 = vld [vmem:[#allocation6 + $0x330] sm:$0xf0]  ;;  %v4613_v54 = vld [vmem:[#allocation6 + $0x150] sm:$0xf] }
  0x73   : > { %v4702_v19 = vor.u32 %v5642_v15, %v4701_v14  ;;  %v5619_v55 = vld [vmem:[#allocation6 + $0x16c] sm:$0xf0]  ;;  %v5599_v60 = vld [vmem:[#allocation6 + $0xd4] sm:$0xf] }
  0x74   : > { %1226 = vmatpush.bf16.msrb.mxu3 %v4770_v50  ;;  %1188 = vmatpush.bf16.msrb.mxu1 %v4766_v59  ;;  %v5671_v50 = vld [vmem:[#allocation6 + $0x314] sm:$0xf]  ;;  %v4869_v56 = vld [vmem:[#allocation6 + $0x350] sm:$0xf]  ;;  %v4614_v57 = vor.u32 %v5619_v55, %v4613_v54 }
  0x75   : > { %v4842_v53 = vor.u32 %v5671_v50, %v4839_v52  ;;  %v4551_v61 = vld [vmem:[#allocation6 + $0xf0] sm:$0xf0]  ;;  %v4581_v2 = vld [vmem:[#allocation6 + $0x110] sm:$0xf] }
  0x76   : > { %1208 = vmatpush.bf16.msrb.mxu2 %v4482_v58  ;;  %1170 = vmatpush.bf16.msrb.mxu0 %v4478_v6  ;;  %v5683_v58 = vld [vmem:[#allocation6 + $0x36c] sm:$0xf0]  ;;  %v5663_v62 = vld [vmem:[#allocation6 + $0x2d4] sm:$0xf] }
  0x77   : > { %v4870_v59 = vor.u32 %v5683_v58, %v4869_v56  ;;  %v4807_v0 = vld [vmem:[#allocation6 + $0x2f0] sm:$0xf0]  ;;  %v5611_v3 = vld [vmem:[#allocation6 + $0x12c] sm:$0xf0] }
  0x78   : > { %1227 = vmatpush.bf16.msrb.mxu3 %v4738_v63  ;;  %1189 = vmatpush.bf16.msrb.mxu1 %v4734_v10  ;;  %v4554_v63 = vor.u32 %v5599_v60, %v4551_v61  ;;  %v4810_v1 = vor.u32 %v5663_v62, %v4807_v0  ;;  %v4837_v4 = vld [vmem:[#allocation6 + $0x310] sm:$0xf]  ;;  %v4582_v5 = vor.u32 %v5611_v3, %v4581_v2  ;;  %v5591_v8 = vld [vmem:[#allocation6 + $0x94] sm:$0xf] }
  0x79   : > { %v5675_v6 = vld [vmem:[#allocation6 + $0x32c] sm:$0xf0]  ;;  %v5655_v10 = vld [vmem:[#allocation6 + $0x294] sm:$0xf] }
  0x7a   : > { %1209 = vmatpush.bf16.msrb.mxu2 %v4450_v9  ;;  %1171 = vmatpush.bf16.msrb.mxu0 %v4446_v18  ;;  %v4838_v7 = vor.u32 %v5675_v6, %v4837_v4  ;;  %v4519_v9 = vld [vmem:[#allocation6 + $0xb0] sm:$0xf0]  ;;  %v4549_v14 = vld [vmem:[#allocation6 + $0xd0] sm:$0xf] }
  0x7b   : > { %v4522_v11 = vor.u32 %v5591_v8, %v4519_v9  ;;  %v4775_v12 = vld [vmem:[#allocation6 + $0x2b0] sm:$0xf0]  ;;  %v5603_v15 = vld [vmem:[#allocation6 + $0xec] sm:$0xf0] }
  0x7c   : > { %1228 = vmatpush.bf16.msrb.mxu3 %v4706_v13  ;;  %1190 = vmatpush.bf16.msrb.mxu1 %v4702_v19  ;;  %v4778_v13 = vor.u32 %v5655_v10, %v4775_v12  ;;  %v5667_v18 = vld [vmem:[#allocation6 + $0x2ec] sm:$0xf0]  ;;  %v5583_v20 = vld [vmem:[#allocation6 + $0x54] sm:$0xf]  ;;  %v4687_v12 = vld [vmem:[#allocation6 + $0x1f8] sm:$0xf0] }
  0x7d   : > { %1210 = vmatmul.bf16.vlgmr.msrb.gmra.mxu2 %v6337_v44  ;;  %1172 = vmatmul.bf16.vlgmr.msrb.gmra.mxu0 %v6337_v44  ;;  %v4487_v21 = vld [vmem:[#allocation6 + $0x70] sm:$0xf0]  ;;  %v4517_v26 = vld [vmem:[#allocation6 + $0x90] sm:$0xf] }
  0x7e   : > { %1278 = vmatpush.bf16.msra.mxu2 %v4682_v16  ;;  %1240 = vmatpush.bf16.msra.mxu0 %v4678_v29  ;;  %v4805_v16 = vld [vmem:[#allocation6 + $0x2d0] sm:$0xf]  ;;  %v5647_v22 = vld [vmem:[#allocation6 + $0x254] sm:$0xf] }
  0x7f   : > { %1229 = vmatmul.bf16.vlgmr.msrb.gmra.mxu3 %v6339_v49  ;;  %1191 = vmatmul.bf16.vlgmr.msrb.gmra.mxu1 %v6339_v49  ;;  %v4806_v19 = vor.u32 %v5667_v18, %v4805_v16  ;;  %v4743_v24 = vld [vmem:[#allocation6 + $0x270] sm:$0xf0]  ;;  %v5595_v27 = vld [vmem:[#allocation6 + $0xac] sm:$0xf0]  ;;  %v5624_v18 = vld [vmem:[#allocation6 + $0x19c] sm:$0xf] }
  0x80   : > { %1297 = vmatpush.bf16.msra.mxu3 %v4938_v17  ;;  %1259 = vmatpush.bf16.msra.mxu1 %v4934_v31  ;;  %v4550_v17 = vor.u32 %v5603_v15, %v4549_v14  ;;  %v4773_v28 = vld [vmem:[#allocation6 + $0x290] sm:$0xf]  ;;  %v4518_v29 = vor.u32 %v5595_v27, %v4517_v26  ;;  %v5575_v32 = vld [vmem:[#allocation6 + $0x14] sm:$0xf] }
  0x81   : > { %v5659_v30 = vld [vmem:[#allocation6 + $0x2ac] sm:$0xf0]  ;;  %v4455_v33 = vld [vmem:[#allocation6 + $0x30] sm:$0xf0] }
  0x82   : > { %1279 = vmatpush.bf16.msra.mxu2 %v4650_v23  ;;  %1241 = vmatpush.bf16.msra.mxu0 %v4646_v43  ;;  %v4490_v23 = vor.u32 %v5583_v20, %v4487_v21  ;;  %v4774_v31 = vor.u32 %v5659_v30, %v4773_v28  ;;  %v5639_v34 = vld [vmem:[#allocation6 + $0x214] sm:$0xf]  ;;  %v4485_v39 = vld [vmem:[#allocation6 + $0x50] sm:$0xf]  ;;  %v5636_v30 = vld [vmem:[#allocation6 + $0x1f4] sm:$0xf0] }
  0x83   : > { %v4711_v36 = vld [vmem:[#allocation6 + $0x230] sm:$0xf0]  ;;  %v5587_v40 = vld [vmem:[#allocation6 + $0x6c] sm:$0xf0] }
  0x84   : > { %1298 = vmatpush.bf16.msra.mxu3 %v4906_v25  ;;  %1260 = vmatpush.bf16.msra.mxu1 %v4902_v46  ;;  %v4746_v25 = vor.u32 %v5647_v22, %v4743_v24  ;;  %v4741_v42 = vld [vmem:[#allocation6 + $0x250] sm:$0xf]  ;;  %v4486_v43 = vor.u32 %v5587_v40, %v4485_v39  ;;  %v5688_v22 = vld [vmem:[#allocation6 + $0x39c] sm:$0xf] }
  0x85   : > { %v5651_v45 = vld [vmem:[#allocation6 + $0x26c] sm:$0xf0] }
  0x86   : > { %1280 = vmatpush.bf16.msra.mxu2 %v4618_v35  ;;  %1242 = vmatpush.bf16.msra.mxu0 %v4614_v57  ;;  %v4458_v35 = vor.u32 %v5575_v32, %v4455_v33  ;;  %v4742_v46 = vor.u32 %v5651_v45, %v4741_v42  ;;  %v4453_v47 = vld [vmem:[#allocation6 + $0x10] sm:$0xf]  ;;  %v5700_v33 = vld [vmem:[#allocation6 + $0x3f4] sm:$0xf0]  ;;  %v4879_v42 = vld [vmem:[#allocation6 + $0x378] sm:$0xf0] }
  0x87   : > { %v5579_v48 = vld [vmem:[#allocation6 + $0x2c] sm:$0xf0]  ;;  %v5628_v45 = vld [vmem:[#allocation6 + $0x1b4] sm:$0xf0] }
  0x88   : > { %1299 = vmatpush.bf16.msra.mxu3 %v4874_v37  ;;  %1261 = vmatpush.bf16.msra.mxu1 %v4870_v59  ;;  %v4714_v37 = vor.u32 %v5639_v34, %v4711_v36  ;;  %v4709_v50 = vld [vmem:[#allocation6 + $0x210] sm:$0xf]  ;;  %v4454_v52 = vor.u32 %v5579_v48, %v4453_v47  ;;  %v4623_v36 = vld [vmem:[#allocation6 + $0x178] sm:$0xf0]  ;;  %v4909_v48 = vld [vmem:[#allocation6 + $0x398] sm:$0xf] }
  0x8a   : > { %1281 = vmatpush.bf16.msra.mxu2 %v4586_v51  ;;  %1243 = vmatpush.bf16.msra.mxu0 %v4582_v5 }
  0x8c   : > { %1300 = vmatpush.bf16.msra.mxu3 %v4842_v53  ;;  %1262 = vmatpush.bf16.msra.mxu1 %v4838_v7  ;;  %v5643_v53 = vld [vmem:[#allocation6 + $0x22c] sm:$0xf0] }
  0x8d   : > { %1215 = vmatmul.bf16.gmra.mxu2 %v6349_v38  ;;  %1177 = vmatmul.bf16.gmra.mxu0 %v6349_v38  ;;  %v4710_v55 = vor.u32 %v5643_v53, %v4709_v50  ;;  %v5692_v50 = vld [vmem:[#allocation6 + $0x3b4] sm:$0xf0]  ;;  %v4591_v53 = vld [vmem:[#allocation6 + $0x138] sm:$0xf0] }
  0x8e   : > { %1282 = vmatpush.bf16.msra.mxu2 %v4554_v63  ;;  %1244 = vmatpush.bf16.msra.mxu0 %v4550_v17  ;;  %v4943_v17 = vld [vmem:[#allocation6 + $0x3f8] sm:$0xf0] }
  0x8f   : > { %1234 = vmatmul.bf16.gmra.mxu3 %v6351_v41  ;;  %1196 = vmatmul.bf16.gmra.mxu1 %v6351_v41 }
  0x90   : > { %1301 = vmatpush.bf16.msra.mxu3 %v4810_v1  ;;  %1263 = vmatpush.bf16.msra.mxu1 %v4806_v19  ;;  %v4655_v19 = vld [vmem:[#allocation6 + $0x1b8] sm:$0xf0] }
  0x91   : > { %v4658_v27 = vor.u32 %v5624_v18, %v4655_v19  ;;  %v4845_v19 = vld [vmem:[#allocation6 + $0x318] sm:$0xf] }
  0x92   : > { %1283 = vmatpush.bf16.msra.mxu2 %v4522_v11  ;;  %1245 = vmatpush.bf16.msra.mxu0 %v4518_v29  ;;  %v5632_v11 = vld [vmem:[#allocation6 + $0x1dc] sm:$0xf]  ;;  %v4685_v29 = vld [vmem:[#allocation6 + $0x1d8] sm:$0xf] }
  0x93   : > { %v4690_v16 = vor.u32 %v5632_v11, %v4687_v12  ;;  %v4686_v32 = vor.u32 %v5636_v30, %v4685_v29  ;;  %v4815_v12 = vld [vmem:[#allocation6 + $0x2f8] sm:$0xf0]  ;;  %v4557_v30 = vld [vmem:[#allocation6 + $0xd8] sm:$0xf] }
  0x94   : > { %1302 = vmatpush.bf16.msra.mxu3 %v4778_v13  ;;  %1264 = vmatpush.bf16.msra.mxu1 %v4774_v31  ;;  %v5696_v13 = vld [vmem:[#allocation6 + $0x3dc] sm:$0xf]  ;;  %v4941_v31 = vld [vmem:[#allocation6 + $0x3d8] sm:$0xf] }
  0x95   : > { %v4946_v21 = vor.u32 %v5696_v13, %v4943_v17  ;;  %v4942_v34 = vor.u32 %v5700_v33, %v4941_v31  ;;  %v5604_v31 = vld [vmem:[#allocation6 + $0xf4] sm:$0xf0] }
  0x96   : > { %1284 = vmatpush.bf16.msra.mxu2 %v4490_v23  ;;  %1246 = vmatpush.bf16.msra.mxu0 %v4486_v43  ;;  %v4911_v23 = vld [vmem:[#allocation6 + $0x3b8] sm:$0xf0]  ;;  %v4653_v43 = vld [vmem:[#allocation6 + $0x198] sm:$0xf]  ;;  %v4558_v33 = vor.u32 %v5604_v31, %v4557_v30 }
  0x97   : > { %v4914_v28 = vor.u32 %v5688_v22, %v4911_v23  ;;  %v4654_v47 = vor.u32 %v5628_v45, %v4653_v43  ;;  %v4527_v23 = vld [vmem:[#allocation6 + $0xb8] sm:$0xf0]  ;;  %v4525_v43 = vld [vmem:[#allocation6 + $0x98] sm:$0xf] }
  0x98   : > { %1303 = vmatpush.bf16.msra.mxu3 %v4746_v25  ;;  %1265 = vmatpush.bf16.msra.mxu1 %v4742_v46  ;;  %v5596_v45 = vld [vmem:[#allocation6 + $0xb4] sm:$0xf0] }
  0x9a   : > { %1285 = vmatpush.bf16.msra.mxu2 %v4458_v35  ;;  %1247 = vmatpush.bf16.msra.mxu0 %v4454_v52  ;;  %v5616_v35 = vld [vmem:[#allocation6 + $0x15c] sm:$0xf]  ;;  %v4910_v52 = vor.u32 %v5692_v50, %v4909_v48  ;;  %v4526_v50 = vor.u32 %v5596_v45, %v4525_v43 }
  0x9b   : > { %v4626_v40 = vor.u32 %v5616_v35, %v4623_v36  ;;  %v5584_v36 = vld [vmem:[#allocation6 + $0x5c] sm:$0xf] }
  0x9c   : > { %1304 = vmatpush.bf16.msra.mxu3 %v4714_v37  ;;  %1266 = vmatpush.bf16.msra.mxu1 %v4710_v55  ;;  %v5680_v37 = vld [vmem:[#allocation6 + $0x35c] sm:$0xf] }
  0x9d   : > { %1286 = vmatmul.bf16.vlgmr.msra.gmra.mxu2 %v6337_v44  ;;  %1248 = vmatmul.bf16.vlgmr.msra.gmra.mxu0 %v6337_v44  ;;  %v4882_v46 = vor.u32 %v5680_v37, %v4879_v42  ;;  %v4847_v55 = vld [vmem:[#allocation6 + $0x338] sm:$0xf0] }
  0x9e   : > { %1354 = vmatpush.bf16.msrb.mxu2 %v4690_v16  ;;  %1316 = vmatpush.bf16.msrb.mxu0 %v4686_v32  ;;  %v5612_v16 = vld [vmem:[#allocation6 + $0x134] sm:$0xf0]  ;;  %v4495_v37 = vld [vmem:[#allocation6 + $0x78] sm:$0xf0] }
  0x9f   : > { %1305 = vmatmul.bf16.vlgmr.msra.gmra.mxu3 %v6339_v49  ;;  %1267 = vmatmul.bf16.vlgmr.msra.gmra.mxu1 %v6339_v49  ;;  %v4813_v32 = vld [vmem:[#allocation6 + $0x2d8] sm:$0xf]  ;;  %v4751_v42 = vld [vmem:[#allocation6 + $0x278] sm:$0xf0] }
  0xa0   : > { %1373 = vmatpush.bf16.msrb.mxu3 %v4946_v21  ;;  %1335 = vmatpush.bf16.msrb.mxu1 %v4942_v34  ;;  %v5592_v21 = vld [vmem:[#allocation6 + $0x9c] sm:$0xf]  ;;  %v5668_v34 = vld [vmem:[#allocation6 + $0x2f4] sm:$0xf0] }
  0xa1   : > { %v4814_v35 = vor.u32 %v5668_v34, %v4813_v32 }
  0xa2   : > { %1355 = vmatpush.bf16.msrb.mxu2 %v4658_v27  ;;  %1317 = vmatpush.bf16.msrb.mxu0 %v4654_v47  ;;  %v4783_v27 = vld [vmem:[#allocation6 + $0x2b8] sm:$0xf0] }
  0xa4   : > { %1374 = vmatpush.bf16.msrb.mxu3 %v4914_v28  ;;  %1336 = vmatpush.bf16.msrb.mxu1 %v4910_v52  ;;  %v4530_v28 = vor.u32 %v5592_v21, %v4527_v23  ;;  %v5660_v52 = vld [vmem:[#allocation6 + $0x2b4] sm:$0xf0] }
  0xa6   : > { %1356 = vmatpush.bf16.msrb.mxu2 %v4626_v40  ;;  %v4498_v40 = vor.u32 %v5584_v36, %v4495_v37 }
  0xa8   : > { %1375 = vmatpush.bf16.msrb.mxu3 %v4882_v46 }
  0xad   : > { %1291 = vmatmul.bf16.gmra.mxu2 %v6349_v38  ;;  %1253 = vmatmul.bf16.gmra.mxu0 %v6349_v38 }
  0xaf   : > { %1310 = vmatmul.bf16.gmra.mxu3 %v6351_v41  ;;  %1272 = vmatmul.bf16.gmra.mxu1 %v6351_v41 }
  0xda   : > { %v1097_v51 = vpop.f32.mrf.mxu0 }
  0xdc   : > { %v1116_v54 = vpop.f32.mrf.mxu1 }
  0xdd   : > { %v6367_v56 = vadd.f32 %v1116_v54, %v1097_v51  ;;  %v5608_v51 = vld [vmem:[#allocation6 + $0x11c] sm:$0xf] }
  0xde   : > { %v5672_v54 = vld [vmem:[#allocation6 + $0x31c] sm:$0xf] }
  0xdf   : > { %1753 = vrot.lane.b32.xlu1 %v6367_v56, %s6159_s24  ;;  %1573 = vrot.lane.b32.xlu2 %v6367_v56, %s6160_s29 }
  0xe0   : > { %1392 = vrot.lane.b32.xlu0 %v6367_v56, %s6161_s6  ;;  %v1135_v57 = vpop.f32.mrf.mxu2 }
  0xe2   : > { %v1154_v58 = vpop.f32.mrf.mxu3  ;;  %v1099_v61 = vpop.f32.mrf.mxu0 }
  0xe3   : > { %v6377_v59 = vadd.f32 %v1154_v58, %v1135_v57  ;;  %v4594_v57 = vor.u32 %v5608_v51, %v4591_v53  ;;  %v4850_v58 = vor.u32 %v5672_v54, %v4847_v55  ;;  %v4781_v51 = vld [vmem:[#allocation6 + $0x298] sm:$0xf]  ;;  %v5576_v53 = vld [vmem:[#allocation6 + $0x1c] sm:$0xf] }
  0xe4   : > { %v1118_v62 = vpop.f32.mrf.mxu1 }
  0xe5   : > { %8864 = vst [vmem:[#allocation16_spill] sm:$0xff] %v6377_v59  ;;  %v2113_v60 = vpack.c.bf16 %v6377_v59, %v6367_v56  ;;  %v6389_v1 = vadd.f32 %v1118_v62, %v1099_v61  ;;  %v5620_v61 = vld [vmem:[#allocation6 + $0x174] sm:$0xf0]  ;;  %1357 = vmatpush.bf16.msrb.mxu2 %v4594_v57  ;;  %1376 = vmatpush.bf16.msrb.mxu3 %v4850_v58  ;;  %v4463_v58 = vld [vmem:[#allocation6 + $0x38] sm:$0xf0] }
  0xe6   : > { %v4877_v62 = vld [vmem:[#allocation6 + $0x358] sm:$0xf]  ;;  %v4782_v57 = vor.u32 %v5660_v52, %v4781_v51 }
  0xe7   : > { %1941 = vrot.lane.b32.xlu1 %v6377_v59, %s6162_s23  ;;  %1400 = vrot.lane.b32.xlu2 %v6377_v59, %s6161_s6  ;;  %2129 = vst [vmem:[#allocation2 + $0x200] sm:$0xff] %v2113_v60  ;;  %v4621_v60 = vld [vmem:[#allocation6 + $0x158] sm:$0xf] }
  0xe8   : > { %1933 = vrot.lane.b32.xlu0 %v6367_v56, %s6162_s23  ;;  %v1137_v63 = vpop.f32.mrf.mxu2  ;;  %8865 = vst [vmem:[#allocation17_spill] sm:$0xff] %v6389_v1 }
  0xea   : > { %v1156_v0 = vpop.f32.mrf.mxu3  ;;  %v1102_v4 = vpop.f32.mrf.mxu0 }
  0xeb   : > { %v6391_v2 = vadd.f32 %v1156_v0, %v1137_v63  ;;  %v4622_v63 = vor.u32 %v5620_v61, %v4621_v60  ;;  %v5684_v0 = vld [vmem:[#allocation6 + $0x374] sm:$0xf0]  ;;  %v5640_v60 = vld [vmem:[#allocation6 + $0x21c] sm:$0xf] }
  0xec   : > { %v1121_v5 = vpop.f32.mrf.mxu1  ;;  %v4719_v61 = vld [vmem:[#allocation6 + $0x238] sm:$0xf0] }
  0xed   : > { %8866 = vst [vmem:[#allocation18_spill] sm:$0xff] %v6391_v2  ;;  %v2117_v3 = vpack.c.bf16 %v6391_v2, %v6389_v1  ;;  %v6403_v8 = vadd.f32 %v1121_v5, %v1102_v4  ;;  %v5600_v4 = vld [vmem:[#allocation6 + $0xdc] sm:$0xf]  ;;  %1318 = vmatpush.bf16.msrb.mxu0 %v4622_v63  ;;  %v4722_v63 = vor.u32 %v5640_v60, %v4719_v61 }
  0xee   : > { %v4559_v5 = vld [vmem:[#allocation6 + $0xf8] sm:$0xf0] }
  0xef   : > { %1935 = vrot.lane.b32.xlu1 %v6389_v1, %s6162_s23  ;;  %1761 = vrot.lane.b32.xlu2 %v6377_v59, %s6159_s24  ;;  %2133 = vst [vmem:[#allocation2 + $0x220] sm:$0xff] %v2117_v3  ;;  %v4878_v3 = vor.u32 %v5684_v0, %v4877_v62  ;;  %v4562_v11 = vor.u32 %v5600_v4, %v4559_v5  ;;  %v4493_v5 = vld [vmem:[#allocation6 + $0x58] sm:$0xf] }
  0xf0   : > { %1581 = vrot.lane.b32.xlu0 %v6377_v59, %s6160_s29  ;;  %v1140_v6 = vpop.f32.mrf.mxu2  ;;  %v4466_v62 = vor.u32 %v5576_v53, %v4463_v58  ;;  %v6723_v59 = vld [vmem:[#allocation9] sm:$0xff] }
  0xf1   : > { %1337 = vmatpush.bf16.msrb.mxu1 %v4878_v3  ;;  %1358 = vmatpush.bf16.msrb.mxu2 %v4562_v11  ;;  %v4749_v11 = vld [vmem:[#allocation6 + $0x258] sm:$0xf] }
  0xf2   : > { %v1159_v7 = vpop.f32.mrf.mxu3  ;;  %v1104_v14 = vpop.f32.mrf.mxu0 }
  0xf3   : > { %v6405_v9 = vadd.f32 %v1159_v7, %v1140_v6  ;;  %v5664_v6 = vld [vmem:[#allocation6 + $0x2dc] sm:$0xf] }
  0xf4   : > { %v1123_v15 = vpop.f32.mrf.mxu1  ;;  %v4818_v17 = vor.u32 %v5664_v6, %v4815_v12  ;;  %v5588_v6 = vld [vmem:[#allocation6 + $0x74] sm:$0xf0] }
  0xf5   : > { %8867 = vst [vmem:[#allocation19_spill] sm:$0xff] %v6405_v9  ;;  %v2121_v10 = vpack.c.bf16 %v6405_v9, %v6403_v8  ;;  %v6415_v25 = vadd.f32 %v1123_v15, %v1104_v14  ;;  %v4589_v15 = vld [vmem:[#allocation6 + $0x118] sm:$0xf]  ;;  %1359 = vmatpush.bf16.msrb.mxu2 %v4530_v28  ;;  %v4494_v12 = vor.u32 %v5588_v6, %v4493_v5 }
  0xf6   : > { %v4590_v18 = vor.u32 %v5612_v16, %v4589_v15  ;;  %1377 = vmatpush.bf16.msrb.mxu3 %v4818_v17  ;;  %v5652_v15 = vld [vmem:[#allocation6 + $0x274] sm:$0xf0] }
  0xf7   : > { %1583 = vrot.lane.b32.xlu1 %v6391_v2, %s6160_s29  ;;  %1755 = vrot.lane.b32.xlu2 %v6389_v1, %s6159_s24  ;;  %2137 = vst [vmem:[#allocation2 + $0x240] sm:$0xff] %v2121_v10  ;;  %v4461_v16 = vld [vmem:[#allocation6 + $0x18] sm:$0xf] }
  0xf8   : > { %1394 = vrot.lane.b32.xlu0 %v6389_v1, %s6161_s6  ;;  %v1142_v20 = vpop.f32.mrf.mxu2  ;;  %1319 = vmatpush.bf16.msrb.mxu0 %v4590_v18  ;;  %v5580_v17 = vld [vmem:[#allocation6 + $0x34] sm:$0xf0] }
  0xf9   : > { %1360 = vmatpush.bf16.msrb.mxu2 %v4498_v40  ;;  %v4717_v18 = vld [vmem:[#allocation6 + $0x218] sm:$0xf] }
  0xfa   : > { %v1161_v24 = vpop.f32.mrf.mxu3  ;;  %v6433_v7 = vpop.f32.mrf.mxu0 }
  0xfb   : > { %v6417_v26 = vadd.f32 %v1161_v24, %v1142_v20  ;;  %v5676_v20 = vld [vmem:[#allocation6 + $0x334] sm:$0xf0]  ;;  %v5656_v24 = vld [vmem:[#allocation6 + $0x29c] sm:$0xf] }
  0xfc   : > { %v6435_v10 = vpop.f32.mrf.mxu1  ;;  %v4846_v22 = vor.u32 %v5676_v20, %v4845_v19  ;;  %v4786_v29 = vor.u32 %v5656_v24, %v4783_v27  ;;  %1320 = vmatpush.bf16.msrb.mxu0 %v4558_v33  ;;  %v4462_v19 = vor.u32 %v5580_v17, %v4461_v16  ;;  %v5644_v20 = vld [vmem:[#allocation6 + $0x234] sm:$0xf0] }
  0xfd   : > { %8868 = vst [vmem:[#allocation20_spill] sm:$0xff] %v6417_v26  ;;  %v2125_v39 = vpack.c.bf16 %v6417_v26, %v6415_v25  ;;  %1361 = vmatpush.bf16.msrb.mxu2 %v4466_v62 }
  0xfe   : > { %1338 = vmatpush.bf16.msrb.mxu1 %v4846_v22  ;;  %1378 = vmatpush.bf16.msrb.mxu3 %v4786_v29 }
  0xff   : > { %1396 = vrot.lane.b32.xlu1 %v6403_v8, %s6161_s6  ;;  %1402 = vrot.lane.b32.xlu2 %v6391_v2, %s6161_s6  ;;  %2141 = vst [vmem:[#allocation2 + $0x260] sm:$0xff] %v2125_v39  ;;  %v5648_v39 = vld [vmem:[#allocation6 + $0x25c] sm:$0xf] }
 0x100   : > { %1575 = vrot.lane.b32.xlu0 %v6389_v1, %s6160_s29  ;;  %v1211_v13 = vpop.f32.mrf.mxu2  ;;  %v4754_v46 = vor.u32 %v5648_v39, %v4751_v42  ;;  %1321 = vmatpush.bf16.msrb.mxu0 %v4526_v50 }
 0x101   : > { %1362 = vmatmul.bf16.vlgmr.msrb.gmra.mxu2 %v6337_v44 }
 0x102   : > { %v1230_v14 = vpop.f32.mrf.mxu3  ;;  %1339 = vmatpush.bf16.msrb.mxu1 %v4814_v35  ;;  %v1175_v47 = vpop.f32.mrf.mxu0  ;;  %1379 = vmatpush.bf16.msrb.mxu3 %v4754_v46 }
 0x103   : > { %v6443_v0 = vadd.f32 %v1230_v14, %v1211_v13  ;;  %v6457_v13 = vadd.f32 %v6435_v10, %v6433_v7  ;;  %v4750_v14 = vor.u32 %v5652_v15, %v4749_v11  ;;  %v4718_v7 = vor.u32 %v5644_v20, %v4717_v18 }
 0x104   : > { %v1194_v48 = vpop.f32.mrf.mxu1  ;;  %1322 = vmatpush.bf16.msrb.mxu0 %v4494_v12 }
 0x105   : > { %8869 = vst [vmem:[#allocation21_spill] sm:$0xff] %v6443_v0  ;;  %v6445_v3 = vadd.f32 %v1194_v48, %v1175_v47  ;;  %v2114_v21 = vpack.c.bf16 %v6443_v0, %v6457_v13 }
 0x106   : > { %1340 = vmatpush.bf16.msrb.mxu1 %v4782_v57  ;;  %8872 = vst [vmem:[#allocation24_spill] sm:$0xff] %v6457_v13  ;;  %1380 = vmatpush.bf16.msrb.mxu3 %v4722_v63 }
 0x107   : > { %1577 = vrot.lane.b32.xlu1 %v6403_v8, %s6160_s29  ;;  %1943 = vrot.lane.b32.xlu2 %v6391_v2, %s6162_s23  ;;  %8870 = vst [vmem:[#allocation22_spill] sm:$0xff] %v6445_v3 }
 0x108   : > { %1763 = vrot.lane.b32.xlu0 %v6391_v2, %s6159_s24  ;;  %v1213_v54 = vpop.f32.mrf.mxu2  ;;  %2130 = vst [vmem:[#allocation2 + $0x208] sm:$0xff] %v2114_v21  ;;  %1323 = vmatpush.bf16.msrb.mxu0 %v4462_v19 }
 0x109   : > { %1381 = vmatmul.bf16.vlgmr.msrb.gmra.mxu3 %v6339_v49 }
 0x10a   : > { %v1232_v55 = vpop.f32.mrf.mxu3  ;;  %1341 = vmatpush.bf16.msrb.mxu1 %v4750_v14  ;;  %v1178_v10 = vpop.f32.mrf.mxu0 }
 0x10b   : > { %v6447_v4 = vadd.f32 %v1232_v55, %v1213_v54  ;;  %1324 = vmatmul.bf16.vlgmr.msrb.gmra.mxu0 %v6337_v44 }
 0x10c   : > { %v1197_v23 = vpop.f32.mrf.mxu1 }
 0x10d   : > { %8871 = vst [vmem:[#allocation23_spill] sm:$0xff] %v6447_v4  ;;  %v2118_v22 = vpack.c.bf16 %v6447_v4, %v6445_v3  ;;  %v6509_v32 = vadd.f32 %v1197_v23, %v1178_v10 }
 0x10e   : > { %1342 = vmatpush.bf16.msrb.mxu1 %v4718_v7 }
 0x10f   : > { %1765 = vrot.lane.b32.xlu1 %v6405_v9, %s6159_s24  ;;  %1937 = vrot.lane.b32.xlu2 %v6403_v8, %s6162_s23  ;;  %2134 = vst [vmem:[#allocation2 + $0x228] sm:$0xff] %v2118_v22 }
 0x110   : > { %1757 = vrot.lane.b32.xlu0 %v6403_v8, %s6159_s24  ;;  %v1216_v44 = vpop.f32.mrf.mxu2  ;;  %8876 = vst [vmem:[#allocation28_spill] sm:$0xff] %v6509_v32 }
 0x111   : > { %1343 = vmatmul.bf16.vlgmr.msrb.gmra.mxu1 %v6339_v49  ;;  %1367 = vmatmul.bf16.gmra.mxu2 %v6349_v38 }
 0x112   : > { %v1235_v49 = vpop.f32.mrf.mxu3  ;;  %v1180_v27 = vpop.f32.mrf.mxu0 }
 0x113   : > { %v6511_v33 = vadd.f32 %v1235_v49, %v1216_v44 }
 0x114   : > { %v1199_v28 = vpop.f32.mrf.mxu1 }
 0x115   : > { %v6505_v30 = vadd.f32 %v1199_v28, %v1180_v27  ;;  %8877 = vst [vmem:[#allocation29_spill] sm:$0xff] %v6511_v33  ;;  %v2122_v34 = vpack.c.bf16 %v6511_v33, %v6509_v32 }
 0x117   : > { %1398 = vrot.lane.b32.xlu1 %v6415_v25, %s6161_s6  ;;  %1585 = vrot.lane.b32.xlu2 %v6405_v9, %s6160_s29  ;;  %8875 = vst [vmem:[#allocation27_spill] sm:$0xff] %v6505_v30 }
 0x118   : > { %1404 = vrot.lane.b32.xlu0 %v6405_v9, %s6161_s6  ;;  %2138 = vst [vmem:[#allocation2 + $0x248] sm:$0xff] %v2122_v34 }
 0x119   : > { %1386 = vmatmul.bf16.gmra.mxu3 %v6351_v41 }
 0x11a   : > { %v1249_v46 = vpop.f32.mrf.mxu0 }
 0x11b   : > { %1329 = vmatmul.bf16.gmra.mxu0 %v6349_v38  ;;  %v1218_v38 = vpop.f32.mrf.mxu2 }
 0x11c   : > { %v1268_v48 = vpop.f32.mrf.mxu1 }
 0x11d   : > { %v6561_v57 = vadd.f32 %v1268_v48, %v1249_v46 }
 0x11f   : > { %1759 = vrot.lane.b32.xlu1 %v6415_v25, %s6159_s24  ;;  %1579 = vrot.lane.b32.xlu2 %v6415_v25, %s6160_s29 }
 0x120   : > { %1945 = vrot.lane.b32.xlu0 %v6405_v9, %s6162_s23 }
 0x121   : > { %1348 = vmatmul.bf16.gmra.mxu1 %v6351_v41  ;;  %v1237_v41 = vpop.f32.mrf.mxu3 }
 0x122   : > { %v6507_v31 = vadd.f32 %v1237_v41, %v1218_v38  ;;  %v1251_v54 = vpop.f32.mrf.mxu0 }
 0x123   : > { %v1287_v47 = vpop.f32.mrf.mxu2 }
 0x124   : > { %v2126_v35 = vpack.c.bf16 %v6507_v31, %v6505_v30  ;;  %v1270_v58 = vpop.f32.mrf.mxu1 }
 0x125   : > { %v6569_v62 = vadd.f32 %v1270_v58, %v1251_v54 }
 0x126   : > { %2142 = vst [vmem:[#allocation2 + $0x268] sm:$0xff] %v2126_v35 }
 0x127   : > { %1406 = vrot.lane.b32.xlu1 %v6417_v26, %s6161_s6  ;;  %1767 = vrot.lane.b32.xlu2 %v6417_v26, %s6159_s24 }
 0x128   : > { %1939 = vrot.lane.b32.xlu0 %v6415_v25, %s6162_s23 }
 0x129   : > { %v1306_v50 = vpop.f32.mrf.mxu3 }
 0x12a   : > { %v6567_v61 = vadd.f32 %v1306_v50, %v1287_v47  ;;  %v1254_v21 = vpop.f32.mrf.mxu0 }
 0x12b   : > { %v1289_v55 = vpop.f32.mrf.mxu2 }
 0x12c   : > { %8886 = vst [vmem:[#allocation38_spill] sm:$0xff] %v6567_v61  ;;  %v2115_v12 = vpack.c.bf16 %v6567_v61, %v6561_v57  ;;  %v1273_v22 = vpop.f32.mrf.mxu1 }
 0x12d   : > { %v6621_v34 = vadd.f32 %v1273_v22, %v1254_v21 }
 0x12e   : > { %2131 = vst [vmem:[#allocation2 + $0x210] sm:$0xff] %v2115_v12 }
 0x12f   : > { %1947 = vrot.lane.b32.xlu1 %v6417_v26, %s6162_s23  ;;  %1408 = vrot.lane.b32.xlu2 %v6457_v13, %s6161_s6 }
 0x130   : > { %1587 = vrot.lane.b32.xlu0 %v6417_v26, %s6160_s29  ;;  %v6768_v26 = vld [vmem:[#allocation9 + $0x18] sm:$0xff] }
 0x131   : > { %v1308_v60 = vpop.f32.mrf.mxu3  ;;  %8907 = vst [vmem:[#allocation59_spill] sm:$0xff] %v6768_v26 }
 0x132   : > { %v6571_v63 = vadd.f32 %v1308_v60, %v1289_v55  ;;  %v1256_v27 = vpop.f32.mrf.mxu0 }
 0x133   : > { %v1292_v7 = vpop.f32.mrf.mxu2 }
 0x134   : > { %8887 = vst [vmem:[#allocation39_spill] sm:$0xff] %v6571_v63  ;;  %v2119_v15 = vpack.c.bf16 %v6571_v63, %v6569_v62  ;;  %v1275_v28 = vpop.f32.mrf.mxu1 }
 0x135   : > { %v6629_v46 = vadd.f32 %v1275_v28, %v1256_v27 }
 0x136   : > { %2135 = vst [vmem:[#allocation2 + $0x230] sm:$0xff] %v2119_v15 }
 0x137   : > { %1589 = vrot.lane.b32.xlu1 %v6457_v13, %s6160_s29  ;;  %1949 = vrot.lane.b32.xlu2 %v6457_v13, %s6162_s23 }
 0x138   : > { %1769 = vrot.lane.b32.xlu0 %v6457_v13, %s6159_s24 }
 0x139   : > { %v6495_v24 = vpop.permute.xlu2 %1573  ;;  %v1311_v44 = vpop.f32.mrf.mxu3 }
 0x13a   : > { %8873 = vst [vmem:[#allocation25_spill] sm:$0xff] %v6495_v24  ;;  %v6627_v35 = vadd.f32 %v1311_v44, %v1292_v7 }
 0x13b   : > { %v1294_v38 = vpop.f32.mrf.mxu2 }
 0x13c   : > { %v2123_v55 = vpack.c.bf16 %v6627_v35, %v6621_v34 }
 0x13e   : > { %2139 = vst [vmem:[#allocation2 + $0x250] sm:$0xff] %v2123_v55 }
 0x13f   : > { %1777 = vrot.lane.b32.xlu1 %v6443_v0, %s6159_s24  ;;  %1597 = vrot.lane.b32.xlu2 %v6443_v0, %s6160_s29 }
 0x140   : > { %1416 = vrot.lane.b32.xlu0 %v6443_v0, %s6161_s6 }
 0x141   : > { %v6503_v29 = vpop.permute.xlu2 %1400  ;;  %v1313_v41 = vpop.f32.mrf.mxu3 }
 0x142   : > { %8874 = vst [vmem:[#allocation26_spill] sm:$0xff] %v6503_v29  ;;  %v6631_v47 = vadd.f32 %v1313_v41, %v1294_v38 }
 0x144   : > { %v2127_v58 = vpack.c.bf16 %v6631_v47, %v6629_v46 }
 0x146   : > { %2143 = vst [vmem:[#allocation2 + $0x270] sm:$0xff] %v2127_v58 }
 0x147   : > { %1771 = vrot.lane.b32.xlu1 %v6445_v3, %s6159_s24  ;;  %1591 = vrot.lane.b32.xlu2 %v6445_v3, %s6160_s29 }
 0x148   : > { %1957 = vrot.lane.b32.xlu0 %v6443_v0, %s6162_s23  ;;  %v1456_v0 = vlaneseq }
 0x149   : > { %v6523_v36 = vpop.permute.xlu2 %1761 }
 0x14f   : > { %1418 = vrot.lane.b32.xlu1 %v6447_v4, %s6161_s6  ;;  %1779 = vrot.lane.b32.xlu2 %v6447_v4, %s6159_s24 }
 0x150   : > { %1410 = vrot.lane.b32.xlu0 %v6445_v3, %s6161_s6 }
 0x151   : > { %v6531_v37 = vpop.permute.xlu1 %1753  ;;  %v6533_v39 = vpop.permute.xlu2 %1755 }
 0x152   : > { %8878 = vst [vmem:[#allocation30_spill] sm:$0xff] %v6533_v39  ;;  %v6535_v40 = vpop.permute.xlu0 %1392 }
 0x153   : > { %8879 = vst [vmem:[#allocation31_spill] sm:$0xff] %v6535_v40 }
 0x157   : > { %1959 = vrot.lane.b32.xlu1 %v6447_v4, %s6162_s23  ;;  %1773 = vrot.lane.b32.xlu2 %v6509_v32, %s6159_s24 }
 0x158   : > { %1951 = vrot.lane.b32.xlu0 %v6445_v3, %s6162_s23 }
 0x159   : > { %v6543_v42 = vpop.permute.xlu1 %1941  ;;  %v6545_v43 = vpop.permute.xlu2 %1402 }
 0x15a   : > { %8880 = vst [vmem:[#allocation32_spill] sm:$0xff] %v6543_v42  ;;  %v6547_v45 = vpop.permute.xlu0 %1933 }
 0x15b   : > { %8881 = vst [vmem:[#allocation33_spill] sm:$0xff] %v6545_v43 }
 0x15c   : > { %8882 = vst [vmem:[#allocation34_spill] sm:$0xff] %v6547_v45  ;;  %v6683_v45 = vand.u32 127, %v1456_v0 }
 0x15e   : > { %vm1637_vm0 = vcmp.lt.s32.totalorder %v6683_v45, 32  ;;  %vm1817_vm1 = vcmp.lt.s32.totalorder %v6683_v45, 31  ;;  %vm1458_vm2 = vcmp.lt.s32.totalorder %v6683_v45, 33  ;;  %vm1997_vm3 = vcmp.lt.s32.totalorder %v6683_v45, 1 }
 0x15f   : > { %1412 = vrot.lane.b32.xlu1 %v6509_v32, %s6161_s6  ;;  %1420 = vrot.lane.b32.xlu2 %v6511_v33, %s6161_s6  ;;  %vm2569_vm4 = vcmp.lt.s32.totalorder %v6683_v45, 96  ;;  %vm2389_vm5 = vcmp.lt.s32.totalorder %v6683_v45, 97  ;;  %vm2209_vm6 = vcmp.lt.s32.totalorder %v6683_v45, 127  ;;  %vm2749_vm7 = vcmp.lt.s32.totalorder %v6683_v45, 95 }
 0x160   : > { %1599 = vrot.lane.b32.xlu0 %v6447_v4, %s6160_s29 }
 0x161   : > { %v6555_v51 = vpop.permute.xlu1 %1935  ;;  %v6557_v52 = vpop.permute.xlu2 %1943 }
 0x162   : > { %8883 = vst [vmem:[#allocation35_spill] sm:$0xff] %v6555_v51  ;;  %v6559_v53 = vpop.permute.xlu0 %1581 }
 0x163   : > { %8884 = vst [vmem:[#allocation36_spill] sm:$0xff] %v6557_v52 }
 0x164   : > { %8885 = vst [vmem:[#allocation37_spill] sm:$0xff] %v6559_v53 }
 0x167   : > { %1953 = vrot.lane.b32.xlu1 %v6509_v32, %s6162_s23  ;;  %1961 = vrot.lane.b32.xlu2 %v6511_v33, %s6162_s23 }
 0x168   : > { %1593 = vrot.lane.b32.xlu0 %v6509_v32, %s6160_s29 }
 0x169   : > { %v6575_v5 = vpop.permute.xlu1 %1583  ;;  %v6577_v6 = vpop.permute.xlu2 %1937 }
 0x16a   : > { %8888 = vst [vmem:[#allocation40_spill] sm:$0xff] %v6577_v6  ;;  %v6579_v11 = vpop.permute.xlu0 %1394 }
 0x16b   : > { %8889 = vst [vmem:[#allocation41_spill] sm:$0xff] %v6579_v11 }
 0x16f   : > { %1601 = vrot.lane.b32.xlu1 %v6511_v33, %s6160_s29  ;;  %1414 = vrot.lane.b32.xlu2 %v6505_v30, %s6161_s6 }
 0x170   : > { %1781 = vrot.lane.b32.xlu0 %v6511_v33, %s6159_s24  ;;  %v6681_v33 = vld [vmem:[#allocation9 + $0x8] sm:$0xff] }
 0x171   : > { %v6591_v14 = vpop.permute.xlu1 %1396  ;;  %v6593_v16 = vpop.permute.xlu2 %1585  ;;  %v6690_v51 = vperm.slane %v6681_v33, 3 }
 0x172   : > { %8890 = vst [vmem:[#allocation42_spill] sm:$0xff] %v6591_v14  ;;  %v6595_v17 = vpop.permute.xlu0 %1575 }
 0x173   : > { %8891 = vst [vmem:[#allocation43_spill] sm:$0xff] %v6595_v17 }
 0x177   : > { %1595 = vrot.lane.b32.xlu1 %v6505_v30, %s6160_s29  ;;  %1955 = vrot.lane.b32.xlu2 %v6505_v30, %s6162_s23 }
 0x178   : > { %1775 = vrot.lane.b32.xlu0 %v6505_v30, %s6159_s24 }
 0x179   : > { %v6603_v18 = vpop.permute.xlu1 %1577  ;;  %v6605_v19 = vpop.permute.xlu2 %1579 }
 0x17a   : > { %8892 = vst [vmem:[#allocation44_spill] sm:$0xff] %v6603_v18  ;;  %v6607_v20 = vpop.permute.xlu0 %1763 }
 0x17b   : > { %8893 = vst [vmem:[#allocation45_spill] sm:$0xff] %v6605_v19 }
 0x17c   : > { %8894 = vst [vmem:[#allocation46_spill] sm:$0xff] %v6607_v20 }
 0x17f   : > { %1783 = vrot.lane.b32.xlu1 %v6507_v31, %s6159_s24  ;;  %1603 = vrot.lane.b32.xlu2 %v6507_v31, %s6160_s29 }
 0x180   : > { %1422 = vrot.lane.b32.xlu0 %v6507_v31, %s6161_s6 }
 0x181   : > { %v6615_v49 = vpop.permute.xlu1 %1765  ;;  %v6617_v10 = vpop.permute.xlu2 %1767 }
 0x182   : > { %v6619_v23 = vpop.permute.xlu0 %1757 }
 0x183   : > { %8895 = vst [vmem:[#allocation47_spill] sm:$0xff] %v6619_v23  ;;  %v6704_v23 = vperm.slane %v6681_v33, 2 }
 0x184   : > { %v1363_v28 = vpop.f32.mrf.mxu2 }
 0x187   : > { %1424 = vrot.lane.b32.xlu1 %v6561_v57, %s6161_s6  ;;  %1785 = vrot.lane.b32.xlu2 %v6561_v57, %s6159_s24 }
 0x188   : > { %1605 = vrot.lane.b32.xlu0 %v6561_v57, %s6160_s29  ;;  %v1325_v44 = vpop.f32.mrf.mxu0 }
 0x189   : > { %v6635_v48 = vpop.permute.xlu1 %1398  ;;  %v6637_v50 = vpop.permute.xlu2 %1408 }
 0x18a   : > { %8896 = vst [vmem:[#allocation48_spill] sm:$0xff] %v6635_v48  ;;  %v6639_v54 = vpop.permute.xlu0 %1404 }
 0x18c   : > { %v1382_v38 = vpop.f32.mrf.mxu3 }
 0x18d   : > { %v6696_v48 = vadd.f32 %v1382_v38, %v1363_v28 }
 0x18e   : > { %v1344_v27 = vpop.f32.mrf.mxu1 }
 0x18f   : > { %1613 = vrot.lane.b32.xlu1 %v6567_v61, %s6160_s29  ;;  %1432 = vrot.lane.b32.xlu2 %v6567_v61, %s6161_s6  ;;  %v6694_v19 = vadd.f32 %v1344_v27, %v1325_v44  ;;  %8904 = vst [vmem:[#allocation56_spill] sm:$0xff] %v6696_v48 }
 0x190   : > { %1793 = vrot.lane.b32.xlu0 %v6567_v61, %s6159_s24  ;;  %v1327_v4 = vpop.f32.mrf.mxu0 }
 0x191   : > { %v6651_v60 = vpop.permute.xlu1 %1759  ;;  %v6653_v12 = vpop.permute.xlu2 %1949  ;;  %8903 = vst [vmem:[#allocation55_spill] sm:$0xff] %v6694_v19  ;;  %v2116_v27 = vpack.c.bf16 %v6696_v48, %v6694_v19 }
 0x192   : > { %8897 = vst [vmem:[#allocation49_spill] sm:$0xff] %v6651_v60  ;;  %v6655_v15 = vpop.permute.xlu0 %1945 }
 0x193   : > { %8898 = vst [vmem:[#allocation50_spill] sm:$0xff] %v6655_v15 }
 0x194   : > { %2132 = vst [vmem:[#allocation2 + $0x218] sm:$0xff] %v2116_v27  ;;  %v1479_v27 = vsel %vm1458_vm2, %v6503_v29, %v6637_v50 }
 0x196   : > { %v1346_v6 = vpop.f32.mrf.mxu1 }
 0x197   : > { %1607 = vrot.lane.b32.xlu1 %v6569_v62, %s6160_s29  ;;  %1426 = vrot.lane.b32.xlu2 %v6569_v62, %s6161_s6  ;;  %v6698_v14 = vadd.f32 %v1346_v6, %v1327_v4 }
 0x198   : > { %1787 = vrot.lane.b32.xlu0 %v6569_v62, %s6159_s24  ;;  %v1330_v40 = vpop.f32.mrf.mxu0 }
 0x199   : > { %v6663_v21 = vpop.permute.xlu1 %1406  ;;  %v6665_v22 = vpop.permute.xlu2 %1597  ;;  %8905 = vst [vmem:[#allocation57_spill] sm:$0xff] %v6698_v14 }
 0x19a   : > { %8899 = vst [vmem:[#allocation51_spill] sm:$0xff] %v6663_v21  ;;  %v6667_v7 = vpop.permute.xlu0 %1939 }
 0x19b   : > { %8900 = vst [vmem:[#allocation52_spill] sm:$0xff] %v6667_v7  ;;  %v1365_v7 = vpop.f32.mrf.mxu2 }
 0x19e   : > { %v1349_v29 = vpop.f32.mrf.mxu1 }
 0x19f   : > { %1795 = vrot.lane.b32.xlu1 %v6571_v63, %s6159_s24  ;;  %1615 = vrot.lane.b32.xlu2 %v6571_v63, %s6160_s29  ;;  %v6827_v11 = vadd.f32 %v1349_v29, %v1330_v40 }
 0x1a0   : > { %1434 = vrot.lane.b32.xlu0 %v6571_v63, %s6161_s6 }
 0x1a1   : > { %v6675_v41 = vpop.permute.xlu1 %1947  ;;  %v6677_v55 = vpop.permute.xlu2 %1591  ;;  %8912 = vst [vmem:[#allocation64_spill] sm:$0xff] %v6827_v11 }
 0x1a2   : > { %8901 = vst [vmem:[#allocation53_spill] sm:$0xff] %v6675_v41  ;;  %v6679_v58 = vpop.permute.xlu0 %1587  ;;  %v1384_v41 = vpop.f32.mrf.mxu3 }
 0x1a3   : > { %8902 = vst [vmem:[#allocation54_spill] sm:$0xff] %v6679_v58  ;;  %v6700_v0 = vadd.f32 %v1384_v41, %v1365_v7  ;;  %v6720_v41 = vld [vmem:[#allocation9 + $0x10] sm:$0xff] }
 0x1a5   : > { %8906 = vst [vmem:[#allocation58_spill] sm:$0xff] %v6700_v0  ;;  %v2120_v28 = vpack.c.bf16 %v6700_v0, %v6698_v14 }
 0x1a7   : > { %1789 = vrot.lane.b32.xlu1 %v6621_v34, %s6159_s24  ;;  %1609 = vrot.lane.b32.xlu2 %v6621_v34, %s6160_s29  ;;  %2136 = vst [vmem:[#allocation2 + $0x238] sm:$0xff] %v2120_v28 }
 0x1a8   : > { %1428 = vrot.lane.b32.xlu0 %v6621_v34, %s6161_s6 }
 0x1a9   : > { %v1590_v3 = vpop.permute.xlu1 %1589  ;;  %v6706_v60 = vpop.permute.xlu2 %1779 }
 0x1aa   : > { %v1654_v39 = vsel %vm1637_vm0, %v1590_v3, %v6665_v22  ;;  %v1658_v44 = vsel %vm1637_vm0, %v6559_v53, %v1590_v3  ;;  %v1770_v4 = vpop.permute.xlu0 %1769  ;;  %v6726_v3 = vperm.slane %v6720_v41, 2 }
 0x1ab   : > { %v1691_v6 = vmul.f32 %v6704_v23, %v1658_v44  ;;  %v1692_v7 = vmul.f32 %v6690_v51, %v1654_v39  ;;  %v6733_v39 = vperm.slane %v6720_v41, 3  ;;  %v6737_v44 = vperm.slane %v6723_v59, 2 }
 0x1ad   : > { %v1722_v38 = vpack.c.bf16 %v1692_v7, %v1691_v6  ;;  %v1838_v6 = vsel %vm1817_vm1, %v6523_v36, %v1770_v4  ;;  %v6745_v7 = vperm.slane %v6723_v59, 3  ;;  %v1511_v24 = vmul.f32 %v6737_v44, %v1479_v27 }
 0x1ae   : > { %v1871_v30 = vmul.f32 %v6726_v3, %v1838_v6 }
 0x1af   : > { %1738 = vst [vmem:[#allocation2 + $0x88] sm:$0xff] %v1722_v38  ;;  %1436 = vrot.lane.b32.xlu1 %v6627_v35, %s6161_s6  ;;  %1797 = vrot.lane.b32.xlu2 %v6627_v35, %s6159_s24 }
 0x1b0   : > { %1617 = vrot.lane.b32.xlu0 %v6627_v35, %s6160_s29 }
 0x1b1   : > { %v6751_v38 = vpop.permute.xlu1 %1777  ;;  %v6753_v13 = vpop.permute.xlu2 %1773 }
 0x1b2   : > { %v1834_v2 = vsel %vm1817_vm1, %v1770_v4, %v6751_v38  ;;  %v6758_v17 = vpop.permute.xlu0 %1416 }
 0x1b3   : > { %v1872_v18 = vmul.f32 %v6733_v39, %v1834_v2  ;;  %v1475_v28 = vsel %vm1458_vm2, %v6637_v50, %v6758_v17  ;;  %v6776_v2 = vperm.slane %v6768_v26, 2 }
 0x1b4   : > { %v1512_v53 = vmul.f32 %v6745_v7, %v1475_v28 }
 0x1b5   : > { %v1902_v9 = vpack.c.bf16 %v1872_v18, %v1871_v30  ;;  %8908 = vst [vmem:[#allocation60_spill] sm:$0xff] %v6776_v2 }
 0x1b6   : > { %v1542_v32 = vpack.c.bf16 %v1512_v53, %v1511_v24  ;;  %v6781_v24 = vperm.slane %v6768_v26, 3 }
 0x1b7   : > { %1918 = vst [vmem:[#allocation2 + $0x108] sm:$0xff] %v1902_v9  ;;  %1430 = vrot.lane.b32.xlu1 %v6629_v46, %s6161_s6  ;;  %1791 = vrot.lane.b32.xlu2 %v6629_v46, %s6159_s24  ;;  %v2018_v9 = vsel %vm1997_vm3, %v6543_v42, %v6653_v12 }
 0x1b8   : > { %1558 = vst [vmem:[#allocation2 + $0x8] sm:$0xff] %v1542_v32  ;;  %1611 = vrot.lane.b32.xlu0 %v6629_v46, %s6160_s29  ;;  %v2051_v28 = vmul.f32 %v6776_v2, %v2018_v9 }
 0x1b9   : > { %8909 = vst [vmem:[#allocation61_spill] sm:$0xff] %v6781_v24  ;;  %v1772_v30 = vpop.permute.xlu1 %1771  ;;  %v6787_v53 = vpop.permute.xlu2 %1420 }
 0x1ba   : > { %v1835_v18 = vsel %vm1817_vm1, %v1772_v30, %v6706_v60  ;;  %v1839_v32 = vsel %vm1817_vm1, %v6607_v20, %v1772_v30  ;;  %v6795_v50 = vpop.permute.xlu0 %1957  ;;  %v1368_v30 = vpop.f32.mrf.mxu2 }
 0x1bb   : > { %8910 = vst [vmem:[#allocation62_spill] sm:$0xff] %v6795_v50  ;;  %v1879_v4 = vmul.f32 %v6726_v3, %v1839_v32  ;;  %v1880_v6 = vmul.f32 %v6733_v39, %v1835_v18  ;;  %v2014_v27 = vsel %vm1997_vm3, %v6653_v12, %v6795_v50  ;;  %v1387_v20 = vpop.f32.mrf.mxu3 }
 0x1bc   : > { %v2052_v42 = vmul.f32 %v6781_v24, %v2014_v27 }
 0x1bd   : > { %v1906_v26 = vpack.c.bf16 %v1880_v6, %v1879_v4  ;;  %v1332_v4 = vpop.f32.mrf.mxu0  ;;  %v1351_v6 = vpop.f32.mrf.mxu1 }
 0x1be   : > { %v2082_v1 = vpack.c.bf16 %v2052_v42, %v2051_v28 }
 0x1bf   : > { %1922 = vst [vmem:[#allocation2 + $0x128] sm:$0xff] %v1906_v26  ;;  %1619 = vrot.lane.b32.xlu1 %v6631_v47, %s6160_s29  ;;  %1438 = vrot.lane.b32.xlu2 %v6631_v47, %s6161_s6 }
 0x1c0   : > { %2098 = vst [vmem:[#allocation2 + $0x188] sm:$0xff] %v2082_v1  ;;  %1799 = vrot.lane.b32.xlu0 %v6631_v47, %s6159_s24 }
 0x1c1   : > { %v6811_v12 = vpop.permute.xlu1 %1418  ;;  %v6813_v9 = vpop.permute.xlu2 %1961 }
 0x1c2   : > { %8911 = vst [vmem:[#allocation63_spill] sm:$0xff] %v6813_v9  ;;  %v1411_v18 = vpop.permute.xlu0 %1410  ;;  %v1370_v28 = vpop.f32.mrf.mxu2 }
 0x1c3   : > { %v1476_v42 = vsel %vm1458_vm2, %v1411_v18, %v6811_v12  ;;  %v1480_v26 = vsel %vm1458_vm2, %v6545_v43, %v1411_v18  ;;  %v1389_v50 = vpop.f32.mrf.mxu3  ;;  %v6831_v18 = vadd.f32 %v1387_v20, %v1368_v30 }
 0x1c4   : > { %v1519_v32 = vmul.f32 %v6737_v44, %v1480_v26  ;;  %v1520_v1 = vmul.f32 %v6745_v7, %v1476_v42  ;;  %v6833_v42 = vadd.f32 %v1351_v6, %v1332_v4  ;;  %v6835_v26 = vadd.f32 %v1389_v50, %v1370_v28 }
 0x1c5   : > { %8913 = vst [vmem:[#allocation65_spill] sm:$0xff] %v6831_v18  ;;  %v2124_v50 = vpack.c.bf16 %v6831_v18, %v6827_v11 }
 0x1c6   : > { %v1546_v27 = vpack.c.bf16 %v1520_v1, %v1519_v32  ;;  %8914 = vst [vmem:[#allocation66_spill] sm:$0xff] %v6835_v26  ;;  %v2128_v4 = vpack.c.bf16 %v6835_v26, %v6833_v42 }
 0x1c7   : > { %1801 = vrot.lane.b32.xlu1 %v6694_v19, %s6159_s24  ;;  %1621 = vrot.lane.b32.xlu2 %v6694_v19, %s6160_s29  ;;  %2140 = vst [vmem:[#allocation2 + $0x258] sm:$0xff] %v2124_v50 }
 0x1c8   : > { %1562 = vst [vmem:[#allocation2 + $0x28] sm:$0xff] %v1546_v27  ;;  %1440 = vrot.lane.b32.xlu0 %v6694_v19, %s6161_s6 }
 0x1c9   : > { %v6837_v32 = vpop.permute.xlu1 %1959  ;;  %v6839_v1 = vpop.permute.xlu2 %1414  ;;  %2144 = vst [vmem:[#allocation2 + $0x278] sm:$0xff] %v2128_v4 }
 0x1ca   : > { %8915 = vst [vmem:[#allocation67_spill] sm:$0xff] %v6837_v32  ;;  %v1952_v43 = vpop.permute.xlu0 %1951 }
 0x1cb   : > { %v2015_v29 = vsel %vm1997_vm3, %v1952_v43, %v6837_v32  ;;  %v2019_v40 = vsel %vm1997_vm3, %v6557_v52, %v1952_v43  ;;  %v1659_v43 = vsel %vm1637_vm0, %v6575_v5, %v6677_v55 }
 0x1cc   : > { %v2059_v20 = vmul.f32 %v6776_v2, %v2019_v40  ;;  %v2060_v30 = vmul.f32 %v6781_v24, %v2015_v29 }
 0x1ce   : > { %v2086_v6 = vpack.c.bf16 %v2060_v30, %v2059_v20 }
 0x1cf   : > { %1448 = vrot.lane.b32.xlu1 %v6696_v48, %s6161_s6  ;;  %1809 = vrot.lane.b32.xlu2 %v6696_v48, %s6159_s24 }
 0x1d0   : > { %2102 = vst [vmem:[#allocation2 + $0x1a8] sm:$0xff] %v2086_v6  ;;  %1629 = vrot.lane.b32.xlu0 %v6696_v48, %s6160_s29  ;;  %v1699_v6 = vmul.f32 %v6704_v23, %v1659_v43 }
 0x1d1   : > { %v1413_v27 = vpop.permute.xlu1 %1412  ;;  %v6863_v28 = vpop.permute.xlu2 %1955 }
 0x1d2   : > { %8916 = vst [vmem:[#allocation68_spill] sm:$0xff] %v6863_v28  ;;  %v1477_v29 = vsel %vm1458_vm2, %v1413_v27, %v6787_v53  ;;  %v1481_v40 = vsel %vm1458_vm2, %v6639_v54, %v1413_v27  ;;  %v6871_v20 = vpop.permute.xlu0 %1599 }
 0x1d3   : > { %v1527_v30 = vmul.f32 %v6737_v44, %v1481_v40  ;;  %v1528_v50 = vmul.f32 %v6745_v7, %v1477_v29  ;;  %v1655_v4 = vsel %vm1637_vm0, %v6677_v55, %v6871_v20 }
 0x1d4   : > { %v1700_v32 = vmul.f32 %v6690_v51, %v1655_v4 }
 0x1d5   : > { %v1550_v52 = vpack.c.bf16 %v1528_v50, %v1527_v30  ;;  %v1840_v50 = vsel %vm1817_vm1, %v6615_v49, %v6753_v13 }
 0x1d6   : > { %v1726_v28 = vpack.c.bf16 %v1700_v32, %v1699_v6 }
 0x1d7   : > { %1566 = vst [vmem:[#allocation2 + $0x48] sm:$0xff] %v1550_v52  ;;  %1442 = vrot.lane.b32.xlu1 %v6698_v14, %s6161_s6  ;;  %1803 = vrot.lane.b32.xlu2 %v6698_v14, %s6159_s24 }
 0x1d8   : > { %1742 = vst [vmem:[#allocation2 + $0xa8] sm:$0xff] %v1726_v28  ;;  %1623 = vrot.lane.b32.xlu0 %v6698_v14, %s6160_s29 }
 0x1d9   : > { %v1954_v27 = vpop.permute.xlu1 %1953  ;;  %v6887_v29 = vpop.permute.xlu2 %1603 }
 0x1da   : > { %v2016_v55 = vsel %vm1997_vm3, %v1954_v27, %v6813_v9  ;;  %v2020_v52 = vsel %vm1997_vm3, %v6655_v15, %v1954_v27  ;;  %v1594_v32 = vpop.permute.xlu0 %1593 }
 0x1db   : > { %v2067_v43 = vmul.f32 %v6776_v2, %v2020_v52  ;;  %v2068_v40 = vmul.f32 %v6781_v24, %v2016_v55  ;;  %v1660_v30 = vsel %vm1637_vm0, %v6593_v16, %v1594_v32 }
 0x1dc   : > { %v1707_v52 = vmul.f32 %v6704_v23, %v1660_v30 }
 0x1dd   : > { %v2090_v28 = vpack.c.bf16 %v2068_v40, %v2067_v43 }
 0x1df   : > { %2106 = vst [vmem:[#allocation2 + $0x1c8] sm:$0xff] %v2090_v28  ;;  %1631 = vrot.lane.b32.xlu1 %v6700_v0, %s6160_s29  ;;  %1450 = vrot.lane.b32.xlu2 %v6700_v0, %s6161_s6  ;;  %v1887_v28 = vmul.f32 %v6726_v3, %v1840_v50 }
 0x1e0   : > { %1811 = vrot.lane.b32.xlu0 %v6700_v0, %s6159_s24 }
 0x1e1   : > { %v6910_v4 = vpop.permute.xlu1 %1601  ;;  %v6912_v6 = vpop.permute.xlu2 %1785 }
 0x1e2   : > { %v1656_v27 = vsel %vm1637_vm0, %v1594_v32, %v6910_v4  ;;  %v6917_v55 = vpop.permute.xlu0 %1781 }
 0x1e3   : > { %v1708_v43 = vmul.f32 %v6690_v51, %v1656_v27  ;;  %v1836_v40 = vsel %vm1817_vm1, %v6753_v13, %v6917_v55 }
 0x1e4   : > { %v1888_v15 = vmul.f32 %v6733_v39, %v1836_v40 }
 0x1e5   : > { %v1730_v9 = vpack.c.bf16 %v1708_v43, %v1707_v52 }
 0x1e6   : > { %v1910_v24 = vpack.c.bf16 %v1888_v15, %v1887_v28 }
 0x1e7   : > { %1746 = vst [vmem:[#allocation2 + $0xc8] sm:$0xff] %v1730_v9  ;;  %1625 = vrot.lane.b32.xlu1 %v6827_v11, %s6160_s29  ;;  %1444 = vrot.lane.b32.xlu2 %v6827_v11, %s6161_s6 }
 0x1e8   : > { %1926 = vst [vmem:[#allocation2 + $0x148] sm:$0xff] %v1910_v24  ;;  %1805 = vrot.lane.b32.xlu0 %v6827_v11, %s6159_s24 }
 0x1e9   : > { %v1596_v32 = vpop.permute.xlu1 %1595  ;;  %v6933_v30 = vpop.permute.xlu2 %1432 }
 0x1ea   : > { %v1657_v13 = vsel %vm1637_vm0, %v1596_v32, %v6887_v29  ;;  %v1661_v15 = vsel %vm1637_vm0, %v6679_v58, %v1596_v32  ;;  %v1776_v9 = vpop.permute.xlu0 %1775 }
 0x1eb   : > { %v1715_v50 = vmul.f32 %v6704_v23, %v1661_v15  ;;  %v1716_v27 = vmul.f32 %v6690_v51, %v1657_v13  ;;  %v1841_v52 = vsel %vm1817_vm1, %v6617_v10, %v1776_v9  ;;  %v1482_v51 = vsel %vm1458_vm2, %v6663_v21, %v6839_v1 }
 0x1ec   : > { %v1895_v32 = vmul.f32 %v6726_v3, %v1841_v52  ;;  %v6978_v3 = vperm.slane %v6723_v59, 5 }
 0x1ed   : > { %v1734_v24 = vpack.c.bf16 %v1716_v27, %v1715_v50  ;;  %v1535_v50 = vmul.f32 %v6737_v44, %v1482_v51 }
 0x1ef   : > { %1750 = vst [vmem:[#allocation2 + $0xe8] sm:$0xff] %v1734_v24  ;;  %1813 = vrot.lane.b32.xlu1 %v6831_v18, %s6159_s24  ;;  %1633 = vrot.lane.b32.xlu2 %v6831_v18, %s6160_s29 }
 0x1f0   : > { %1452 = vrot.lane.b32.xlu0 %v6831_v18, %s6161_s6 }
 0x1f1   : > { %v6956_v23 = vpop.permute.xlu1 %1783  ;;  %v6958_v43 = vpop.permute.xlu2 %1426 }
 0x1f2   : > { %v1837_v40 = vsel %vm1817_vm1, %v1776_v9, %v6956_v23  ;;  %v6963_v28 = vpop.permute.xlu0 %1422 }
 0x1f3   : > { %v1896_v13 = vmul.f32 %v6733_v39, %v1837_v40  ;;  %v1478_v15 = vsel %vm1458_vm2, %v6839_v1, %v6963_v28  ;;  %v6983_v39 = vperm.slane %v6723_v59, 4 }
 0x1f4   : > { %v1536_v27 = vmul.f32 %v6745_v7, %v1478_v15 }
 0x1f5   : > { %v1914_v24 = vpack.c.bf16 %v1896_v13, %v1895_v32  ;;  %v6996_v32 = vperm.slane %v6681_v33, 4  ;;  %v7003_v13 = vperm.slane %v6681_v33, 5 }
 0x1f6   : > { %v1554_v2 = vpack.c.bf16 %v1536_v27, %v1535_v50  ;;  %v7014_v50 = vperm.slane %v6720_v41, 5  ;;  %v1830_v27 = vsel %vm1817_vm1, %v6751_v38, %v6912_v6 }
 0x1f7   : > { %1930 = vst [vmem:[#allocation2 + $0x168] sm:$0xff] %v1914_v24  ;;  %1807 = vrot.lane.b32.xlu1 %v6833_v42, %s6159_s24  ;;  %1627 = vrot.lane.b32.xlu2 %v6833_v42, %s6160_s29 }
 0x1f8   : > { %1570 = vst [vmem:[#allocation2 + $0x68] sm:$0xff] %v1554_v2  ;;  %1446 = vrot.lane.b32.xlu0 %v6833_v42, %s6161_s6 }
 0x1f9   : > { %v1425_v44 = vpop.permute.xlu1 %1424  ;;  %v6985_v7 = vpop.permute.xlu2 %1615 }
 0x1fa   : > { %v1467_v1 = vsel %vm1458_vm2, %v1425_v44, %v6933_v30  ;;  %v1471_v9 = vsel %vm1458_vm2, %v6758_v17, %v1425_v44  ;;  %v1606_v52 = vpop.permute.xlu0 %1605  ;;  %v7006_v17 = vperm.slane %v6720_v41, 4 }
 0x1fb   : > { %v1513_v2 = vmul.f32 %v6983_v39, %v1471_v9  ;;  %v1514_v51 = vmul.f32 %v6978_v3, %v1467_v1  ;;  %v1650_v15 = vsel %vm1637_vm0, %v6665_v22, %v1606_v52 }
 0x1fc   : > { %v1693_v9 = vmul.f32 %v6996_v32, %v1650_v15  ;;  %v1873_v38 = vmul.f32 %v7006_v17, %v1830_v27 }
 0x1fd   : > { %v1543_v40 = vpack.c.bf16 %v1514_v51, %v1513_v2 }
 0x1ff   : > { %1559 = vst [vmem:[#allocation2 + $0x10] sm:$0xff] %v1543_v40  ;;  %1454 = vrot.lane.b32.xlu1 %v6835_v26, %s6161_s6  ;;  %1815 = vrot.lane.b32.xlu2 %v6835_v26, %s6159_s24 }
 0x200   : > { %1635 = vrot.lane.b32.xlu0 %v6835_v26, %s6160_s29  ;;  %s4418_s29 = sshll.u32 %s6315_s26, 8 }
 0x201   : > { %v7020_v24 = vpop.permute.xlu1 %1613  ;;  %v7022_v44 = vpop.permute.xlu2 %1609  ;;  %s8606_s6 = scalar_lea.vmem [#allocation11], %s4418_s29 }
 0x202   : > { %v1646_v1 = vsel %vm1637_vm0, %v1606_v52, %v7020_v24  ;;  %v7027_v22 = vpop.permute.xlu0 %1793 }
 0x203   : > { %v1694_v2 = vmul.f32 %v7003_v13, %v1646_v1  ;;  %v1826_v51 = vsel %vm1817_vm1, %v6912_v6, %v7027_v22 }
 0x204   : > { %v1874_v40 = vmul.f32 %v7014_v50, %v1826_v51 }
 0x205   : > { %v1723_v58 = vpack.c.bf16 %v1694_v2, %v1693_v9 }
 0x206   : > { %v1903_v21 = vpack.c.bf16 %v1874_v40, %v1873_v38 }
 0x207   : > { %1739 = vst [vmem:[#allocation2 + $0x90] sm:$0xff] %v1723_v58  ;;  %1965 = vrot.lane.b32.xlu1 %v6561_v57, %s6162_s23  ;;  %1967 = vrot.lane.b32.xlu2 %v6569_v62, %s6162_s23 }
 0x208   : > { %1919 = vst [vmem:[#allocation2 + $0x110] sm:$0xff] %v1903_v21  ;;  %1963 = vrot.lane.b32.xlu0 %v6507_v31, %s6162_s23 }
 0x209   : > { %v1608_v52 = vpop.permute.xlu1 %1607  ;;  %v7043_v15 = vpop.permute.xlu2 %1797 }
 0x20a   : > { %v1647_v6 = vsel %vm1637_vm0, %v1608_v52, %v6985_v7  ;;  %v1651_v58 = vsel %vm1637_vm0, %v6871_v20, %v1608_v52  ;;  %v1788_v27 = vpop.permute.xlu0 %1787  ;;  %v1472_v20 = vsel %vm1458_vm2, %v6811_v12, %v6958_v43 }
 0x20b   : > { %v1701_v1 = vmul.f32 %v6996_v32, %v1651_v58  ;;  %v1702_v9 = vmul.f32 %v7003_v13, %v1647_v6  ;;  %v1831_v2 = vsel %vm1817_vm1, %v6706_v60, %v1788_v27  ;;  %v1521_v12 = vmul.f32 %v6983_v39, %v1472_v20 }
 0x20c   : > { %v1881_v60 = vmul.f32 %v7006_v17, %v1831_v2 }
 0x20d   : > { %v1727_v21 = vpack.c.bf16 %v1702_v9, %v1701_v1 }
 0x20f   : > { %1743 = vst [vmem:[#allocation2 + $0xb0] sm:$0xff] %v1727_v21  ;;  %1971 = vrot.lane.b32.xlu1 %v6629_v46, %s6162_s23  ;;  %1973 = vrot.lane.b32.xlu2 %v6567_v61, %s6162_s23 }
 0x210   : > { %1969 = vrot.lane.b32.xlu0 %v6621_v34, %s6162_s23 }
 0x211   : > { %v7066_v51 = vpop.permute.xlu1 %1795  ;;  %v7068_v38 = vpop.permute.xlu2 %1791 }
 0x212   : > { %v1827_v40 = vsel %vm1817_vm1, %v1788_v27, %v7066_v51  ;;  %v7073_v52 = vpop.permute.xlu0 %1434 }
 0x213   : > { %v1882_v6 = vmul.f32 %v7014_v50, %v1827_v40  ;;  %v1468_v58 = vsel %vm1458_vm2, %v6958_v43, %v7073_v52 }
 0x214   : > { %v1522_v1 = vmul.f32 %v6978_v3, %v1468_v58 }
 0x215   : > { %v1907_v9 = vpack.c.bf16 %v1882_v6, %v1881_v60 }
 0x216   : > { %v1547_v21 = vpack.c.bf16 %v1522_v1, %v1521_v12 }
 0x217   : > { %1923 = vst [vmem:[#allocation2 + $0x130] sm:$0xff] %v1907_v9  ;;  %1977 = vrot.lane.b32.xlu1 %v6627_v35, %s6162_s23  ;;  %1979 = vrot.lane.b32.xlu2 %v6631_v47, %s6162_s23 }
 0x218   : > { %1563 = vst [vmem:[#allocation2 + $0x30] sm:$0xff] %v1547_v21  ;;  %1975 = vrot.lane.b32.xlu0 %v6571_v63, %s6162_s23  ;;  %v7130_v63 = vperm.slane %v6720_v41, 1 }
 0x219   : > { %v1790_v27 = vpop.permute.xlu1 %1789  ;;  %v7089_v2 = vpop.permute.xlu2 %1438 }
 0x21a   : > { %v1828_v43 = vsel %vm1817_vm1, %v1790_v27, %v7043_v15  ;;  %v1832_v20 = vsel %vm1817_vm1, %v6917_v55, %v1790_v27  ;;  %v1429_v40 = vpop.permute.xlu0 %1428  ;;  %v1652_v55 = vsel %vm1637_vm0, %v6910_v4, %v7022_v44 }
 0x21b   : > { %v1889_v60 = vmul.f32 %v7006_v17, %v1832_v20  ;;  %v1890_v6 = vmul.f32 %v7014_v50, %v1828_v43  ;;  %v1473_v12 = vsel %vm1458_vm2, %v6787_v53, %v1429_v40  ;;  %v1709_v4 = vmul.f32 %v6996_v32, %v1652_v55 }
 0x21c   : > { %v1529_v53 = vmul.f32 %v6983_v39, %v1473_v12 }
 0x21d   : > { %v1911_v58 = vpack.c.bf16 %v1890_v6, %v1889_v60 }
 0x21f   : > { %1927 = vst [vmem:[#allocation2 + $0x150] sm:$0xff] %v1911_v58  ;;  %1983 = vrot.lane.b32.xlu1 %v6698_v14, %s6162_s23  ;;  %1985 = vrot.lane.b32.xlu2 %v6827_v11, %s6162_s23 }
 0x220   : > { %1981 = vrot.lane.b32.xlu0 %v6694_v19, %s6162_s23 }
 0x221   : > { %v7112_v1 = vpop.permute.xlu1 %1436  ;;  %v7114_v9 = vpop.permute.xlu2 %1621 }
 0x222   : > { %v1469_v21 = vsel %vm1458_vm2, %v1429_v40, %v7112_v1  ;;  %v7119_v27 = vpop.permute.xlu0 %1617  ;;  %v7137_v40 = vperm.slane %v6720_v41, 0 }
 0x223   : > { %v1530_v43 = vmul.f32 %v6978_v3, %v1469_v21  ;;  %v1648_v20 = vsel %vm1637_vm0, %v7022_v44, %v7119_v27  ;;  %v1842_v44 = vsel %vm1817_vm1, %v6531_v37, %v6523_v36 }
 0x224   : > { %v1710_v60 = vmul.f32 %v7003_v13, %v1648_v20  ;;  %v1870_v36 = vmul.f32 %v7130_v63, %v1842_v44 }
 0x225   : > { %v1551_v6 = vpack.c.bf16 %v1530_v43, %v1529_v53 }
 0x226   : > { %v1731_v58 = vpack.c.bf16 %v1710_v60, %v1709_v4 }
 0x227   : > { %1567 = vst [vmem:[#allocation2 + $0x50] sm:$0xff] %v1551_v6  ;;  %1989 = vrot.lane.b32.xlu1 %v6696_v48, %s6162_s23  ;;  %1991 = vrot.lane.b32.xlu2 %v6700_v0, %s6162_s23 }
 0x228   : > { %1747 = vst [vmem:[#allocation2 + $0xd0] sm:$0xff] %v1731_v58  ;;  %1987 = vrot.lane.b32.xlu0 %v6833_v42, %s6162_s23 }
 0x229   : > { %v1431_v12 = vpop.permute.xlu1 %1430  ;;  %v1810_v55 = vpop.permute.xlu2 %1809 }
 0x22a   : > { %v1470_v21 = vsel %vm1458_vm2, %v1431_v12, %v7089_v2  ;;  %v1474_v53 = vsel %vm1458_vm2, %v6963_v28, %v1431_v12  ;;  %v1846_v43 = vsel %vm1817_vm1, %v1810_v55, %v6531_v37  ;;  %v1612_v20 = vpop.permute.xlu0 %1611  ;;  %v1833_v28 = vsel %vm1817_vm1, %v6956_v23, %v7068_v38 }
 0x22b   : > { %v1537_v4 = vmul.f32 %v6983_v39, %v1474_v53  ;;  %v1538_v60 = vmul.f32 %v6978_v3, %v1470_v21  ;;  %v1869_v6 = vmul.f32 %v7137_v40, %v1846_v43  ;;  %v1653_v37 = vsel %vm1637_vm0, %v6887_v29, %v1612_v20 }
 0x22c   : > { %v1717_v29 = vmul.f32 %v6996_v32, %v1653_v37  ;;  %v1897_v23 = vmul.f32 %v7006_v17, %v1833_v28  ;;  %v7193_v32 = vperm.slane %v6720_v41, 7  ;;  %v8918_v17 = vld [vmem:[#allocation41_spill] sm:$0xff] }
 0x22d   : > { %v1555_v58 = vpack.c.bf16 %v1538_v60, %v1537_v4  ;;  %v1901_v0 = vpack.c.bf16 %v1870_v36, %v1869_v6  ;;  %v7205_v4 = vperm.slane %v6723_v59, 1  ;;  %v7208_v60 = vperm.slane %v6720_v41, 6 }
 0x22f   : > { %1571 = vst [vmem:[#allocation2 + $0x70] sm:$0xff] %v1555_v58  ;;  %1995 = vrot.lane.b32.xlu1 %v6835_v26, %s6162_s23  ;;  %2145 = vrot.lane.b32.xlu2 %v6367_v56, %s6163_s27 }
 0x230   : > { %1917 = vst [vmem:[#allocation2 + $0x100] sm:$0xff] %v1901_v0  ;;  %1993 = vrot.lane.b32.xlu0 %v6831_v18, %s6162_s23  ;;  %s5851_s23 = sshll.u32 %s6221_s22, 8  ;;  %s4287_s22 = scalar_lea.sflag [#allocation5], %s6315_s26 }
 0x231   : > { %v7171_v3 = vpop.permute.xlu1 %1619  ;;  %v7173_v39 = vpop.permute.xlu2 %1803 }
 0x232   : > { %v1649_v0 = vsel %vm1637_vm0, %v1612_v20, %v7171_v3  ;;  %v7178_v44 = vpop.permute.xlu0 %1799  ;;  %v8919_v20 = vld [vmem:[#allocation17_spill] sm:$0xff] }
 0x233   : > { %v1718_v12 = vmul.f32 %v7003_v13, %v1649_v0  ;;  %v1829_v21 = vsel %vm1817_vm1, %v7068_v38, %v7178_v44  ;;  %v7196_v13 = vperm.slane %v6723_v59, 0  ;;  %v8917_v38 = vld [vmem:[#allocation33_spill] sm:$0xff] }
 0x234   : > { %v1898_v53 = vmul.f32 %v7014_v50, %v1829_v21  ;;  %v1484_v50 = vsel %vm1458_vm2, %v8918_v17, %v8917_v38  ;;  %v7227_v38 = vperm.slane %v6723_v59, 6 }
 0x235   : > { %v1735_v43 = vpack.c.bf16 %v1718_v12, %v1717_v29  ;;  %v1518_v12 = vmul.f32 %v7205_v4, %v1484_v50  ;;  %v8923_v50 = vld [vmem:[#allocation28_spill] sm:$0xff] }
 0x236   : > { %v1915_v36 = vpack.c.bf16 %v1898_v53, %v1897_v23 }
 0x237   : > { %1751 = vst [vmem:[#allocation2 + $0xf0] sm:$0xff] %v1735_v43  ;;  %2509 = vrot.lane.b32.xlu1 %v6403_v8, %s6164_s28  ;;  %2511 = vrot.lane.b32.xlu2 %v6415_v25, %s6164_s28 }
 0x238   : > { %1931 = vst [vmem:[#allocation2 + $0x170] sm:$0xff] %v1915_v36  ;;  %2147 = vrot.lane.b32.xlu0 %v8919_v20, %s6163_s27  ;;  %v8921_v36 = vld [vmem:[#allocation31_spill] sm:$0xff] }
 0x239   : > { %v1802_v6 = vpop.permute.xlu1 %1801  ;;  %v1451_v58 = vpop.permute.xlu2 %1450 }
 0x23a   : > { %v1818_v37 = vsel %vm1817_vm1, %v1802_v6, %v1810_v55  ;;  %v1822_v28 = vsel %vm1817_vm1, %v7027_v22, %v1802_v6  ;;  %v1488_v0 = vsel %vm1458_vm2, %v1451_v58, %v8918_v17  ;;  %v1441_v29 = vpop.permute.xlu0 %1440  ;;  %v8920_v55 = vld [vmem:[#allocation26_spill] sm:$0xff]  ;;  %v8922_v17 = vld [vmem:[#allocation20_spill] sm:$0xff]  ;;  %v7234_v6 = vperm.slane %v6723_v59, 7 }
 0x23b   : > { %v1875_v21 = vmul.f32 %v7208_v60, %v1822_v28  ;;  %v1876_v41 = vmul.f32 %v7193_v32, %v1818_v37  ;;  %v1517_v23 = vmul.f32 %v7196_v13, %v1488_v0  ;;  %v1483_v22 = vsel %vm1458_vm2, %v8921_v36, %v8920_v55  ;;  %v8924_v0 = vld [vmem:[#allocation19_spill] sm:$0xff]  ;;  %v8926_v55 = vld [vmem:[#allocation25_spill] sm:$0xff] }
 0x23c   : > { %v7237_v37 = vperm.slane %v6681_v33, 6  ;;  %v1463_v28 = vsel %vm1458_vm2, %v6933_v30, %v1441_v29  ;;  %v1642_v59 = vsel %vm1637_vm0, %v7020_v24, %v7114_v9  ;;  %v1510_v30 = vmul.f32 %v7205_v4, %v1483_v22 }
 0x23d   : > { %v1904_v53 = vpack.c.bf16 %v1876_v41, %v1875_v21  ;;  %v1545_v43 = vpack.c.bf16 %v1518_v12, %v1517_v23  ;;  %v7245_v12 = vperm.slane %v6681_v33, 7  ;;  %v7248_v21 = vperm.slane %v6681_v33, 1 }
 0x23e   : > { %v1515_v14 = vmul.f32 %v7227_v38, %v1463_v28 }
 0x23f   : > { %1920 = vst [vmem:[#allocation2 + $0x118] sm:$0xff] %v1904_v53  ;;  %2519 = vrot.lane.b32.xlu1 %v8922_v17, %s6164_s28  ;;  %2525 = vrot.lane.b32.xlu2 %v8923_v50, %s6164_s28  ;;  %v7257_v53 = vperm.slane %v6681_v33, 0 }
 0x240   : > { %1561 = vst [vmem:[#allocation2 + $0x20] sm:$0xff] %v1545_v43  ;;  %2517 = vrot.lane.b32.xlu0 %v8924_v0, %s6164_s28  ;;  %v8925_v43 = vld [vmem:[#allocation37_spill] sm:$0xff] }
 0x241   : > { %v1449_v41 = vpop.permute.xlu1 %1448  ;;  %v7254_v23 = vpop.permute.xlu2 %1444  ;;  %v1662_v18 = vsel %vm1637_vm0, %v8926_v55, %v8925_v43  ;;  %v1695_v43 = vmul.f32 %v7237_v37, %v1642_v59 }
 0x242   : > { %v1459_v48 = vsel %vm1458_vm2, %v1441_v29, %v1449_v41  ;;  %v1487_v24 = vsel %vm1458_vm2, %v1449_v41, %v8921_v36  ;;  %v1630_v26 = vpop.permute.xlu0 %1629  ;;  %v1690_v36 = vmul.f32 %v7248_v21, %v1662_v18  ;;  %v8928_v18 = vld [vmem:[#allocation27_spill] sm:$0xff] }
 0x243   : > { %v1509_v33 = vmul.f32 %v7196_v13, %v1487_v24  ;;  %v1516_v19 = vmul.f32 %v7234_v6, %v1459_v48  ;;  %v1638_v22 = vsel %vm1637_vm0, %v7114_v9, %v1630_v26  ;;  %v1666_v29 = vsel %vm1637_vm0, %v1630_v26, %v8926_v55  ;;  %v8927_v9 = vld [vmem:[#allocation44_spill] sm:$0xff] }
 0x244   : > { %v1696_v11 = vmul.f32 %v7245_v12, %v1638_v22  ;;  %v1689_v24 = vmul.f32 %v7257_v53, %v1666_v29  ;;  %v1664_v26 = vsel %vm1637_vm0, %v8927_v9, %v6593_v16 }
 0x245   : > { %v1541_v41 = vpack.c.bf16 %v1510_v30, %v1509_v33  ;;  %v1544_v28 = vpack.c.bf16 %v1516_v19, %v1515_v14  ;;  %v1706_v55 = vmul.f32 %v7248_v21, %v1664_v26 }
 0x246   : > { %v1724_v61 = vpack.c.bf16 %v1696_v11, %v1695_v43  ;;  %v1721_v48 = vpack.c.bf16 %v1690_v36, %v1689_v24  ;;  %v8930_v36 = vld [vmem:[#allocation18_spill] sm:$0xff]  ;;  %v8932_v24 = vld [vmem:[#allocation16_spill] sm:$0xff] }
 0x247   : > { %1557 = vst [vmem:[#allocation2] sm:$0xff] %v1541_v41  ;;  %2505 = vrot.lane.b32.xlu1 %v6367_v56, %s6164_s28  ;;  %2507 = vrot.lane.b32.xlu2 %v8919_v20, %s6164_s28  ;;  %v8931_v41 = vld [vmem:[#allocation24_spill] sm:$0xff] }
 0x248   : > { %1560 = vst [vmem:[#allocation2 + $0x18] sm:$0xff] %v1544_v28  ;;  %2527 = vrot.lane.b32.xlu0 %v8928_v18, %s6164_s28 }
 0x249   : > { %1737 = vst [vmem:[#allocation2 + $0x80] sm:$0xff] %v1721_v48  ;;  %v1443_v14 = vpop.permute.xlu1 %1442  ;;  %v1634_v11 = vpop.permute.xlu2 %1633 }
 0x24a   : > { %1740 = vst [vmem:[#allocation2 + $0x98] sm:$0xff] %v1724_v61  ;;  %v1460_v19 = vsel %vm1458_vm2, %v1443_v14, %v1451_v58  ;;  %v1464_v59 = vsel %vm1458_vm2, %v7073_v52, %v1443_v14  ;;  %v1668_v30 = vsel %vm1637_vm0, %v1634_v11, %v8927_v9  ;;  %v1624_v16 = vpop.permute.xlu0 %1623  ;;  %v8929_v58 = vld [vmem:[#allocation43_spill] sm:$0xff]  ;;  %v8933_v14 = vld [vmem:[#allocation46_spill] sm:$0xff] }
 0x24b   : > { %v1523_v33 = vmul.f32 %v7227_v38, %v1464_v59  ;;  %v1524_v22 = vmul.f32 %v7234_v6, %v1460_v19  ;;  %v1705_v61 = vmul.f32 %v7257_v53, %v1668_v30  ;;  %v1663_v52 = vsel %vm1637_vm0, %v8929_v58, %v6575_v5  ;;  %v8934_v19 = vld [vmem:[#allocation30_spill] sm:$0xff] }
 0x24c   : > { %v1643_v28 = vsel %vm1637_vm0, %v6985_v7, %v1624_v16  ;;  %v1823_v5 = vsel %vm1817_vm1, %v7066_v51, %v7173_v39  ;;  %v1698_v26 = vmul.f32 %v7248_v21, %v1663_v52  ;;  %v1843_v59 = vsel %vm1817_vm1, %v8934_v19, %v8933_v14 }
 0x24d   : > { %v1548_v43 = vpack.c.bf16 %v1524_v22, %v1523_v33  ;;  %v1729_v29 = vpack.c.bf16 %v1706_v55, %v1705_v61  ;;  %v1703_v51 = vmul.f32 %v7237_v37, %v1643_v28 }
 0x24f   : > { %1564 = vst [vmem:[#allocation2 + $0x38] sm:$0xff] %v1548_v43  ;;  %2515 = vrot.lane.b32.xlu1 %v8930_v36, %s6164_s28  ;;  %2521 = vrot.lane.b32.xlu2 %v8931_v41, %s6164_s28  ;;  %v1883_v43 = vmul.f32 %v7208_v60, %v1823_v5 }
 0x250   : > { %1745 = vst [vmem:[#allocation2 + $0xc0] sm:$0xff] %v1729_v29  ;;  %2513 = vrot.lane.b32.xlu0 %v8932_v24, %s6164_s28 }
 0x251   : > { %v1632_v48 = vpop.permute.xlu1 %1631  ;;  %v7321_v9 = vpop.permute.xlu2 %1627 }
 0x252   : > { %v1639_v7 = vsel %vm1637_vm0, %v1624_v16, %v1632_v48  ;;  %v1667_v30 = vsel %vm1637_vm0, %v1632_v48, %v8929_v58  ;;  %v1812_v55 = vpop.permute.xlu0 %1811  ;;  %v1878_v58 = vmul.f32 %v7130_v63, %v1843_v59 }
 0x253   : > { %v1697_v33 = vmul.f32 %v7257_v53, %v1667_v30  ;;  %v1704_v22 = vmul.f32 %v7245_v12, %v1639_v7  ;;  %v1819_v61 = vsel %vm1817_vm1, %v7173_v39, %v1812_v55  ;;  %v1847_v16 = vsel %vm1817_vm1, %v1812_v55, %v8934_v19  ;;  %v8935_v39 = vld [vmem:[#allocation49_spill] sm:$0xff] }
 0x254   : > { %v1884_v29 = vmul.f32 %v7193_v32, %v1819_v61  ;;  %v1877_v48 = vmul.f32 %v7137_v40, %v1847_v16  ;;  %v1845_v5 = vsel %vm1817_vm1, %v8935_v39, %v6617_v10 }
 0x255   : > { %v1725_v52 = vpack.c.bf16 %v1698_v26, %v1697_v33  ;;  %v1728_v28 = vpack.c.bf16 %v1704_v22, %v1703_v51  ;;  %v8936_v26 = vld [vmem:[#allocation22_spill] sm:$0xff]  ;;  %v1894_v33 = vmul.f32 %v7130_v63, %v1845_v5 }
 0x256   : > { %v1908_v14 = vpack.c.bf16 %v1884_v29, %v1883_v43  ;;  %v1905_v7 = vpack.c.bf16 %v1878_v58, %v1877_v48 }
 0x257   : > { %1741 = vst [vmem:[#allocation2 + $0xa0] sm:$0xff] %v1725_v52  ;;  %2329 = vrot.lane.b32.xlu1 %v6403_v8, %s6165_s9  ;;  %2331 = vrot.lane.b32.xlu2 %v6415_v25, %s6165_s9 }
 0x258   : > { %1744 = vst [vmem:[#allocation2 + $0xb8] sm:$0xff] %v1728_v28  ;;  %2523 = vrot.lane.b32.xlu0 %v8936_v26, %s6164_s28 }
 0x259   : > { %1921 = vst [vmem:[#allocation2 + $0x120] sm:$0xff] %v1905_v7  ;;  %v1626_v19 = vpop.permute.xlu1 %1625  ;;  %v1816_v59 = vpop.permute.xlu2 %1815 }
 0x25a   : > { %1924 = vst [vmem:[#allocation2 + $0x138] sm:$0xff] %v1908_v14  ;;  %v1640_v30 = vsel %vm1637_vm0, %v1626_v19, %v1634_v11  ;;  %v1644_v55 = vsel %vm1637_vm0, %v7119_v27, %v1626_v19  ;;  %v1849_v51 = vsel %vm1817_vm1, %v1816_v59, %v8935_v39  ;;  %v1806_v10 = vpop.permute.xlu0 %1805  ;;  %v8937_v11 = vld [vmem:[#allocation47_spill] sm:$0xff]  ;;  %v8938_v14 = vld [vmem:[#allocation42_spill] sm:$0xff] }
 0x25b   : > { %v1711_v22 = vmul.f32 %v7237_v37, %v1644_v55  ;;  %v1712_v61 = vmul.f32 %v7245_v12, %v1640_v30  ;;  %v1893_v43 = vmul.f32 %v7137_v40, %v1849_v51  ;;  %v1844_v27 = vsel %vm1817_vm1, %v8937_v11, %v6615_v49 }
 0x25c   : > { %v1824_v58 = vsel %vm1817_vm1, %v7043_v15, %v1806_v10  ;;  %v1465_v49 = vsel %vm1458_vm2, %v7112_v1, %v7254_v23  ;;  %v1886_v48 = vmul.f32 %v7130_v63, %v1844_v27  ;;  %v1485_v7 = vsel %vm1458_vm2, %v8938_v14, %v6639_v54 }
 0x25d   : > { %v1732_v16 = vpack.c.bf16 %v1712_v61, %v1711_v22  ;;  %v1913_v29 = vpack.c.bf16 %v1894_v33, %v1893_v43  ;;  %v1891_v1 = vmul.f32 %v7208_v60, %v1824_v58  ;;  %v1531_v54 = vmul.f32 %v7227_v38, %v1465_v49 }
 0x25f   : > { %1748 = vst [vmem:[#allocation2 + $0xd8] sm:$0xff] %v1732_v16  ;;  %2339 = vrot.lane.b32.xlu1 %v8922_v17, %s6165_s9  ;;  %2345 = vrot.lane.b32.xlu2 %v8923_v50, %s6165_s9 }
 0x260   : > { %1929 = vst [vmem:[#allocation2 + $0x160] sm:$0xff] %v1913_v29  ;;  %2337 = vrot.lane.b32.xlu0 %v8924_v0, %s6165_s9 }
 0x261   : > { %v1814_v52 = vpop.permute.xlu1 %1813  ;;  %v7385_v28 = vpop.permute.xlu2 %1967 }
 0x262   : > { %v1820_v15 = vsel %vm1817_vm1, %v1806_v10, %v1814_v52  ;;  %v1848_v39 = vsel %vm1817_vm1, %v1814_v52, %v8937_v11  ;;  %v1453_v5 = vpop.permute.xlu0 %1452  ;;  %v1526_v10 = vmul.f32 %v7205_v4, %v1485_v7 }
 0x263   : > { %v1885_v19 = vmul.f32 %v7137_v40, %v1848_v39  ;;  %v1892_v30 = vmul.f32 %v7193_v32, %v1820_v15  ;;  %v1461_v63 = vsel %vm1458_vm2, %v7254_v23, %v1453_v5  ;;  %v1489_v55 = vsel %vm1458_vm2, %v1453_v5, %v8938_v14  ;;  %v8940_v14 = vld [vmem:[#allocation48_spill] sm:$0xff] }
 0x264   : > { %v1532_v51 = vmul.f32 %v7234_v6, %v1461_v63  ;;  %v1525_v40 = vmul.f32 %v7196_v13, %v1489_v55  ;;  %v1645_v15 = vsel %vm1637_vm0, %v7171_v3, %v7321_v9 }
 0x265   : > { %v1909_v33 = vpack.c.bf16 %v1886_v48, %v1885_v19  ;;  %v1912_v22 = vpack.c.bf16 %v1892_v30, %v1891_v1  ;;  %v8939_v48 = vld [vmem:[#allocation51_spill] sm:$0xff] }
 0x266   : > { %v1552_v61 = vpack.c.bf16 %v1532_v51, %v1531_v54  ;;  %v1549_v43 = vpack.c.bf16 %v1526_v10, %v1525_v40  ;;  %v1486_v7 = vsel %vm1458_vm2, %v8940_v14, %v8939_v48  ;;  %v1719_v51 = vmul.f32 %v7237_v37, %v1645_v15  ;;  %v8944_v37 = vld [vmem:[#allocation68_spill] sm:$0xff] }
 0x267   : > { %1925 = vst [vmem:[#allocation2 + $0x140] sm:$0xff] %v1909_v33  ;;  %2325 = vrot.lane.b32.xlu1 %v6367_v56, %s6165_s9  ;;  %2327 = vrot.lane.b32.xlu2 %v8919_v20, %s6165_s9  ;;  %v1534_v5 = vmul.f32 %v7205_v4, %v1486_v7 }
 0x268   : > { %1928 = vst [vmem:[#allocation2 + $0x158] sm:$0xff] %v1912_v22  ;;  %2347 = vrot.lane.b32.xlu0 %v8928_v18, %s6165_s9 }
 0x269   : > { %1565 = vst [vmem:[#allocation2 + $0x40] sm:$0xff] %v1549_v43  ;;  %v1808_v23 = vpop.permute.xlu1 %1807  ;;  %v7416_v16 = vpop.permute.xlu2 %1973 }
 0x26a   : > { %1568 = vst [vmem:[#allocation2 + $0x58] sm:$0xff] %v1552_v61  ;;  %v1821_v29 = vsel %vm1817_vm1, %v1808_v23, %v1816_v59  ;;  %v1825_v11 = vsel %vm1817_vm1, %v7178_v44, %v1808_v23  ;;  %v1447_v27 = vpop.permute.xlu0 %1446  ;;  %v8941_v44 = vld [vmem:[#allocation54_spill] sm:$0xff] }
 0x26b   : > { %v1899_v58 = vmul.f32 %v7208_v60, %v1825_v11  ;;  %v1900_v49 = vmul.f32 %v7193_v32, %v1821_v29  ;;  %v1466_v59 = vsel %vm1458_vm2, %v7089_v2, %v1447_v27  ;;  %v8942_v32 = vld [vmem:[#allocation45_spill] sm:$0xff]  ;;  %v8946_v11 = vld [vmem:[#allocation62_spill] sm:$0xff] }
 0x26c   : > { %v1665_v60 = vsel %vm1637_vm0, %v8942_v32, %v8941_v44  ;;  %v1539_v1 = vmul.f32 %v7227_v38, %v1466_v59  ;;  %v8948_v59 = vld [vmem:[#allocation61_spill] sm:$0xff] }
 0x26d   : > { %v1916_v52 = vpack.c.bf16 %v1900_v49, %v1899_v58  ;;  %v1714_v38 = vmul.f32 %v7248_v21, %v1665_v60  ;;  %v8945_v21 = vld [vmem:[#allocation53_spill] sm:$0xff] }
 0x26f   : > { %1932 = vst [vmem:[#allocation2 + $0x178] sm:$0xff] %v1916_v52  ;;  %2335 = vrot.lane.b32.xlu1 %v8930_v36, %s6165_s9  ;;  %2341 = vrot.lane.b32.xlu2 %v8931_v41, %s6165_s9 }
 0x270   : > { %2333 = vrot.lane.b32.xlu0 %v8932_v24, %s6165_s9 }
 0x271   : > { %v1455_v2 = vpop.permute.xlu1 %1454  ;;  %v7446_v39 = vpop.permute.xlu2 %1979 }
 0x272   : > { %v1462_v19 = vsel %vm1458_vm2, %v1447_v27, %v1455_v2  ;;  %v1490_v30 = vsel %vm1458_vm2, %v1455_v2, %v8940_v14  ;;  %v1636_v63 = vpop.permute.xlu0 %1635  ;;  %v8947_v14 = vld [vmem:[#allocation60_spill] sm:$0xff] }
 0x273   : > { %v1533_v54 = vmul.f32 %v7196_v13, %v1490_v30  ;;  %v1540_v55 = vmul.f32 %v7234_v6, %v1462_v19  ;;  %v1641_v3 = vsel %vm1637_vm0, %v7321_v9, %v1636_v63  ;;  %v1669_v4 = vsel %vm1637_vm0, %v1636_v63, %v8942_v32  ;;  %v8943_v9 = vld [vmem:[#allocation59_spill] sm:$0xff]  ;;  %v8949_v2 = vld [vmem:[#allocation36_spill] sm:$0xff] }
 0x274   : > { %v1713_v10 = vmul.f32 %v7257_v53, %v1669_v4  ;;  %v1720_v33 = vmul.f32 %v7245_v12, %v1641_v3  ;;  %v2038_v61 = vperm.slane %v8943_v9, 5  ;;  %v2021_v12 = vsel %vm1997_vm3, %v8945_v21, %v8944_v37 }
 0x275   : > { %v1553_v22 = vpack.c.bf16 %v1534_v5, %v1533_v54  ;;  %v1556_v13 = vpack.c.bf16 %v1540_v55, %v1539_v1  ;;  %v2037_v53 = vperm.slane %v8943_v9, 4  ;;  %v2075_v7 = vmul.f32 %v8947_v14, %v2021_v12  ;;  %v8950_v5 = vld [vmem:[#allocation35_spill] sm:$0xff] }
 0x276   : > { %v1733_v40 = vpack.c.bf16 %v1714_v38, %v1713_v10  ;;  %v1736_v6 = vpack.c.bf16 %v1720_v33, %v1719_v51  ;;  %v7497_v15 = vperm.slane %v8943_v9, 0  ;;  %v2023_v1 = vsel %vm1997_vm3, %v8950_v5, %v8949_v2 }
 0x277   : > { %1569 = vst [vmem:[#allocation2 + $0x60] sm:$0xff] %v1553_v22  ;;  %2149 = vrot.lane.b32.xlu1 %v6403_v8, %s6163_s27  ;;  %2151 = vrot.lane.b32.xlu2 %v6415_v25, %s6163_s27  ;;  %v7506_v19 = vperm.slane %v8943_v9, 1  ;;  %v8952_v9 = vld [vmem:[#allocation67_spill] sm:$0xff] }
 0x278   : > { %1572 = vst [vmem:[#allocation2 + $0x78] sm:$0xff] %v1556_v13  ;;  %2343 = vrot.lane.b32.xlu0 %v8936_v26, %s6165_s9 }
 0x279   : > { %1749 = vst [vmem:[#allocation2 + $0xe0] sm:$0xff] %v1733_v40  ;;  %v1966_v43 = vpop.permute.xlu1 %1965  ;;  %v7479_v23 = vpop.permute.xlu2 %1985  ;;  %v2058_v38 = vmul.f32 %v7506_v19, %v2023_v1  ;;  %v8951_v40 = vld [vmem:[#allocation63_spill] sm:$0xff] }
 0x27a   : > { %1752 = vst [vmem:[#allocation2 + $0xf8] sm:$0xff] %v1736_v6  ;;  %v2006_v29 = vsel %vm1997_vm3, %v1966_v43, %v7416_v16  ;;  %v2010_v27 = vsel %vm1997_vm3, %v8946_v11, %v1966_v43  ;;  %v1964_v58 = vpop.permute.xlu0 %1963 }
 0x27b   : > { %v2053_v49 = vmul.f32 %v2037_v53, %v2010_v27  ;;  %v2054_v52 = vmul.f32 %v2038_v61, %v2006_v29  ;;  %v2017_v48 = vsel %vm1997_vm3, %v8944_v37, %v1964_v58  ;;  %v2011_v37 = vsel %vm1997_vm3, %v8952_v9, %v7385_v28  ;;  %v8957_v9 = vld [vmem:[#allocation50_spill] sm:$0xff] }
 0x27c   : > { %v2076_v44 = vmul.f32 %v8948_v59, %v2017_v48  ;;  %v5949_v59 = vld [vmem:[#allocation9 + $0x18] sm:$0xff] }
 0x27d   : > { %v2083_v32 = vpack.c.bf16 %v2054_v52, %v2053_v49  ;;  %v2061_v52 = vmul.f32 %v2037_v53, %v2011_v37  ;;  %v8958_v37 = vld [vmem:[#allocation40_spill] sm:$0xff] }
 0x27e   : > { %v2094_v60 = vpack.c.bf16 %v2076_v44, %v2075_v7  ;;  %v2040_v44 = vperm.slane %v5949_v59, 7 }
 0x27f   : > { %2099 = vst [vmem:[#allocation2 + $0x190] sm:$0xff] %v2083_v32  ;;  %2159 = vrot.lane.b32.xlu1 %v8922_v17, %s6163_s27  ;;  %2165 = vrot.lane.b32.xlu2 %v8923_v50, %s6163_s27  ;;  %v2039_v32 = vperm.slane %v5949_v59, 6 }
 0x280   : > { %2110 = vst [vmem:[#allocation2 + $0x1e8] sm:$0xff] %v2094_v60  ;;  %2157 = vrot.lane.b32.xlu0 %v8924_v0, %s6163_s27 }
 0x281   : > { %v1972_v30 = vpop.permute.xlu1 %1971  ;;  %v1992_v63 = vpop.permute.xlu2 %1991 }
 0x282   : > { %v2009_v54 = vsel %vm1997_vm3, %v1972_v30, %v7446_v39  ;;  %v2013_v55 = vsel %vm1997_vm3, %v1964_v58, %v1972_v30  ;;  %v2027_v3 = vsel %vm1997_vm3, %v1992_v63, %v8950_v5  ;;  %v1970_v4 = vpop.permute.xlu0 %1969  ;;  %v8954_v30 = vld [vmem:[#allocation32_spill] sm:$0xff] }
 0x283   : > { %v2077_v51 = vmul.f32 %v2037_v53, %v2013_v55  ;;  %v2078_v10 = vmul.f32 %v2038_v61, %v2009_v54  ;;  %v2057_v33 = vmul.f32 %v7497_v15, %v2027_v3  ;;  %v2012_v6 = vsel %vm1997_vm3, %v8951_v40, %v1970_v4  ;;  %v8955_v54 = vld [vmem:[#allocation34_spill] sm:$0xff] }
 0x284   : > { %v2069_v27 = vmul.f32 %v2037_v53, %v2012_v6  ;;  %v2022_v55 = vsel %vm1997_vm3, %v8955_v54, %v8954_v30 }
 0x285   : > { %v2095_v22 = vpack.c.bf16 %v2078_v10, %v2077_v51  ;;  %v2085_v13 = vpack.c.bf16 %v2058_v38, %v2057_v33  ;;  %v2050_v51 = vmul.f32 %v7506_v19, %v2022_v55 }
 0x287   : > { %2111 = vst [vmem:[#allocation2 + $0x1f0] sm:$0xff] %v2095_v22  ;;  %2153 = vrot.lane.b32.xlu1 %v8932_v24, %s6163_s27  ;;  %2155 = vrot.lane.b32.xlu2 %v8930_v36, %s6163_s27 }
 0x288   : > { %2101 = vst [vmem:[#allocation2 + $0x1a0] sm:$0xff] %v2085_v13  ;;  %2167 = vrot.lane.b32.xlu0 %v8928_v18, %s6163_s27 }
 0x289   : > { %v1978_v12 = vpop.permute.xlu1 %1977  ;;  %v7531_v43 = vpop.permute.xlu2 %2145 }
 0x28a   : > { %8953 = vst [vmem:[#allocation33_spill] sm:$0xff] %v7531_v43  ;;  %v2008_v29 = vsel %vm1997_vm3, %v1970_v4, %v1978_v12  ;;  %v1976_v11 = vpop.permute.xlu0 %1975 }
 0x28b   : > { %v2070_v58 = vmul.f32 %v2038_v61, %v2008_v29  ;;  %v2007_v49 = vsel %vm1997_vm3, %v7385_v28, %v1976_v11  ;;  %v2004_v29 = vsel %vm1997_vm3, %v1978_v12, %v7479_v23 }
 0x28c   : > { %v2062_v48 = vmul.f32 %v2038_v61, %v2007_v49 }
 0x28d   : > { %v2091_v14 = vpack.c.bf16 %v2070_v58, %v2069_v27 }
 0x28e   : > { %v2087_v7 = vpack.c.bf16 %v2062_v48, %v2061_v52 }
 0x28f   : > { %2107 = vst [vmem:[#allocation2 + $0x1d0] sm:$0xff] %v2091_v14  ;;  %2163 = vrot.lane.b32.xlu1 %v8936_v26, %s6163_s27  ;;  %2689 = vrot.lane.b32.xlu2 %v6403_v8, %s6166_s15 }
 0x290   : > { %2103 = vst [vmem:[#allocation2 + $0x1b0] sm:$0xff] %v2087_v7  ;;  %2161 = vrot.lane.b32.xlu0 %v8931_v41, %s6163_s27  ;;  %v2071_v7 = vmul.f32 %v2039_v32, %v2004_v29 }
 0x291   : > { %v1984_v28 = vpop.permute.xlu1 %1983  ;;  %v7544_v53 = vpop.permute.xlu2 %2511 }
 0x292   : > { %v1999_v61 = vsel %vm1997_vm3, %v1984_v28, %v1992_v63  ;;  %v2003_v60 = vsel %vm1997_vm3, %v1976_v11, %v1984_v28  ;;  %v1982_v2 = vpop.permute.xlu0 %1981 }
 0x293   : > { %v2063_v5 = vmul.f32 %v2039_v32, %v2003_v60  ;;  %v2064_v1 = vmul.f32 %v2040_v44, %v1999_v61  ;;  %v2002_v63 = vsel %vm1997_vm3, %v7416_v16, %v1982_v2 }
 0x294   : > { %v2055_v10 = vmul.f32 %v2039_v32, %v2002_v63 }
 0x295   : > { %v2088_v8 = vpack.c.bf16 %v2064_v1, %v2063_v5 }
 0x297   : > { %2104 = vst [vmem:[#allocation2 + $0x1b8] sm:$0xff] %v2088_v8  ;;  %2697 = vrot.lane.b32.xlu1 %v8924_v0, %s6166_s15  ;;  %2699 = vrot.lane.b32.xlu2 %v8922_v17, %s6166_s15 }
 0x298   : > { %2691 = vrot.lane.b32.xlu0 %v6415_v25, %s6166_s15  ;;  %v8956_v25 = vld [vmem:[#allocation52_spill] sm:$0xff] }
 0x299   : > { %v1990_v3 = vpop.permute.xlu1 %1989  ;;  %v7563_v4 = vpop.permute.xlu2 %2525  ;;  %v2025_v40 = vsel %vm1997_vm3, %v8956_v25, %v8945_v21  ;;  %v2024_v21 = vsel %vm1997_vm3, %v8958_v37, %v8957_v9  ;;  %v5751_v9 = vld [vmem:[#allocation2 + $0x15c] sm:$0xf0] }
 0x29a   : > { %v1998_v0 = vsel %vm1997_vm3, %v1982_v2, %v1990_v3  ;;  %v2026_v17 = vsel %vm1997_vm3, %v1990_v3, %v8955_v54  ;;  %v1988_v38 = vpop.permute.xlu0 %1987  ;;  %v2066_v14 = vmul.f32 %v7506_v19, %v2024_v21 }
 0x29b   : > { %v2049_v33 = vmul.f32 %v7497_v15, %v2026_v17  ;;  %v2056_v16 = vmul.f32 %v2040_v44, %v1998_v0  ;;  %v2005_v6 = vsel %vm1997_vm3, %v7446_v39, %v1988_v38 }
 0x29c   : > { %v2079_v27 = vmul.f32 %v2039_v32, %v2005_v6  ;;  %v5747_v6 = vld [vmem:[#allocation2 + $0x144] sm:$0xf] }
 0x29d   : > { %v2081_v22 = vpack.c.bf16 %v2050_v51, %v2049_v33  ;;  %v2084_v13 = vpack.c.bf16 %v2056_v16, %v2055_v10  ;;  %v5759_v33 = vld [vmem:[#allocation2 + $0x19c] sm:$0xf0]  ;;  %v5167_v16 = vld [vmem:[#allocation2 + $0x1a0] sm:$0xf0] }
 0x29f   : > { %2097 = vst [vmem:[#allocation2 + $0x180] sm:$0xff] %v2081_v22  ;;  %2707 = vrot.lane.b32.xlu1 %v8928_v18, %s6166_s15  ;;  %2685 = vrot.lane.b32.xlu2 %v6367_v56, %s6166_s15  ;;  %v2074_v18 = vmul.f32 %v7506_v19, %v2025_v40  ;;  %v5133_v40 = vld [vmem:[#allocation2 + $0x140] sm:$0xf] }
 0x2a0   : > { %2100 = vst [vmem:[#allocation2 + $0x198] sm:$0xff] %v2084_v13  ;;  %2705 = vrot.lane.b32.xlu0 %v8923_v50, %s6166_s15 }
 0x2a1   : > { %v1996_v39 = vpop.permute.xlu1 %1995  ;;  %v7592_v11 = vpop.permute.xlu2 %2507 }
 0x2a2   : > { %8959 = vst [vmem:[#allocation41_spill] sm:$0xff] %v7592_v11  ;;  %v2001_v56 = vsel %vm1997_vm3, %v1988_v38, %v1996_v39  ;;  %v2029_v50 = vsel %vm1997_vm3, %v1996_v39, %v8956_v25  ;;  %v1994_v58 = vpop.permute.xlu0 %1993 }
 0x2a3   : > { %v2073_v49 = vmul.f32 %v7497_v15, %v2029_v50  ;;  %v2080_v52 = vmul.f32 %v2040_v44, %v2001_v56  ;;  %v2000_v12 = vsel %vm1997_vm3, %v7479_v23, %v1994_v58  ;;  %v2028_v48 = vsel %vm1997_vm3, %v1994_v58, %v8958_v37  ;;  %v5135_v37 = vld [vmem:[#allocation2 + $0x160] sm:$0xf0]  ;;  %v5743_v50 = vld [vmem:[#allocation2 + $0x11c] sm:$0xf0] }
 0x2a4   : > { %v2065_v59 = vmul.f32 %v7497_v15, %v2028_v48  ;;  %v2072_v28 = vmul.f32 %v2040_v44, %v2000_v12  ;;  %v7621_v44 = vld [vmem:[#allocation9 + $0x38] sm:$0xff]  ;;  %v5103_v58 = vld [vmem:[#allocation2 + $0x120] sm:$0xf0]  ;;  %v5101_v48 = vld [vmem:[#allocation2 + $0x100] sm:$0xf] }
 0x2a5   : > { %v2093_v61 = vpack.c.bf16 %v2074_v18, %v2073_v49  ;;  %v2096_v60 = vpack.c.bf16 %v2080_v52, %v2079_v27  ;;  %v7634_v30 = vperm.slane %v7621_v44, 1  ;;  %v5134_v18 = vor.u32 %v5751_v9, %v5133_v40  ;;  %v5007_v40 = vld [vmem:[#allocation2 + $0x60] sm:$0xf0] }
 0x2a6   : > { %v2089_v2 = vpack.c.bf16 %v2066_v14, %v2065_v59  ;;  %v2092_v5 = vpack.c.bf16 %v2072_v28, %v2071_v7  ;;  %v5165_v0 = vld [vmem:[#allocation2 + $0x180] sm:$0xf]  ;;  %v5755_v17 = vld [vmem:[#allocation2 + $0x184] sm:$0xf]  ;;  %v5138_v27 = vor.u32 %v5747_v6, %v5135_v37  ;;  %v5102_v7 = vor.u32 %v5743_v50, %v5101_v48 }
 0x2a7   : > { %2109 = vst [vmem:[#allocation2 + $0x1e0] sm:$0xff] %v2093_v61  ;;  %2693 = vrot.lane.b32.xlu1 %v8932_v24, %s6166_s15  ;;  %2695 = vrot.lane.b32.xlu2 %v8930_v36, %s6166_s15  ;;  %v8960_v36 = vld [vmem:[#allocation29_spill] sm:$0xff]  ;;  %v5166_v22 = vor.u32 %v5759_v33, %v5165_v0  ;;  %v5170_v13 = vor.u32 %v5755_v17, %v5167_v16 }
 0x2a8   : > { %2112 = vst [vmem:[#allocation2 + $0x1f8] sm:$0xff] %v2096_v60  ;;  %2687 = vrot.lane.b32.xlu0 %v8919_v20, %s6166_s15  ;;  %v7631_v20 = vperm.slane %v7621_v44, 0  ;;  %v5739_v14 = vld [vmem:[#allocation2 + $0x104] sm:$0xf]  ;;  %v5735_v61 = vld [vmem:[#allocation2 + $0xdc] sm:$0xf0] }
 0x2a9   : > { %2105 = vst [vmem:[#allocation2 + $0x1c0] sm:$0xff] %v2089_v2  ;;  %v7615_v23 = vpop.permute.xlu1 %2509  ;;  %v7617_v15 = vpop.permute.xlu2 %2521  ;;  %v5106_v59 = vor.u32 %v5739_v14, %v5103_v58  ;;  %v5071_v60 = vld [vmem:[#allocation2 + $0xe0] sm:$0xf0]  ;;  %v8961_v2 = vld [vmem:[#allocation23_spill] sm:$0xff]  ;;  %v5005_v37 = vld [vmem:[#allocation2 + $0x40] sm:$0xf] }
 0x2aa   : > { %2108 = vst [vmem:[#allocation2 + $0x1d8] sm:$0xff] %v2092_v5  ;;  %v7619_v19 = vpop.permute.xlu0 %2147  ;;  %v5069_v5 = vld [vmem:[#allocation2 + $0xc0] sm:$0xf]  ;;  %v5039_v0 = vld [vmem:[#allocation2 + $0xa0] sm:$0xf0] }
 0x2ab   : > { %v5723_v33 = vld [vmem:[#allocation2 + $0x84] sm:$0xf]  ;;  %v4973_v48 = vld [vmem:[#allocation2] sm:$0xf] }
 0x2ac   : > { %v5707_v14 = vld [vmem:[#allocation2 + $0x4] sm:$0xf] }
 0x2ae   : > { %v5767_v32 = vld [vmem:[#allocation2 + $0x1dc] sm:$0xf0]  ;;  %v5199_v1 = vld [vmem:[#allocation2 + $0x1e0] sm:$0xf0] }
 0x2af   : > { %2703 = vrot.lane.b32.xlu1 %v8936_v26, %s6166_s15  ;;  %2533 = vrot.lane.b32.xlu2 %v8960_v36, %s6164_s28 }
 0x2b0   : > { %2701 = vrot.lane.b32.xlu0 %v8931_v41, %s6166_s15  ;;  %v5197_v24 = vld [vmem:[#allocation2 + $0x1c0] sm:$0xf]  ;;  %v5763_v8 = vld [vmem:[#allocation2 + $0x1c4] sm:$0xf] }
 0x2b1   : > { %v2520_v54 = vpop.permute.xlu1 %2519  ;;  %v7636_v55 = vpop.permute.xlu2 %2331  ;;  %v5198_v26 = vor.u32 %v5767_v32, %v5197_v24  ;;  %v5202_v63 = vor.u32 %v5763_v8, %v5199_v1  ;;  %v5731_v32 = vld [vmem:[#allocation2 + $0xc4] sm:$0xf] }
 0x2b2   : > { %v2518_v3 = vpop.permute.xlu0 %2517  ;;  %v2597_v21 = vsel %vm2569_vm4, %v7544_v53, %v2520_v54  ;;  %v8962_v1 = vld [vmem:[#allocation21_spill] sm:$0xff] }
 0x2b3   : > { %3798 = vmatpush.bf16.msra.mxu0 %v5198_v26  ;;  %3855 = vmatpush.bf16.msra.mxu3 %v5202_v63  ;;  %v2592_v41 = vsel %vm2569_vm4, %v2518_v3, %v7563_v4  ;;  %v2596_v38 = vsel %vm2569_vm4, %v7615_v23, %v2518_v3  ;;  %v2645_v52 = vmul.f32 %v7631_v20, %v2597_v21  ;;  %v5727_v3 = vld [vmem:[#allocation2 + $0x9c] sm:$0xf0] }
 0x2b4   : > { %v2637_v51 = vmul.f32 %v7631_v20, %v2596_v38  ;;  %v2638_v10 = vmul.f32 %v7634_v30, %v2592_v41  ;;  %v5074_v26 = vor.u32 %v5731_v32, %v5071_v60  ;;  %v5711_v60 = vld [vmem:[#allocation2 + $0x1c] sm:$0xf0] }
 0x2b5   : > { %v4974_v32 = vor.u32 %v5711_v60, %v4973_v48 }
 0x2b6   : > { %v2661_v25 = vpack.c.bf16 %v2638_v10, %v2637_v51  ;;  %v5037_v10 = vld [vmem:[#allocation2 + $0x80] sm:$0xf] }
 0x2b7   : > { %3799 = vmatpush.bf16.msra.mxu0 %v5166_v22  ;;  %3856 = vmatpush.bf16.msra.mxu3 %v5170_v13  ;;  %v5038_v16 = vor.u32 %v5727_v3, %v5037_v10  ;;  %v5042_v22 = vor.u32 %v5723_v33, %v5039_v0 }
 0x2b8   : > { %2677 = vst [vmem:[#allocation2 + $0x3c0] sm:$0xff] %v2661_v25  ;;  %2541 = vrot.lane.b32.xlu1 %v6621_v34, %s6164_s28  ;;  %2543 = vrot.lane.b32.xlu2 %v6629_v46, %s6164_s28  ;;  %v5719_v25 = vld [vmem:[#allocation2 + $0x5c] sm:$0xf0] }
 0x2b9   : > { %2535 = vrot.lane.b32.xlu0 %v6507_v31, %s6164_s28  ;;  %v7655_v29 = vpop.permute.xlu1 %2505  ;;  %v7657_v39 = vpop.permute.xlu2 %2345 }
 0x2ba   : > { %v7659_v56 = vpop.permute.xlu0 %2527 }
 0x2bb   : > { %3800 = vmatpush.bf16.msra.mxu0 %v5134_v18  ;;  %3857 = vmatpush.bf16.msra.mxu3 %v5138_v27  ;;  %v2593_v49 = vsel %vm2569_vm4, %v2520_v54, %v7659_v56  ;;  %v5070_v54 = vor.u32 %v5735_v61, %v5069_v5  ;;  %v5715_v18 = vld [vmem:[#allocation2 + $0x44] sm:$0xf] }
 0x2bc   : > { %v2646_v12 = vmul.f32 %v7634_v30, %v2593_v49  ;;  %v5006_v49 = vor.u32 %v5719_v25, %v5005_v37  ;;  %v4975_v5 = vld [vmem:[#allocation2 + $0x20] sm:$0xf0] }
 0x2be   : > { %v2665_v28 = vpack.c.bf16 %v2646_v12, %v2645_v52  ;;  %v5010_v52 = vor.u32 %v5715_v18, %v5007_v40 }
 0x2bf   : > { %3801 = vmatpush.bf16.msra.mxu0 %v5102_v7  ;;  %3858 = vmatpush.bf16.msra.mxu3 %v5106_v59  ;;  %v5453_v6 = vld [vmem:[#allocation2 + $0x3c0] sm:$0xf] }
 0x2c0   : > { %2681 = vst [vmem:[#allocation2 + $0x3e0] sm:$0xff] %v2665_v28  ;;  %2531 = vrot.lane.b32.xlu1 %v8961_v2, %s6164_s28  ;;  %2537 = vrot.lane.b32.xlu2 %v6561_v57, %s6164_s28 }
 0x2c1   : > { %2529 = vrot.lane.b32.xlu0 %v8962_v1, %s6164_s28  ;;  %v2516_v24 = vpop.permute.xlu1 %2515  ;;  %v7672_v8 = vpop.permute.xlu2 %2327 }
 0x2c2   : > { %8963 = vst [vmem:[#allocation17_spill] sm:$0xff] %v7672_v8  ;;  %v2514_v63 = vpop.permute.xlu0 %2513  ;;  %v2595_v27 = vsel %vm2569_vm4, %v7592_v11, %v2516_v24  ;;  %v5702_v11 = vld [vmem:[#allocation8 + $0x8] sm:$0xf0] }
 0x2c3   : > { %3802 = vmatpush.bf16.msra.mxu0 %v5070_v54  ;;  %3859 = vmatpush.bf16.msra.mxu3 %v5074_v26  ;;  %v2590_v17 = vsel %vm2569_vm4, %v2514_v63, %v7617_v15  ;;  %v2594_v41 = vsel %vm2569_vm4, %v7655_v29, %v2514_v63  ;;  %v2629_v28 = vmul.f32 %v7631_v20, %v2595_v27  ;;  %v5827_v26 = vld [vmem:[#allocation2 + $0x3c4] sm:$0xf] }
 0x2c4   : > { %v2621_v38 = vmul.f32 %v7631_v20, %v2594_v41  ;;  %v2622_v51 = vmul.f32 %v7634_v30, %v2590_v17  ;;  %v4978_v54 = vor.u32 %v5707_v14, %v4975_v5  ;;  %v7702_v63 = vld [vmem:[#allocation9 + $0x30] sm:$0xff] }
 0x2c5   : > { %v2425_v20 = vperm.slane %v7702_v63, 0 }
 0x2c6   : > { %v2653_v13 = vpack.c.bf16 %v2622_v51, %v2621_v38 }
 0x2c7   : > { %3803 = vmatpush.bf16.msra.mxu0 %v5038_v16  ;;  %3860 = vmatpush.bf16.msra.mxu3 %v5042_v22  ;;  %v5831_v9 = vld [vmem:[#allocation2 + $0x3dc] sm:$0xf0]  ;;  %v5455_v59 = vld [vmem:[#allocation2 + $0x3e0] sm:$0xf0] }
 0x2c8   : > { %2669 = vst [vmem:[#allocation2 + $0x380] sm:$0xff] %v2653_v13  ;;  %2353 = vrot.lane.b32.xlu1 %v8960_v36, %s6165_s9  ;;  %2355 = vrot.lane.b32.xlu2 %v6507_v31, %s6165_s9  ;;  %v5454_v21 = vor.u32 %v5831_v9, %v5453_v6  ;;  %v5458_v0 = vor.u32 %v5827_v26, %v5455_v59 }
 0x2c9   : > { %2539 = vrot.lane.b32.xlu0 %v6569_v62, %s6164_s28  ;;  %v7691_v50 = vpop.permute.xlu1 %2329  ;;  %v7693_v58 = vpop.permute.xlu2 %2341 }
 0x2ca   : > { %3817 = vmatpush.bf16.msra.mxu1 %v5454_v21  ;;  %v7695_v12 = vpop.permute.xlu0 %2523 }
 0x2cb   : > { %3804 = vmatpush.bf16.msra.mxu0 %v5006_v49  ;;  %3861 = vmatpush.bf16.msra.mxu3 %v5010_v52  ;;  %v2591_v7 = vsel %vm2569_vm4, %v2516_v24, %v7695_v12 }
 0x2cc   : > { %v2630_v61 = vmul.f32 %v7634_v30, %v2591_v7  ;;  %v2426_v30 = vperm.slane %v7702_v63, 1 }
 0x2ce   : > { %v2657_v3 = vpack.c.bf16 %v2630_v61, %v2629_v28 }
 0x2cf   : > { %3805 = vmatpush.bf16.msra.mxu0 %v4974_v32  ;;  %3862 = vmatpush.bf16.msra.mxu3 %v4978_v54  ;;  %v5421_v22 = vld [vmem:[#allocation2 + $0x380] sm:$0xf]  ;;  %v5819_v25 = vld [vmem:[#allocation2 + $0x384] sm:$0xf] }
 0x2d0   : > { %2673 = vst [vmem:[#allocation2 + $0x3a0] sm:$0xff] %v2657_v3  ;;  %2363 = vrot.lane.b32.xlu1 %v6629_v46, %s6165_s9  ;;  %2349 = vrot.lane.b32.xlu2 %v8962_v1, %s6165_s9 }
 0x2d1   : > { %2361 = vrot.lane.b32.xlu0 %v6621_v34, %s6165_s9  ;;  %v2340_v24 = vpop.permute.xlu1 %2339  ;;  %v7713_v17 = vpop.permute.xlu2 %2151 }
 0x2d2   : > { %8964 = vst [vmem:[#allocation26_spill] sm:$0xff] %v7713_v17  ;;  %v2338_v41 = vpop.permute.xlu0 %2337  ;;  %v2417_v37 = vsel %vm2389_vm5, %v7636_v55, %v2340_v24 }
 0x2d3   : > { %3874 = vmatpush.bf16.msrb.mxu0 %v5458_v0  ;;  %v2412_v38 = vsel %vm2389_vm5, %v2338_v41, %v7657_v39  ;;  %v2416_v51 = vsel %vm2389_vm5, %v7691_v50, %v2338_v41  ;;  %v2465_v52 = vmul.f32 %v2425_v20, %v2417_v37 }
 0x2d4   : > { %v2457_v10 = vmul.f32 %v2425_v20, %v2416_v51  ;;  %v2458_v33 = vmul.f32 %v2426_v30, %v2412_v38 }
 0x2d6   : > { %v2481_v16 = vpack.c.bf16 %v2458_v33, %v2457_v10 }
 0x2d7   : > { %v5823_v13 = vld [vmem:[#allocation2 + $0x39c] sm:$0xf0]  ;;  %v5423_v40 = vld [vmem:[#allocation2 + $0x3a0] sm:$0xf0] }
 0x2d8   : > { %2497 = vst [vmem:[#allocation2 + $0x340] sm:$0xff] %v2481_v16  ;;  %2357 = vrot.lane.b32.xlu1 %v6561_v57, %s6165_s9  ;;  %v5422_v6 = vor.u32 %v5823_v13, %v5421_v22  ;;  %v5426_v9 = vor.u32 %v5819_v25, %v5423_v40  ;;  %2359 = vrot.lane.b32.xlu2 %v6569_v62, %s6165_s9 }
 0x2d9   : > { %2351 = vrot.lane.b32.xlu0 %v8961_v2, %s6165_s9  ;;  %v7730_v21 = vpop.permute.xlu1 %2325  ;;  %v7732_v18 = vpop.permute.xlu2 %2165 }
 0x2da   : > { %8965 = vst [vmem:[#allocation31_spill] sm:$0xff] %v7730_v21  ;;  %3818 = vmatpush.bf16.msra.mxu1 %v5422_v6  ;;  %3875 = vmatpush.bf16.msrb.mxu0 %v5426_v9  ;;  %v7734_v27 = vpop.permute.xlu0 %2347  ;;  %v7771_v6 = vld [vmem:[#allocation9 + $0x28] sm:$0xff] }
 0x2db   : > { %v2413_v49 = vsel %vm2389_vm5, %v2340_v24, %v7734_v27  ;;  %v2246_v9 = vperm.slane %v7771_v6, 1 }
 0x2dc   : > { %v2466_v48 = vmul.f32 %v2426_v30, %v2413_v49 }
 0x2de   : > { %v2485_v14 = vpack.c.bf16 %v2466_v48, %v2465_v52 }
 0x2df   : > { %v5389_v26 = vld [vmem:[#allocation2 + $0x340] sm:$0xf]  ;;  %v5811_v0 = vld [vmem:[#allocation2 + $0x344] sm:$0xf] }
 0x2e0   : > { %2501 = vst [vmem:[#allocation2 + $0x360] sm:$0xff] %v2485_v14  ;;  %2175 = vrot.lane.b32.xlu1 %v6507_v31, %s6163_s27  ;;  %2181 = vrot.lane.b32.xlu2 %v6621_v34, %s6163_s27 }
 0x2e1   : > { %2173 = vrot.lane.b32.xlu0 %v8960_v36, %s6163_s27  ;;  %v2336_v7 = vpop.permute.xlu1 %2335  ;;  %v7745_v59 = vpop.permute.xlu2 %2155 }
 0x2e2   : > { %v2334_v28 = vpop.permute.xlu0 %2333  ;;  %v2415_v51 = vsel %vm2389_vm5, %v7672_v8, %v2336_v7 }
 0x2e3   : > { %v2410_v61 = vsel %vm2389_vm5, %v2334_v28, %v7693_v58  ;;  %v2414_v60 = vsel %vm2389_vm5, %v7730_v21, %v2334_v28  ;;  %v2449_v13 = vmul.f32 %v2425_v20, %v2415_v51  ;;  %v5720_v21 = vld [vmem:[#allocation2 + $0x64] sm:$0xf0] }
 0x2e4   : > { %v2441_v5 = vmul.f32 %v2425_v20, %v2414_v60  ;;  %v2442_v32 = vmul.f32 %v2426_v30, %v2410_v61  ;;  %v2245_v20 = vperm.slane %v7771_v6, 0 }
 0x2e6   : > { %v2473_v54 = vpack.c.bf16 %v2442_v32, %v2441_v5 }
 0x2e7   : > { %v5815_v3 = vld [vmem:[#allocation2 + $0x35c] sm:$0xf0]  ;;  %v5391_v24 = vld [vmem:[#allocation2 + $0x360] sm:$0xf0] }
 0x2e8   : > { %2489 = vst [vmem:[#allocation2 + $0x300] sm:$0xff] %v2473_v54  ;;  %2169 = vrot.lane.b32.xlu1 %v8962_v1, %s6163_s27  ;;  %v5390_v41 = vor.u32 %v5815_v3, %v5389_v26  ;;  %v5394_v38 = vor.u32 %v5811_v0, %v5391_v24  ;;  %2171 = vrot.lane.b32.xlu2 %v8961_v2, %s6163_s27 }
 0x2e9   : > { %2183 = vrot.lane.b32.xlu0 %v6629_v46, %s6163_s27  ;;  %v7762_v10 = vpop.permute.xlu1 %2149  ;;  %v7764_v33 = vpop.permute.xlu2 %2689 }
 0x2ea   : > { %8966 = vst [vmem:[#allocation20_spill] sm:$0xff] %v7764_v33  ;;  %3819 = vmatpush.bf16.msra.mxu1 %v5390_v41  ;;  %3876 = vmatpush.bf16.msrb.mxu0 %v5394_v38  ;;  %v7766_v16 = vpop.permute.xlu0 %2343 }
 0x2eb   : > { %v2411_v22 = vsel %vm2389_vm5, %v2336_v7, %v7766_v16 }
 0x2ec   : > { %v2450_v25 = vmul.f32 %v2426_v30, %v2411_v22 }
 0x2ee   : > { %v2477_v40 = vpack.c.bf16 %v2450_v25, %v2449_v13 }
 0x2ef   : > { %v5357_v28 = vld [vmem:[#allocation2 + $0x300] sm:$0xf]  ;;  %v5803_v60 = vld [vmem:[#allocation2 + $0x304] sm:$0xf] }
 0x2f0   : > { %2493 = vst [vmem:[#allocation2 + $0x320] sm:$0xff] %v2477_v40  ;;  %2179 = vrot.lane.b32.xlu1 %v6569_v62, %s6163_s27  ;;  %2713 = vrot.lane.b32.xlu2 %v8960_v36, %s6166_s15 }
 0x2f1   : > { %2177 = vrot.lane.b32.xlu0 %v6561_v57, %s6163_s27  ;;  %v2160_v37 = vpop.permute.xlu1 %2159  ;;  %v7780_v49 = vpop.permute.xlu2 %2699 }
 0x2f2   : > { %v2158_v30 = vpop.permute.xlu0 %2157  ;;  %v2237_v26 = vsel %vm2209_vm6, %v7713_v17, %v2160_v37  ;;  %v4957_v17 = vld [vmem:[#allocation8 + $0x8] sm:$0xf] }
 0x2f3   : > { %v2232_v52 = vsel %vm2209_vm6, %v2158_v30, %v7732_v18  ;;  %v2236_v48 = vsel %vm2209_vm6, %v7762_v10, %v2158_v30  ;;  %v2285_v41 = vmul.f32 %v2245_v20, %v2237_v26 }
 0x2f4   : > { %v2277_v36 = vmul.f32 %v2245_v20, %v2236_v48  ;;  %v2278_v14 = vmul.f32 %v2246_v9, %v2232_v52 }
 0x2f6   : > { %v2301_v7 = vpack.c.bf16 %v2278_v14, %v2277_v36 }
 0x2f7   : > { %v5807_v61 = vld [vmem:[#allocation2 + $0x31c] sm:$0xf0]  ;;  %v5359_v5 = vld [vmem:[#allocation2 + $0x320] sm:$0xf0] }
 0x2f8   : > { %2317 = vst [vmem:[#allocation2 + $0x2c0] sm:$0xff] %v2301_v7  ;;  %2721 = vrot.lane.b32.xlu1 %v6621_v34, %s6166_s15  ;;  %v5358_v32 = vor.u32 %v5807_v61, %v5357_v28  ;;  %v5362_v54 = vor.u32 %v5803_v60, %v5359_v5  ;;  %2723 = vrot.lane.b32.xlu2 %v6629_v46, %s6166_s15  ;;  %v7842_v5 = vld [vmem:[#allocation9 + $0x40] sm:$0xff] }
 0x2f9   : > { %2715 = vrot.lane.b32.xlu0 %v6507_v31, %s6166_s15  ;;  %v2154_v3 = vpop.permute.xlu1 %2153  ;;  %v7799_v0 = vpop.permute.xlu2 %2685  ;;  %v2235_v46 = vsel %vm2209_vm6, %v7619_v19, %v7745_v59  ;;  %v7846_v26 = vperm.slane %v7842_v5, 0 }
 0x2fa   : > { %3820 = vmatpush.bf16.msra.mxu1 %v5358_v32  ;;  %3877 = vmatpush.bf16.msrb.mxu0 %v5362_v54  ;;  %v7801_v24 = vpop.permute.xlu0 %2167  ;;  %v2234_v31 = vsel %vm2209_vm6, %v7531_v43, %v2154_v3  ;;  %v2269_v40 = vmul.f32 %v2245_v20, %v2235_v46  ;;  %v5261_v46 = vld [vmem:[#allocation2 + $0x240] sm:$0xf] }
 0x2fb   : > { %v2233_v34 = vsel %vm2209_vm6, %v2160_v37, %v7801_v24  ;;  %v2261_v30 = vmul.f32 %v2245_v20, %v2234_v31 }
 0x2fc   : > { %v2286_v38 = vmul.f32 %v2246_v9, %v2233_v34 }
 0x2fe   : > { %v2305_v51 = vpack.c.bf16 %v2286_v38, %v2285_v41 }
 0x2ff   : > { %v5325_v36 = vld [vmem:[#allocation2 + $0x2c0] sm:$0xf]  ;;  %v5795_v14 = vld [vmem:[#allocation2 + $0x2c4] sm:$0xf] }
 0x300   : > { %2321 = vst [vmem:[#allocation2 + $0x2e0] sm:$0xff] %v2305_v51  ;;  %2711 = vrot.lane.b32.xlu1 %v8961_v2, %s6166_s15  ;;  %2717 = vrot.lane.b32.xlu2 %v6561_v57, %s6166_s15 }
 0x301   : > { %2709 = vrot.lane.b32.xlu0 %v8962_v1, %s6166_s15  ;;  %v7819_v22 = vpop.permute.xlu1 %2163  ;;  %v7821_v13 = vpop.permute.xlu2 %2695 }
 0x302   : > { %v2231_v25 = vsel %vm2209_vm6, %v7745_v59, %v7819_v22  ;;  %v7827_v2 = vpop.permute.xlu0 %2161 }
 0x303   : > { %v2270_v37 = vmul.f32 %v2246_v9, %v2231_v25  ;;  %v2230_v57 = vsel %vm2209_vm6, %v2154_v3, %v7827_v2  ;;  %v7849_v3 = vperm.slane %v7842_v5, 1  ;;  %v8968_v25 = vld [vmem:[#allocation38_spill] sm:$0xff] }
 0x304   : > { %v2262_v52 = vmul.f32 %v2246_v9, %v2230_v57  ;;  %v5783_v57 = vld [vmem:[#allocation2 + $0x25c] sm:$0xf0] }
 0x305   : > { %v2297_v1 = vpack.c.bf16 %v2270_v37, %v2269_v40  ;;  %v8969_v40 = vld [vmem:[#allocation64_spill] sm:$0xff] }
 0x306   : > { %v2293_v48 = vpack.c.bf16 %v2262_v52, %v2261_v30  ;;  %v5779_v30 = vld [vmem:[#allocation2 + $0x244] sm:$0xf] }
 0x307   : > { %2313 = vst [vmem:[#allocation2 + $0x2a0] sm:$0xff] %v2297_v1  ;;  %v5799_v7 = vld [vmem:[#allocation2 + $0x2dc] sm:$0xf0]  ;;  %v5327_v28 = vld [vmem:[#allocation2 + $0x2e0] sm:$0xf0] }
 0x308   : > { %2309 = vst [vmem:[#allocation2 + $0x280] sm:$0xff] %v2293_v48  ;;  %2549 = vrot.lane.b32.xlu1 %v6627_v35, %s6164_s28  ;;  %v5326_v59 = vor.u32 %v5799_v7, %v5325_v36  ;;  %v5330_v61 = vor.u32 %v5795_v14, %v5327_v28  ;;  %2551 = vrot.lane.b32.xlu2 %v6631_v47, %s6164_s28  ;;  %v5263_v52 = vld [vmem:[#allocation2 + $0x260] sm:$0xf0] }
 0x309   : > { %2719 = vrot.lane.b32.xlu0 %v6569_v62, %s6166_s15  ;;  %v2698_v9 = vpop.permute.xlu1 %2697  ;;  %v7838_v20 = vpop.permute.xlu2 %2533 }
 0x30a   : > { %3821 = vmatpush.bf16.msra.mxu1 %v5326_v59  ;;  %3878 = vmatpush.bf16.msrb.mxu0 %v5330_v61  ;;  %v7840_v60 = vpop.permute.xlu0 %2691  ;;  %v2776_v31 = vsel %vm2749_vm7, %v7764_v33, %v2698_v9  ;;  %v5771_v33 = vld [vmem:[#allocation2 + $0x204] sm:$0xf] }
 0x30b   : > { %8967 = vst [vmem:[#allocation28_spill] sm:$0xff] %v7840_v60  ;;  %v2777_v41 = vsel %vm2749_vm7, %v7840_v60, %v7780_v49  ;;  %v2817_v59 = vmul.f32 %v7846_v26, %v2776_v31 }
 0x30c   : > { %v2825_v14 = vmul.f32 %v7846_v26, %v2777_v41  ;;  %v4951_v41 = vld [vmem:[#allocation8 + $0xc] sm:$0xf0] }
 0x30e   : > { %v5791_v32 = vld [vmem:[#allocation2 + $0x29c] sm:$0xf0]  ;;  %v5295_v54 = vld [vmem:[#allocation2 + $0x2a0] sm:$0xf0] }
 0x30f   : > { %v5293_v62 = vld [vmem:[#allocation2 + $0x280] sm:$0xf]  ;;  %v5787_v34 = vld [vmem:[#allocation2 + $0x284] sm:$0xf] }
 0x310   : > { %2559 = vrot.lane.b32.xlu1 %v6833_v42, %s6164_s28  ;;  %v5294_v38 = vor.u32 %v5791_v32, %v5293_v62  ;;  %v5298_v51 = vor.u32 %v5787_v34, %v5295_v54  ;;  %2545 = vrot.lane.b32.xlu2 %v8968_v25, %s6164_s28  ;;  %v5262_v32 = vor.u32 %v5783_v57, %v5261_v46  ;;  %v5775_v62 = vld [vmem:[#allocation2 + $0x21c] sm:$0xf0]  ;;  %v5231_v34 = vld [vmem:[#allocation2 + $0x220] sm:$0xf0]  ;;  %v8972_v57 = vld [vmem:[#allocation39_spill] sm:$0xff] }
 0x311   : > { %2557 = vrot.lane.b32.xlu0 %v8969_v40, %s6164_s28  ;;  %v7864_v37 = vpop.permute.xlu1 %2707  ;;  %v5234_v60 = vor.u32 %v5771_v33, %v5231_v34  ;;  %v8971_v46 = vld [vmem:[#allocation57_spill] sm:$0xff] }
 0x312   : > { %v2773_v1 = vsel %vm2749_vm7, %v7780_v49, %v7864_v37  ;;  %v7870_v48 = vpop.permute.xlu2 %2543  ;;  %3822 = vmatpush.bf16.msra.mxu1 %v5294_v38  ;;  %3879 = vmatpush.bf16.msrb.mxu0 %v5298_v51  ;;  %v7872_v36 = vpop.permute.xlu0 %2705  ;;  %v5266_v49 = vor.u32 %v5779_v30, %v5263_v52  ;;  %v5701_v51 = vld [vmem:[#allocation8 + $0x4] sm:$0xf] }
 0x313   : > { %v2826_v7 = vmul.f32 %v7849_v3, %v2773_v1  ;;  %v2772_v28 = vsel %vm2749_vm7, %v2698_v9, %v7872_v36  ;;  %v5229_v1 = vld [vmem:[#allocation2 + $0x200] sm:$0xf]  ;;  %v8970_v9 = vld [vmem:[#allocation55_spill] sm:$0xff]  ;;  %v7887_v52 = vor.u32 %v5701_v51, %v4951_v41 }
 0x314   : > { %v2818_v61 = vmul.f32 %v7849_v3, %v2772_v28  ;;  %v5230_v31 = vor.u32 %v5775_v62, %v5229_v1 }
 0x315   : > { %v2845_v54 = vpack.c.bf16 %v2826_v7, %v2825_v14 }
 0x316   : > { %v2841_v38 = vpack.c.bf16 %v2818_v61, %v2817_v59  ;;  %3823 = vmatpush.bf16.msra.mxu1 %v5262_v32  ;;  %3880 = vmatpush.bf16.msrb.mxu0 %v5266_v49 }
 0x317   : > { %2861 = vst [vmem:[#allocation2 + $0x460] sm:$0xff] %v2845_v54 }
 0x318   : > { %2857 = vst [vmem:[#allocation2 + $0x440] sm:$0xff] %v2841_v38  ;;  %2553 = vrot.lane.b32.xlu1 %v8970_v9, %s6164_s28  ;;  %2555 = vrot.lane.b32.xlu2 %v8971_v46, %s6164_s28 }
 0x319   : > { %2547 = vrot.lane.b32.xlu0 %v8972_v57, %s6164_s28  ;;  %v2694_v30 = vpop.permute.xlu1 %2693 }
 0x31a   : > { %v7889_v14 = vpop.permute.xlu2 %2537  ;;  %v7891_v7 = vpop.permute.xlu0 %2687  ;;  %3824 = vmatpush.bf16.msra.mxu1 %v5230_v31  ;;  %3881 = vmatpush.bf16.msrb.mxu0 %v5234_v60  ;;  %v2774_v60 = vsel %vm2749_vm7, %v7799_v0, %v2694_v30 }
 0x31b   : > { %8973 = vst [vmem:[#allocation19_spill] sm:$0xff] %v7891_v7  ;;  %v2775_v32 = vsel %vm2749_vm7, %v7891_v7, %v7821_v13 }
 0x31c   : > { %v2809_v41 = vmul.f32 %v7846_v26, %v2775_v32  ;;  %v7930_v32 = vperm.slane %v7621_v44, 3 }
 0x31d   : > { %3825 = vmatmul.bf16.vlgmr.msra.gmra.mxu1 %v7887_v52 }
 0x31e   : > { %v5847_v28 = vld [vmem:[#allocation2 + $0x45c] sm:$0xf0]  ;;  %v5519_v59 = vld [vmem:[#allocation2 + $0x460] sm:$0xf0] }
 0x31f   : > { %v5517_v33 = vld [vmem:[#allocation2 + $0x440] sm:$0xf]  ;;  %v5843_v61 = vld [vmem:[#allocation2 + $0x444] sm:$0xf] }
 0x320   : > { %2371 = vrot.lane.b32.xlu1 %v6631_v47, %s6165_s9  ;;  %v5518_v49 = vor.u32 %v5847_v28, %v5517_v33  ;;  %v5522_v54 = vor.u32 %v5843_v61, %v5519_v59  ;;  %2377 = vrot.lane.b32.xlu2 %v8969_v40, %s6165_s9  ;;  %v2801_v28 = vmul.f32 %v7846_v26, %v2774_v60  ;;  %v7925_v61 = vperm.slane %v7621_v44, 2 }
 0x321   : > { %2369 = vrot.lane.b32.xlu0 %v6627_v35, %s6165_s9  ;;  %v7907_v62 = vpop.permute.xlu1 %2703  ;;  %v2588_v26 = vsel %vm2569_vm4, %v7563_v4, %v7838_v20 }
 0x322   : > { %v2771_v34 = vsel %vm2749_vm7, %v7821_v13, %v7907_v62  ;;  %v7913_v38 = vpop.permute.xlu2 %2355  ;;  %3842 = vmatpush.bf16.msra.mxu2 %v5518_v49  ;;  %v7915_v51 = vpop.permute.xlu0 %2701  ;;  %3899 = vmatpush.bf16.msrb.mxu1 %v5522_v54  ;;  %v2639_v54 = vmul.f32 %v7925_v61, %v2588_v26 }
 0x323   : > { %v2810_v1 = vmul.f32 %v7849_v3, %v2771_v34  ;;  %v2770_v31 = vsel %vm2749_vm7, %v2694_v30, %v7915_v51 }
 0x324   : > { %v2802_v59 = vmul.f32 %v7849_v3, %v2770_v31 }
 0x325   : > { %v2837_v33 = vpack.c.bf16 %v2810_v1, %v2809_v41 }
 0x326   : > { %v2833_v13 = vpack.c.bf16 %v2802_v59, %v2801_v28 }
 0x327   : > { %2853 = vst [vmem:[#allocation2 + $0x420] sm:$0xff] %v2837_v33  ;;  %v5205_v33 = vld [vmem:[#allocation2 + $0x1c8] sm:$0xf] }
 0x328   : > { %2849 = vst [vmem:[#allocation2 + $0x400] sm:$0xff] %v2833_v13  ;;  %2365 = vrot.lane.b32.xlu1 %v8968_v25, %s6165_s9  ;;  %2367 = vrot.lane.b32.xlu2 %v8972_v57, %s6165_s9  ;;  %v5207_v13 = vld [vmem:[#allocation2 + $0x1e8] sm:$0xf0] }
 0x329   : > { %2379 = vrot.lane.b32.xlu0 %v6833_v42, %s6165_s9 }
 0x32a   : > { %v7940_v3 = vpop.permute.xlu1 %2541  ;;  %v7946_v44 = vpop.permute.xlu2 %2349 }
 0x32b   : > { %v2584_v30 = vsel %vm2569_vm4, %v7838_v20, %v7940_v3  ;;  %v2536_v49 = vpop.permute.xlu0 %2535  ;;  %v5768_v20 = vld [vmem:[#allocation2 + $0x1e4] sm:$0xf0] }
 0x32c   : > { %v2640_v4 = vmul.f32 %v7930_v32, %v2584_v30  ;;  %v2585_v60 = vsel %vm2569_vm4, %v2536_v49, %v7870_v48  ;;  %v2589_v34 = vsel %vm2569_vm4, %v7659_v56, %v2536_v49  ;;  %v5764_v49 = vld [vmem:[#allocation2 + $0x1cc] sm:$0xf] }
 0x32d   : > { %v2647_v41 = vmul.f32 %v7925_v61, %v2589_v34  ;;  %v2648_v1 = vmul.f32 %v7930_v32, %v2585_v60  ;;  %v5703_v34 = vld [vmem:[#allocation8 + $0x10] sm:$0xf0] }
 0x32e   : > { %v2662_v31 = vpack.c.bf16 %v2640_v4, %v2639_v54  ;;  %v5839_v28 = vld [vmem:[#allocation2 + $0x41c] sm:$0xf0]  ;;  %v5487_v59 = vld [vmem:[#allocation2 + $0x420] sm:$0xf0]  ;;  %v5206_v54 = vor.u32 %v5768_v20, %v5205_v33  ;;  %v5210_v4 = vor.u32 %v5764_v49, %v5207_v13  ;;  %v7964_v60 = vor.u32 %v5703_v34, %v4957_v17  ;;  %v5173_v20 = vld [vmem:[#allocation2 + $0x188] sm:$0xf] }
 0x32f   : > { %v2666_v26 = vpack.c.bf16 %v2648_v1, %v2647_v41  ;;  %v5485_v30 = vld [vmem:[#allocation2 + $0x400] sm:$0xf]  ;;  %v5835_v7 = vld [vmem:[#allocation2 + $0x404] sm:$0xf]  ;;  %v5760_v1 = vld [vmem:[#allocation2 + $0x1a4] sm:$0xf0] }
 0x330   : > { %2678 = vst [vmem:[#allocation2 + $0x3c8] sm:$0xff] %v2662_v31  ;;  %2375 = vrot.lane.b32.xlu1 %v8971_v46, %s6165_s9  ;;  %v5486_v43 = vor.u32 %v5839_v28, %v5485_v30  ;;  %v5490_v56 = vor.u32 %v5835_v7, %v5487_v59  ;;  %2189 = vrot.lane.b32.xlu2 %v6627_v35, %s6163_s27  ;;  %v5175_v31 = vld [vmem:[#allocation2 + $0x1a8] sm:$0xf0] }
 0x331   : > { %2682 = vst [vmem:[#allocation2 + $0x3e8] sm:$0xff] %v2666_v26  ;;  %2373 = vrot.lane.b32.xlu0 %v8970_v9, %s6165_s9  ;;  %v5756_v33 = vld [vmem:[#allocation2 + $0x18c] sm:$0xf]  ;;  %v5174_v26 = vor.u32 %v5760_v1, %v5173_v20 }
 0x332   : > { %v2532_v41 = vpop.permute.xlu1 %2531  ;;  %3843 = vmatpush.bf16.msra.mxu2 %v5486_v43  ;;  %3900 = vmatpush.bf16.msrb.mxu1 %v5490_v56  ;;  %v7966_v7 = vpop.permute.xlu2 %2359  ;;  %v5178_v30 = vor.u32 %v5756_v33, %v5175_v31  ;;  %v5752_v56 = vld [vmem:[#allocation2 + $0x164] sm:$0xf0] }
 0x333   : > { %v2530_v28 = vpop.permute.xlu0 %2529  ;;  %v5744_v33 = vld [vmem:[#allocation2 + $0x124] sm:$0xf0] }
 0x334   : > { %v2582_v59 = vsel %vm2569_vm4, %v2530_v28, %v7889_v14  ;;  %v2586_v17 = vsel %vm2569_vm4, %v7617_v15, %v2530_v28  ;;  %v5748_v28 = vld [vmem:[#allocation2 + $0x14c] sm:$0xf] }
 0x335   : > { %v2623_v43 = vmul.f32 %v7925_v61, %v2586_v17  ;;  %v2624_v13 = vmul.f32 %v7930_v32, %v2582_v59  ;;  %5547 = vmatmul.msk.bf16.vlgmr.msra.gmra.mxu2 %vm3791_vm8, %v7964_v60  ;;  %v2587_v59 = vsel %vm2569_vm4, %v7695_v12, %v2532_v41 }
 0x336   : > { %3912 = vmatpush.bf16.msrb.mxu2 %v5206_v54  ;;  %3969 = vmatpush.bf16.msra.mxu1 %v5210_v4  ;;  %v5143_v54 = vld [vmem:[#allocation2 + $0x168] sm:$0xf0]  ;;  %v5141_v4 = vld [vmem:[#allocation2 + $0x148] sm:$0xf] }
 0x337   : > { %v2654_v49 = vpack.c.bf16 %v2624_v13, %v2623_v43  ;;  %v5461_v34 = vld [vmem:[#allocation2 + $0x3c8] sm:$0xf]  ;;  %v5142_v31 = vor.u32 %v5752_v56, %v5141_v4  ;;  %v5146_v20 = vor.u32 %v5748_v28, %v5143_v54  ;;  %v5740_v54 = vld [vmem:[#allocation2 + $0x10c] sm:$0xf] }
 0x338   : > { %2197 = vrot.lane.b32.xlu1 %v8969_v40, %s6163_s27  ;;  %v5832_v15 = vld [vmem:[#allocation2 + $0x3e4] sm:$0xf0]  ;;  %2199 = vrot.lane.b32.xlu2 %v6833_v42, %s6163_s27 }
 0x339   : > { %2670 = vst [vmem:[#allocation2 + $0x388] sm:$0xff] %v2654_v49  ;;  %2191 = vrot.lane.b32.xlu0 %v6631_v47, %s6163_s27  ;;  %v5462_v1 = vor.u32 %v5832_v15, %v5461_v34  ;;  %v5109_v56 = vld [vmem:[#allocation2 + $0x108] sm:$0xf]  ;;  %v2631_v49 = vmul.f32 %v7925_v61, %v2587_v59 }
 0x33a   : > { %3913 = vmatpush.bf16.msrb.mxu2 %v5174_v26  ;;  %3970 = vmatpush.bf16.msra.mxu1 %v5178_v30  ;;  %v2354_v17 = vpop.permute.xlu1 %2353  ;;  %v7987_v43 = vpop.permute.xlu2 %2181  ;;  %v5111_v26 = vld [vmem:[#allocation2 + $0x128] sm:$0xf0]  ;;  %v5110_v34 = vor.u32 %v5744_v33, %v5109_v56  ;;  %v5736_v4 = vld [vmem:[#allocation2 + $0xe4] sm:$0xf0] }
 0x33b   : > { %3931 = vmatpush.bf16.msrb.mxu3 %v5462_v1  ;;  %v7989_v13 = vpop.permute.xlu0 %2539  ;;  %v5114_v15 = vor.u32 %v5740_v54, %v5111_v26  ;;  %v5079_v1 = vld [vmem:[#allocation2 + $0xe8] sm:$0xf0]  ;;  %v5077_v61 = vld [vmem:[#allocation2 + $0xc8] sm:$0xf] }
 0x33c   : > { %v2583_v30 = vsel %vm2569_vm4, %v2532_v41, %v7989_v13  ;;  %v8002_v41 = vperm.slane %v7702_v63, 3  ;;  %v5078_v59 = vor.u32 %v5736_v4, %v5077_v61 }
 0x33d   : > { %v2632_v12 = vmul.f32 %v7930_v32, %v2583_v30  ;;  %v2409_v32 = vsel %vm2389_vm5, %v7734_v27, %v7913_v38  ;;  %v5728_v30 = vld [vmem:[#allocation2 + $0xa4] sm:$0xf0] }
 0x33e   : > { %3914 = vmatpush.bf16.msrb.mxu2 %v5142_v31  ;;  %3971 = vmatpush.bf16.msra.mxu1 %v5146_v20  ;;  %v7997_v31 = vperm.slane %v7702_v63, 2  ;;  %v5732_v20 = vld [vmem:[#allocation2 + $0xcc] sm:$0xf]  ;;  %v2408_v63 = vsel %vm2389_vm5, %v7657_v39, %v2354_v17 }
 0x33f   : > { %v2658_v28 = vpack.c.bf16 %v2632_v12, %v2631_v49  ;;  %v5082_v26 = vor.u32 %v5732_v20, %v5079_v1  ;;  %v5047_v12 = vld [vmem:[#allocation2 + $0xa8] sm:$0xf0] }
 0x340   : > { %2187 = vrot.lane.b32.xlu1 %v8972_v57, %s6163_s27  ;;  %2193 = vrot.lane.b32.xlu2 %v8970_v9, %s6163_s27  ;;  %v2459_v4 = vmul.f32 %v7997_v31, %v2408_v63  ;;  %v5724_v1 = vld [vmem:[#allocation2 + $0x8c] sm:$0xf] }
 0x341   : > { %2674 = vst [vmem:[#allocation2 + $0x3a8] sm:$0xff] %v2658_v28  ;;  %2185 = vrot.lane.b32.xlu0 %v8968_v25, %s6163_s27  ;;  %v5050_v20 = vor.u32 %v5724_v1, %v5047_v12 }
 0x342   : > { %3915 = vmatpush.bf16.msrb.mxu2 %v5110_v34  ;;  %3972 = vmatpush.bf16.msra.mxu1 %v5114_v15  ;;  %v8015_v33 = vpop.permute.xlu1 %2363  ;;  %v8021_v56 = vpop.permute.xlu2 %2171  ;;  %v2467_v34 = vmul.f32 %v7997_v31, %v2409_v32  ;;  %v5045_v15 = vld [vmem:[#allocation2 + $0x88] sm:$0xf]  ;;  %v5015_v32 = vld [vmem:[#allocation2 + $0x68] sm:$0xf0] }
 0x343   : > { %v2405_v27 = vsel %vm2389_vm5, %v7913_v38, %v8015_v33  ;;  %v8023_v49 = vpop.permute.xlu0 %2361  ;;  %v5046_v28 = vor.u32 %v5728_v30, %v5045_v15  ;;  %v2406_v30 = vsel %vm2389_vm5, %v7693_v58, %v7946_v44 }
 0x344   : > { %v2468_v54 = vmul.f32 %v8002_v41, %v2405_v27  ;;  %v2404_v39 = vsel %vm2389_vm5, %v2354_v17, %v8023_v49  ;;  %v4949_v27 = vld [vmem:[#allocation8] sm:$0xf]  ;;  %v5429_v17 = vld [vmem:[#allocation2 + $0x388] sm:$0xf]  ;;  %v2443_v15 = vmul.f32 %v7997_v31, %v2406_v30 }
 0x345   : > { %v2460_v38 = vmul.f32 %v8002_v41, %v2404_v39 }
 0x346   : > { %3916 = vmatpush.bf16.msrb.mxu2 %v5078_v59  ;;  %3973 = vmatpush.bf16.msra.mxu1 %v5082_v26  ;;  %v2486_v61 = vpack.c.bf16 %v2468_v54, %v2467_v34  ;;  %v5013_v59 = vld [vmem:[#allocation2 + $0x48] sm:$0xf]  ;;  %v8034_v26 = vor.u32 %v5702_v11, %v4949_v27  ;;  %v5716_v54 = vld [vmem:[#allocation2 + $0x4c] sm:$0xf] }
 0x347   : > { %v2482_v8 = vpack.c.bf16 %v2460_v38, %v2459_v4  ;;  %v5014_v34 = vor.u32 %v5720_v21, %v5013_v59  ;;  %v5018_v39 = vor.u32 %v5716_v54, %v5015_v32  ;;  %v5712_v11 = vld [vmem:[#allocation2 + $0x24] sm:$0xf0]  ;;  %v4983_v21 = vld [vmem:[#allocation2 + $0x28] sm:$0xf0] }
 0x348   : > { %2502 = vst [vmem:[#allocation2 + $0x368] sm:$0xff] %v2486_v61  ;;  %2729 = vrot.lane.b32.xlu1 %v6627_v35, %s6166_s15  ;;  %v5824_v63 = vld [vmem:[#allocation2 + $0x3a4] sm:$0xf0]  ;;  %2731 = vrot.lane.b32.xlu2 %v6631_v47, %s6166_s15  ;;  %v5708_v59 = vld [vmem:[#allocation2 + $0xc] sm:$0xf] }
 0x349   : > { %2498 = vst [vmem:[#allocation2 + $0x348] sm:$0xff] %v2482_v8  ;;  %2195 = vrot.lane.b32.xlu0 %v8971_v46, %s6163_s27  ;;  %v5430_v12 = vor.u32 %v5824_v63, %v5429_v17  ;;  %3806 = vmatmul.bf16.vlgmr.msra.gmra.mxu0 %v8034_v26  ;;  %v5828_v32 = vld [vmem:[#allocation2 + $0x3cc] sm:$0xf]  ;;  %v4986_v63 = vor.u32 %v5708_v59, %v4983_v21  ;;  %v5705_v59 = vld [vmem:[#allocation8 + $0x20] sm:$0xf0] }
 0x34a   : > { %3917 = vmatpush.bf16.msrb.mxu2 %v5046_v28  ;;  %3974 = vmatpush.bf16.msra.mxu1 %v5050_v20  ;;  %v8044_v35 = vpop.permute.xlu1 %2357  ;;  %v8052_v47 = vpop.permute.xlu2 %2713  ;;  %v5463_v27 = vld [vmem:[#allocation2 + $0x3e8] sm:$0xf0] }
 0x34b   : > { %3863 = vmatmul.bf16.vlgmr.msra.gmra.mxu3 %v8034_v26  ;;  %v2402_v8 = vsel %vm2389_vm5, %v7946_v44, %v8044_v35  ;;  %v2352_v58 = vpop.permute.xlu0 %2351  ;;  %v4981_v44 = vld [vmem:[#allocation2 + $0x8] sm:$0xf]  ;;  %v5431_v54 = vld [vmem:[#allocation2 + $0x3a8] sm:$0xf0] }
 0x34c   : > { %3932 = vmatpush.bf16.msrb.mxu3 %v5430_v12  ;;  %v2444_v4 = vmul.f32 %v8002_v41, %v2402_v8  ;;  %v2403_v38 = vsel %vm2389_vm5, %v2352_v58, %v7966_v7  ;;  %v2407_v28 = vsel %vm2389_vm5, %v7766_v16, %v2352_v58  ;;  %v4982_v20 = vor.u32 %v5712_v11, %v4981_v44  ;;  %v5820_v58 = vld [vmem:[#allocation2 + $0x38c] sm:$0xf] }
 0x34d   : > { %v2451_v1 = vmul.f32 %v7997_v31, %v2407_v28  ;;  %v2452_v61 = vmul.f32 %v8002_v41, %v2403_v38  ;;  %v5466_v16 = vor.u32 %v5828_v32, %v5463_v27  ;;  %v8071_v41 = vperm.slane %v7771_v6, 3 }
 0x34e   : > { %3918 = vmatpush.bf16.msrb.mxu2 %v5014_v34  ;;  %3975 = vmatpush.bf16.msra.mxu1 %v5018_v39  ;;  %v2474_v17 = vpack.c.bf16 %v2444_v4, %v2443_v15  ;;  %v2247_v11 = vperm.slane %v7771_v6, 2  ;;  %v5434_v21 = vor.u32 %v5820_v58, %v5431_v54  ;;  %v8974_v58 = vld [vmem:[#allocation66_spill] sm:$0xff] }
 0x34f   : > { %v2478_v30 = vpack.c.bf16 %v2452_v61, %v2451_v1  ;;  %v5816_v12 = vld [vmem:[#allocation2 + $0x364] sm:$0xf0]  ;;  %v5399_v28 = vld [vmem:[#allocation2 + $0x368] sm:$0xf0]  ;;  %v4961_v1 = vld [vmem:[#allocation8 + $0x18] sm:$0xf] }
 0x350   : > { %2490 = vst [vmem:[#allocation2 + $0x308] sm:$0xff] %v2474_v17  ;;  %2739 = vrot.lane.b32.xlu1 %v6833_v42, %s6166_s15  ;;  %v5397_v34 = vld [vmem:[#allocation2 + $0x348] sm:$0xf]  ;;  %2725 = vrot.lane.b32.xlu2 %v8968_v25, %s6166_s15  ;;  %v5812_v38 = vld [vmem:[#allocation2 + $0x34c] sm:$0xf]  ;;  %v8089_v17 = vor.u32 %v5705_v59, %v4961_v1 }
 0x351   : > { %2494 = vst [vmem:[#allocation2 + $0x328] sm:$0xff] %v2478_v30  ;;  %2737 = vrot.lane.b32.xlu0 %v8969_v40, %s6166_s15  ;;  %v5398_v31 = vor.u32 %v5816_v12, %v5397_v34  ;;  %v5402_v61 = vor.u32 %v5812_v38, %v5399_v28  ;;  %v5704_v30 = vld [vmem:[#allocation8 + $0x1c] sm:$0xf]  ;;  %v4963_v12 = vld [vmem:[#allocation8 + $0x24] sm:$0xf0] }
 0x352   : > { %3919 = vmatpush.bf16.msrb.mxu2 %v4982_v20  ;;  %3976 = vmatpush.bf16.msra.mxu1 %v4986_v63  ;;  %v2176_v39 = vpop.permute.xlu1 %2175  ;;  %v8074_v8 = vpop.permute.xlu2 %2723 }
 0x353   : > { %3933 = vmatpush.bf16.msrb.mxu3 %v5398_v31  ;;  %v2174_v42 = vpop.permute.xlu0 %2173  ;;  %v2229_v63 = vsel %vm2209_vm6, %v7801_v24, %v2176_v39 }
 0x354   : > { %v2224_v25 = vsel %vm2209_vm6, %v2174_v42, %v7987_v43  ;;  %v2228_v40 = vsel %vm2209_vm6, %v7732_v18, %v2174_v42  ;;  %v2287_v24 = vmul.f32 %v2247_v11, %v2229_v63 }
 0x355   : > { %v2279_v15 = vmul.f32 %v2247_v11, %v2228_v40  ;;  %v2280_v4 = vmul.f32 %v8071_v41, %v2224_v25  ;;  %v2227_v25 = vsel %vm2209_vm6, %v7819_v22, %v8021_v56  ;;  %v8976_v40 = vld [vmem:[#allocation65_spill] sm:$0xff] }
 0x356   : > { %3988 = vmatpush.bf16.msra.mxu2 %v5466_v16  ;;  %v2271_v28 = vmul.f32 %v2247_v11, %v2227_v25 }
 0x357   : > { %v2302_v6 = vpack.c.bf16 %v2280_v4, %v2279_v15  ;;  %v5365_v44 = vld [vmem:[#allocation2 + $0x308] sm:$0xf]  ;;  %v5804_v32 = vld [vmem:[#allocation2 + $0x30c] sm:$0xf] }
 0x358   : > { %2733 = vrot.lane.b32.xlu1 %v8970_v9, %s6166_s15  ;;  %v5808_v20 = vld [vmem:[#allocation2 + $0x324] sm:$0xf0]  ;;  %2735 = vrot.lane.b32.xlu2 %v8971_v46, %s6166_s15  ;;  %v5367_v27 = vld [vmem:[#allocation2 + $0x328] sm:$0xf0] }
 0x359   : > { %2318 = vst [vmem:[#allocation2 + $0x2c8] sm:$0xff] %v2302_v6  ;;  %2727 = vrot.lane.b32.xlu0 %v8972_v57, %s6166_s15  ;;  %v5366_v18 = vor.u32 %v5808_v20, %v5365_v44  ;;  %3811 = vmatmul.bf16.gmra.mxu0 %v8089_v17  ;;  %v8099_v57 = vor.u32 %v5704_v30, %v4963_v12  ;;  %v8136_v20 = vperm.slane %v7842_v5, 2 }
 0x35a   : > { %3989 = vmatpush.bf16.msra.mxu2 %v5434_v21  ;;  %v2170_v9 = vpop.permute.xlu1 %2169  ;;  %v8094_v16 = vpop.permute.xlu2 %2717  ;;  %v5370_v31 = vor.u32 %v5804_v32, %v5367_v27  ;;  %v8141_v32 = vperm.slane %v7842_v5, 3 }
 0x35b   : > { %3934 = vmatpush.bf16.msrb.mxu3 %v5366_v18  ;;  %v8096_v46 = vpop.permute.xlu0 %2183  ;;  %3830 = vmatmul.bf16.gmra.mxu1 %v8099_v57  ;;  %v2226_v21 = vsel %vm2209_vm6, %v7827_v2, %v2170_v9 }
 0x35c   : > { %v2225_v34 = vsel %vm2209_vm6, %v2176_v39, %v8096_v46  ;;  %3868 = vmatmul.bf16.gmra.mxu3 %v8089_v17  ;;  %v8975_v39 = vld [vmem:[#allocation56_spill] sm:$0xff]  ;;  %v2263_v1 = vmul.f32 %v2247_v11, %v2226_v21  ;;  %v8977_v11 = vld [vmem:[#allocation58_spill] sm:$0xff] }
 0x35d   : > { %v2288_v54 = vmul.f32 %v8071_v41, %v2225_v34 }
 0x35e   : > { %3990 = vmatpush.bf16.msra.mxu2 %v5402_v61 }
 0x35f   : > { %v2306_v42 = vpack.c.bf16 %v2288_v54, %v2287_v24 }
 0x360   : > { %2567 = vrot.lane.b32.xlu1 %v8974_v58, %s6164_s28  ;;  %2561 = vrot.lane.b32.xlu2 %v8975_v39, %s6164_s28  ;;  %v5796_v18 = vld [vmem:[#allocation2 + $0x2cc] sm:$0xf] }
 0x361   : > { %2322 = vst [vmem:[#allocation2 + $0x2e8] sm:$0xff] %v2306_v42  ;;  %2565 = vrot.lane.b32.xlu0 %v8976_v40, %s6164_s28 }
 0x362   : > { %3991 = vmatpush.bf16.msra.mxu2 %v5370_v31  ;;  %v8120_v15 = vpop.permute.xlu1 %2179  ;;  %v8126_v38 = vpop.permute.xlu2 %2551 }
 0x363   : > { %v2223_v4 = vsel %vm2209_vm6, %v8021_v56, %v8120_v15  ;;  %v8128_v22 = vpop.permute.xlu0 %2177  ;;  %v5333_v56 = vld [vmem:[#allocation2 + $0x2c8] sm:$0xf] }
 0x364   : > { %v2272_v6 = vmul.f32 %v8071_v41, %v2223_v4  ;;  %v2222_v44 = vsel %vm2209_vm6, %v2170_v9, %v8128_v22  ;;  %v4969_v4 = vld [vmem:[#allocation8 + $0x20] sm:$0xf] }
 0x365   : > { %v2264_v2 = vmul.f32 %v8071_v41, %v2222_v44  ;;  %v2768_v41 = vsel %vm2749_vm7, %v7872_v36, %v8052_v47 }
 0x366   : > { %v2298_v61 = vpack.c.bf16 %v2272_v6, %v2271_v28  ;;  %v2819_v31 = vmul.f32 %v8136_v20, %v2768_v41  ;;  %v5706_v28 = vld [vmem:[#allocation8 + $0x28] sm:$0xf0] }
 0x367   : > { %v2294_v59 = vpack.c.bf16 %v2264_v2, %v2263_v1  ;;  %v8172_v2 = vor.u32 %v5706_v28, %v4969_v4  ;;  %v5780_v41 = vld [vmem:[#allocation2 + $0x24c] sm:$0xf] }
 0x368   : > { %2314 = vst [vmem:[#allocation2 + $0x2a8] sm:$0xff] %v2298_v61  ;;  %2385 = vrot.lane.b32.xlu1 %v8976_v40, %s6165_s9  ;;  %v5800_v27 = vld [vmem:[#allocation2 + $0x2e4] sm:$0xf0]  ;;  %v5335_v63 = vld [vmem:[#allocation2 + $0x2e8] sm:$0xf0]  ;;  %2387 = vrot.lane.b32.xlu2 %v8974_v58, %s6165_s9 }
 0x369   : > { %2310 = vst [vmem:[#allocation2 + $0x288] sm:$0xff] %v2294_v59  ;;  %2563 = vrot.lane.b32.xlu0 %v8977_v11, %s6164_s28  ;;  %v5334_v9 = vor.u32 %v5800_v27, %v5333_v56  ;;  %v5338_v30 = vor.u32 %v5796_v18, %v5335_v63  ;;  %3882 = vmatmul.bf16.vlgmr.msrb.gmra.mxu0 %v7887_v52  ;;  %v5269_v18 = vld [vmem:[#allocation2 + $0x248] sm:$0xf]  ;;  %v5772_v4 = vld [vmem:[#allocation2 + $0x20c] sm:$0xf] }
 0x36a   : > { %v8151_v12 = vpop.permute.xlu1 %2721  ;;  %v8157_v34 = vpop.permute.xlu2 %2545  ;;  %v5784_v27 = vld [vmem:[#allocation2 + $0x264] sm:$0xf0]  ;;  %5548 = vmatmul.msk.bf16.gmra.mxu2 %vm3791_vm8, %v8172_v2  ;;  %v5239_v28 = vld [vmem:[#allocation2 + $0x228] sm:$0xf0] }
 0x36b   : > { %v2764_v5 = vsel %vm2749_vm7, %v8052_v47, %v8151_v12  ;;  %3935 = vmatpush.bf16.msrb.mxu3 %v5334_v9  ;;  %3992 = vmatpush.bf16.msra.mxu2 %v5338_v30  ;;  %v2716_v36 = vpop.permute.xlu0 %2715  ;;  %v5271_v9 = vld [vmem:[#allocation2 + $0x268] sm:$0xf0] }
 0x36c   : > { %v2820_v24 = vmul.f32 %v8141_v32, %v2764_v5  ;;  %v2765_v54 = vsel %vm2749_vm7, %v2716_v36, %v8074_v8  ;;  %v2769_v42 = vsel %vm2749_vm7, %v7864_v37, %v2716_v36  ;;  %5549 = vmatmul.msk.bf16.vlgmr.msrb.gmra.mxu1 %vm3791_vm8, %v7964_v60 }
 0x36d   : > { %v2827_v47 = vmul.f32 %v8136_v20, %v2769_v42  ;;  %v2828_v25 = vmul.f32 %v8141_v32, %v2765_v54 }
 0x36e   : > { %v2842_v21 = vpack.c.bf16 %v2820_v24, %v2819_v31  ;;  %v5270_v24 = vor.u32 %v5784_v27, %v5269_v18 }
 0x36f   : > { %v2846_v6 = vpack.c.bf16 %v2828_v25, %v2827_v47  ;;  %v5792_v44 = vld [vmem:[#allocation2 + $0x2a4] sm:$0xf0]  ;;  %v5303_v1 = vld [vmem:[#allocation2 + $0x2a8] sm:$0xf0]  ;;  %v5274_v47 = vor.u32 %v5780_v41, %v5271_v9 }
 0x370   : > { %2858 = vst [vmem:[#allocation2 + $0x448] sm:$0xff] %v2842_v21  ;;  %2383 = vrot.lane.b32.xlu1 %v8977_v11, %s6165_s9  ;;  %v5301_v37 = vld [vmem:[#allocation2 + $0x288] sm:$0xf]  ;;  %v5788_v61 = vld [vmem:[#allocation2 + $0x28c] sm:$0xf]  ;;  %2205 = vrot.lane.b32.xlu2 %v8976_v40, %s6163_s27 }
 0x371   : > { %2862 = vst [vmem:[#allocation2 + $0x468] sm:$0xff] %v2846_v6  ;;  %2381 = vrot.lane.b32.xlu0 %v8975_v39, %s6165_s9  ;;  %v5302_v59 = vor.u32 %v5792_v44, %v5301_v37  ;;  %v5306_v56 = vor.u32 %v5788_v61, %v5303_v1  ;;  %v5237_v25 = vld [vmem:[#allocation2 + $0x208] sm:$0xf]  ;;  %v6167_v6 = vmov 0   ;;  %s4298_s9 = scalar_lea.hbm %s8772_s5, %s5851_s23 }
 0x372   : > { %v2712_v63 = vpop.permute.xlu1 %2711  ;;  %v8182_v30 = vpop.permute.xlu2 %2555  ;;  %v5776_v21 = vld [vmem:[#allocation2 + $0x224] sm:$0xf0]  ;;  %5946 = vset.pattern.permute.xlu1 %v6167_v6  ;;  %5948 = vset.pattern.permute.xlu0 %v6167_v6  ;;  %s4301_s14 = sshll.u32 %s4298_s9, 4  ;;  %s4302_s14 = int_to_ptr.hbm [resolvable:$true] %s4301_s14 }
 0x373   : > { %3936 = vmatpush.bf16.msrb.mxu3 %v5302_v59  ;;  %3993 = vmatpush.bf16.msra.mxu2 %v5306_v56  ;;  %v2710_v5 = vpop.permute.xlu0 %2709  ;;  %v5242_v56 = vor.u32 %v5772_v4, %v5239_v28  ;;  %v2767_v41 = vsel %vm2749_vm7, %v7907_v62, %v2712_v63  ;;  %s6088_s16 = sshra.s32 %s4302_s14, 4  ;;  %s6089_s16 = int_to_ptr.hbm [resolvable:$true] %s6088_s16 }
 0x374   : > { %v2762_v36 = vsel %vm2749_vm7, %v2710_v5, %v8094_v16  ;;  %v2766_v31 = vsel %vm2749_vm7, %v7915_v51, %v2710_v5  ;;  %v5238_v51 = vor.u32 %v5776_v21, %v5237_v25  ;;  %5947 = vset.pattern.permute.xlu2 %v6167_v6  ;;  %v3017_v6 = vld [vmem:[%s8771_s4] sm:$0xff]  ;;  %s6090_s17 = scalar_lea.hbm %s6089_s16, 256  ;;  %p6095_p11 = scmp.lt.s32.totalorder %s6089_s16, %s8772_s5 }
 0x375   : > { %v2803_v54 = vmul.f32 %v8136_v20, %v2766_v31  ;;  %v2804_v42 = vmul.f32 %v8141_v32, %v2762_v36  ;;  %p6091_p1 = scmp.ne.s32.totalorder %s6089_s16, %s6090_s17  ;;  %p6096_p9 = scmp.lt.s32.totalorder %s6094_s30, %s6090_s17 }
 0x377   : > { %v2834_v44 = vpack.c.bf16 %v2804_v42, %v2803_v54  ;;  %3937 = vmatpush.bf16.msrb.mxu3 %v5270_v24  ;;  %3994 = vmatpush.bf16.msra.mxu2 %v5274_v47  ;;  %v5525_v1 = vld [vmem:[#allocation2 + $0x448] sm:$0xf]  ;;  %v5844_v37 = vld [vmem:[#allocation2 + $0x44c] sm:$0xf]  ;;  %v2811_v24 = vmul.f32 %v8136_v20, %v2767_v41  ;;  %v2581_v20 = vsel %vm2569_vm4, %v7870_v48, %v8126_v38  ;;  %p6092_p4 = pnand %p6091_p1, %p6285_p3  ;;  %p6097_p2 = por %p6096_p9, %p6095_p11 }
 0x378   : > { %2201 = vrot.lane.b32.xlu1 %v8975_v39, %s6163_s27  ;;  %v5848_v61 = vld [vmem:[#allocation2 + $0x464] sm:$0xf0]  ;;  %v5527_v59 = vld [vmem:[#allocation2 + $0x468] sm:$0xf0]  ;;  %2203 = vrot.lane.b32.xlu2 %v8977_v11, %s6163_s27 }
 0x379   : > { %2850 = vst [vmem:[#allocation2 + $0x408] sm:$0xff] %v2834_v44  ;;  %2207 = vrot.lane.b32.xlu0 %v8974_v58, %s6163_s27  ;;  %v5526_v18 = vor.u32 %v5848_v61, %v5525_v1  ;;  %v5530_v27 = vor.u32 %v5844_v37, %v5527_v59  ;;  %3887 = vmatmul.bf16.gmra.mxu0 %v8099_v57  ;;  %v8214_v42 = vld [vmem:[#allocation9 + $0x38] sm:$0xff]  ;;  %v5213_v1 = vld [vmem:[#allocation2 + $0x1d0] sm:$0xf]  ;;  %v5765_v61 = vld [vmem:[#allocation2 + $0x1d4] sm:$0xf]  ;;  %p6093_p8 = pneg %p6092_p4 }
 0x37a   : > { %v2550_v9 = vpop.permute.xlu1 %2549  ;;  %v8201_v5 = vpop.permute.xlu2 %2377  ;;  %v2609_v47 = vperm.slane %v8214_v42, 4  ;;  %3920 = vmatmul.bf16.vlgmr.msrb.gmra.mxu2 %v8034_v26 }
 0x37b   : > { %3938 = vmatpush.bf16.msrb.mxu3 %v5238_v51  ;;  %3995 = vmatpush.bf16.msra.mxu2 %v5242_v56  ;;  %v8203_v36 = vpop.permute.xlu0 %2719  ;;  %p6098_p10 = pnand %p6097_p2, %p6093_p8 }
 0x37c   : > { %v2763_v31 = vsel %vm2749_vm7, %v2712_v63, %v8203_v36  ;;  %3956 = vmatpush.bf16.msra.mxu0 %v5526_v18  ;;  %5550 = vmatmul.msk.bf16.gmra.mxu1 %vm3791_vm8, %v8172_v2  ;;  %v2610_v63 = vperm.slane %v8214_v42, 5  ;;  %v2578_v18 = vsel %vm2569_vm4, %v7889_v14, %v8157_v34 }
 0x37d   : > { %v2812_v54 = vmul.f32 %v8141_v32, %v2763_v31  ;;  %v2580_v32 = vsel %vm2569_vm4, %v7940_v3, %v2550_v9 }
 0x37e   : > { %3939 = vmatmul.bf16.vlgmr.msrb.gmra.mxu3 %v7887_v52  ;;  %v2641_v3 = vmul.f32 %v2609_v47, %v2580_v32 }
 0x37f   : > { %4013 = vmatpush.bf16.msra.mxu3 %v5530_v27  ;;  %v2838_v62 = vpack.c.bf16 %v2812_v54, %v2811_v24  ;;  %v5215_v54 = vld [vmem:[#allocation2 + $0x1f0] sm:$0xf0] }
 0x380   : > { %2747 = vrot.lane.b32.xlu1 %v8974_v58, %s6166_s15  ;;  %2741 = vrot.lane.b32.xlu2 %v8975_v39, %s6166_s15  ;;  %v2649_v39 = vmul.f32 %v2609_v47, %v2581_v20  ;;  %v5493_v51 = vld [vmem:[#allocation2 + $0x408] sm:$0xf]  ;;  %v5218_v32 = vor.u32 %v5765_v61, %v5215_v54 }
 0x381   : > { %2854 = vst [vmem:[#allocation2 + $0x428] sm:$0xff] %v2838_v62  ;;  %2745 = vrot.lane.b32.xlu0 %v8976_v40, %s6166_s15 }
 0x382   : > { %v8231_v25 = vpop.permute.xlu1 %2559  ;;  %v8238_v58 = vpop.permute.xlu2 %2367 }
 0x383   : > { %v2577_v48 = vsel %vm2569_vm4, %v8126_v38, %v8231_v25  ;;  %v8240_v21 = vpop.permute.xlu0 %2557  ;;  %v5836_v38 = vld [vmem:[#allocation2 + $0x40c] sm:$0xf] }
 0x384   : > { %v2650_v4 = vmul.f32 %v2610_v63, %v2577_v48  ;;  %v2576_v40 = vsel %vm2569_vm4, %v2550_v9, %v8240_v21  ;;  %v5769_v9 = vld [vmem:[#allocation2 + $0x1ec] sm:$0xf0] }
 0x385   : > { %v2642_v28 = vmul.f32 %v2610_v63, %v2576_v40  ;;  %v5214_v24 = vor.u32 %v5769_v9, %v5213_v1  ;;  %v5761_v48 = vld [vmem:[#allocation2 + $0x1ac] sm:$0xf0]  ;;  %v3018_v1 = vld [vmem:[%s8771_s4 + $0x8] sm:$0xff] }
 0x386   : > { %v2667_v44 = vpack.c.bf16 %v2650_v4, %v2649_v39 }
 0x387   : > { %v2663_v37 = vpack.c.bf16 %v2642_v28, %v2641_v3  ;;  %v5183_v3 = vld [vmem:[#allocation2 + $0x1b0] sm:$0xf0] }
 0x388   : > { %2683 = vst [vmem:[#allocation2 + $0x3f0] sm:$0xff] %v2667_v44  ;;  %v5495_v59 = vld [vmem:[#allocation2 + $0x428] sm:$0xf0]  ;;  %v5840_v56 = vld [vmem:[#allocation2 + $0x424] sm:$0xf0]  ;;  %3023 = vperm.xlu1 %5946, %v3017_v6   ;;  %v3020_v44 = vld [vmem:[%s8771_s4 + $0x18] sm:$0xff]  ;;  %3028 = vperm.xlu2 %5947, %v3018_v1  }
 0x389   : > { %2679 = vst [vmem:[#allocation2 + $0x3d0] sm:$0xff] %v2663_v37  ;;  %2743 = vrot.lane.b32.xlu0 %v8977_v11, %s6166_s15  ;;  %v5498_v27 = vor.u32 %v5836_v38, %v5495_v59  ;;  %v5494_v41 = vor.u32 %v5840_v56, %v5493_v51  ;;  %v2625_v11 = vmul.f32 %v2609_v47, %v2578_v18  ;;  %v5181_v6 = vld [vmem:[#allocation2 + $0x190] sm:$0xf]  ;;  %v5757_v51 = vld [vmem:[#allocation2 + $0x194] sm:$0xf]  ;;  %s4299_s15 = sshll.u32 %s8606_s6, 4  ;;  %s4300_s15 = int_to_ptr.vmem [resolvable:$true] %s4299_s15 }
 0x38a   : > { %v8254_v31 = vpop.permute.xlu1 %2553  ;;  %v8260_v20 = vpop.permute.xlu2 %2189  ;;  %v5182_v38 = vor.u32 %v5761_v48, %v5181_v6  ;;  %v5753_v59 = vld [vmem:[#allocation2 + $0x16c] sm:$0xf0]  ;;  %v5151_v18 = vld [vmem:[#allocation2 + $0x170] sm:$0xf0]  ;;  %3925 = vmatmul.bf16.gmra.mxu2 %v8089_v17 }
 0x38b   : > { %v2574_v62 = vsel %vm2569_vm4, %v8157_v34, %v8254_v31  ;;  %4014 = vmatpush.bf16.msra.mxu3 %v5498_v27  ;;  %v2548_v14 = vpop.permute.xlu0 %2547  ;;  %3957 = vmatpush.bf16.msra.mxu0 %v5494_v41  ;;  %v8281_v27 = vld [vmem:[#allocation9 + $0x30] sm:$0xff] }
 0x38c   : > { %v2626_v39 = vmul.f32 %v2610_v63, %v2574_v62  ;;  %v2575_v4 = vsel %vm2569_vm4, %v2548_v14, %v8182_v30  ;;  %v2579_v40 = vsel %vm2569_vm4, %v7989_v13, %v2548_v14  ;;  %3977 = vmatmul.bf16.vlgmr.msra.gmra.mxu1 %v8034_v26  ;;  %v3019_v13 = vld [vmem:[%s8771_s4 + $0x10] sm:$0xff]  ;;  %v8284_v41 = vperm.slane %v8281_v27, 5 }
 0x38d   : > { %v2633_v34 = vmul.f32 %v2609_v47, %v2579_v40  ;;  %v2634_v28 = vmul.f32 %v2610_v63, %v2575_v4  ;;  %v5186_v63 = vor.u32 %v5757_v51, %v5183_v3  ;;  %v5749_v14 = vld [vmem:[#allocation2 + $0x154] sm:$0xf]  ;;  %v5745_v4 = vld [vmem:[#allocation2 + $0x12c] sm:$0xf0] }
 0x38e   : > { %v2655_v37 = vpack.c.bf16 %v2626_v39, %v2625_v11  ;;  %5551 = vmatmul.msk.bf16.vlgmr.msra.gmra.mxu0 %vm3791_vm8, %v7964_v60  ;;  %3944 = vmatmul.bf16.gmra.mxu3 %v8099_v57  ;;  %v5154_v39 = vor.u32 %v5749_v14, %v5151_v18 }
 0x38f   : > { %4026 = vmatpush.bf16.msrb.mxu0 %v5214_v24  ;;  %4083 = vmatpush.bf16.msrb.mxu3 %v5218_v32  ;;  %v2659_v47 = vpack.c.bf16 %v2634_v28, %v2633_v34  ;;  %v5833_v61 = vld [vmem:[#allocation2 + $0x3ec] sm:$0xf0]  ;;  %v8288_v32 = vperm.slane %v8281_v27, 4  ;;  %v5119_v34 = vld [vmem:[#allocation2 + $0x130] sm:$0xf0] }
 0x390   : > { %2671 = vst [vmem:[#allocation2 + $0x390] sm:$0xff] %v2655_v37  ;;  %v5469_v56 = vld [vmem:[#allocation2 + $0x3d0] sm:$0xf]  ;;  %3038 = vperm.xlu1 %5946, %v3020_v44   ;;  %v5741_v37 = vld [vmem:[#allocation2 + $0x114] sm:$0xf] }
 0x391   : > { %2675 = vst [vmem:[#allocation2 + $0x3b0] sm:$0xff] %v2659_v47  ;;  %v5470_v9 = vor.u32 %v5833_v61, %v5469_v56  ;;  %v5149_v24 = vld [vmem:[#allocation2 + $0x150] sm:$0xf]  ;;  %3033 = vperm.xlu0 %5948, %v3019_v13   ;;  %v5122_v51 = vor.u32 %v5741_v37, %v5119_v34  ;;  %v5087_v61 = vld [vmem:[#allocation2 + $0xf0] sm:$0xf0] }
 0x392   : > { %v2372_v54 = vpop.permute.xlu1 %2371  ;;  %v5150_v62 = vor.u32 %v5753_v59, %v5149_v24  ;;  %v8290_v48 = vpop.permute.xlu2 %2199  ;;  %v5117_v44 = vld [vmem:[#allocation2 + $0x110] sm:$0xf]  ;;  %v5733_v24 = vld [vmem:[#allocation2 + $0xd4] sm:$0xf] }
 0x393   : > { %4027 = vmatpush.bf16.msrb.mxu0 %v5182_v38  ;;  %4084 = vmatpush.bf16.msrb.mxu3 %v5186_v63  ;;  %v2370_v11 = vpop.permute.xlu0 %2369  ;;  %v5118_v1 = vor.u32 %v5745_v4, %v5117_v44  ;;  %v5737_v47 = vld [vmem:[#allocation2 + $0xec] sm:$0xf0]  ;;  %v2401_v56 = vsel %vm2389_vm5, %v8015_v33, %v2372_v54 }
 0x394   : > { %4045 = vmatpush.bf16.msrb.mxu1 %v5470_v9  ;;  %v2396_v40 = vsel %vm2389_vm5, %v2370_v11, %v8201_v5  ;;  %v2400_v3 = vsel %vm2389_vm5, %v8023_v49, %v2370_v11  ;;  %v5085_v59 = vld [vmem:[#allocation2 + $0xd0] sm:$0xf]  ;;  %v5090_v11 = vor.u32 %v5733_v24, %v5087_v61  ;;  %v5717_v61 = vld [vmem:[#allocation2 + $0x54] sm:$0xf] }
 0x395   : > { %v2461_v28 = vmul.f32 %v8288_v32, %v2400_v3  ;;  %v2462_v6 = vmul.f32 %v8284_v41, %v2396_v40  ;;  %v5086_v9 = vor.u32 %v5737_v47, %v5085_v59  ;;  %v5055_v40 = vld [vmem:[#allocation2 + $0xb0] sm:$0xf0]  ;;  %v2469_v3 = vmul.f32 %v8288_v32, %v2401_v56  ;;  %v5053_v34 = vld [vmem:[#allocation2 + $0x90] sm:$0xf] }
 0x396   : > { %v5721_v37 = vld [vmem:[#allocation2 + $0x6c] sm:$0xf0] }
 0x397   : > { %4028 = vmatpush.bf16.msrb.mxu0 %v5150_v62  ;;  %4085 = vmatpush.bf16.msrb.mxu3 %v5154_v39  ;;  %v2483_v38 = vpack.c.bf16 %v2462_v6, %v2461_v28  ;;  %v5437_v13 = vld [vmem:[#allocation2 + $0x390] sm:$0xf]  ;;  %v5725_v6 = vld [vmem:[#allocation2 + $0x94] sm:$0xf] }
 0x398   : > { %v5825_v63 = vld [vmem:[#allocation2 + $0x3ac] sm:$0xf0] }
 0x399   : > { %2499 = vst [vmem:[#allocation2 + $0x350] sm:$0xff] %v2483_v38  ;;  %v5438_v49 = vor.u32 %v5825_v63, %v5437_v13  ;;  %v5729_v39 = vld [vmem:[#allocation2 + $0xac] sm:$0xf0]  ;;  %v2399_v38 = vsel %vm2389_vm5, %v7966_v7, %v8238_v58 }
 0x39a   : > { %v2366_v18 = vpop.permute.xlu1 %2365  ;;  %v8303_v62 = vpop.permute.xlu2 %2193  ;;  %v5054_v28 = vor.u32 %v5729_v39, %v5053_v34  ;;  %3996 = vmatmul.bf16.vlgmr.msra.gmra.mxu2 %v7887_v52  ;;  %v2453_v24 = vmul.f32 %v8288_v32, %v2399_v38  ;;  %v4991_v39 = vld [vmem:[#allocation2 + $0x30] sm:$0xf0] }
 0x39b   : > { %4029 = vmatpush.bf16.msrb.mxu0 %v5118_v1  ;;  %4086 = vmatpush.bf16.msrb.mxu3 %v5122_v51  ;;  %v8305_v14 = vpop.permute.xlu0 %2379  ;;  %v5058_v1 = vor.u32 %v5725_v6, %v5055_v40  ;;  %v5021_v51 = vld [vmem:[#allocation2 + $0x50] sm:$0xf]  ;;  %v2398_v13 = vsel %vm2389_vm5, %v8044_v35, %v2366_v18  ;;  %v5471_v40 = vld [vmem:[#allocation2 + $0x3f0] sm:$0xf0] }
 0x39c   : > { %4046 = vmatpush.bf16.msrb.mxu1 %v5438_v49  ;;  %v2397_v4 = vsel %vm2389_vm5, %v2372_v54, %v8305_v14  ;;  %v5023_v54 = vld [vmem:[#allocation2 + $0x70] sm:$0xf0]  ;;  %v5022_v63 = vor.u32 %v5721_v37, %v5021_v51 }
 0x39d   : > { %v2470_v33 = vmul.f32 %v8284_v41, %v2397_v4  ;;  %3982 = vmatmul.bf16.gmra.mxu1 %v8089_v17  ;;  %v5026_v56 = vor.u32 %v5717_v61, %v5023_v54  ;;  %v5829_v4 = vld [vmem:[#allocation2 + $0x3d4] sm:$0xf] }
 0x39e   : > { %5552 = vmatmul.msk.bf16.gmra.mxu0 %vm3791_vm8, %v8172_v2  ;;  %5553 = vmatmul.msk.bf16.vlgmr.msra.gmra.mxu3 %vm3791_vm8, %v7964_v60  ;;  %v5709_v6 = vld [vmem:[#allocation2 + $0x14] sm:$0xf]  ;;  %v5474_v54 = vor.u32 %v5829_v4, %v5471_v40 }
 0x39f   : > { %4030 = vmatpush.bf16.msrb.mxu0 %v5086_v9  ;;  %4087 = vmatpush.bf16.msrb.mxu3 %v5090_v11  ;;  %v2487_v44 = vpack.c.bf16 %v2470_v33, %v2469_v3  ;;  %v5713_v9 = vld [vmem:[#allocation2 + $0x2c] sm:$0xf0]  ;;  %v5821_v38 = vld [vmem:[#allocation2 + $0x394] sm:$0xf] }
 0x3a0   : > { %v4989_v33 = vld [vmem:[#allocation2 + $0x10] sm:$0xf]  ;;  %v5439_v51 = vld [vmem:[#allocation2 + $0x3b0] sm:$0xf0] }
 0x3a1   : > { %2503 = vst [vmem:[#allocation2 + $0x370] sm:$0xff] %v2487_v44  ;;  %v8342_v44 = vld [vmem:[#allocation9 + $0x28] sm:$0xff] }
 0x3a2   : > { %v8324_v47 = vpop.permute.xlu1 %2375  ;;  %v8331_v59 = vpop.permute.xlu2 %2731 }
 0x3a3   : > { %4031 = vmatpush.bf16.msrb.mxu0 %v5054_v28  ;;  %4088 = vmatpush.bf16.msrb.mxu3 %v5058_v1  ;;  %v2395_v49 = vsel %vm2389_vm5, %v8238_v58, %v8324_v47  ;;  %v8333_v7 = vpop.permute.xlu0 %2373  ;;  %v2445_v58 = vmul.f32 %v8288_v32, %v2398_v13  ;;  %v4990_v28 = vor.u32 %v5713_v9, %v4989_v33  ;;  %v8345_v1 = vperm.slane %v8342_v44, 4  ;;  %v5813_v33 = vld [vmem:[#allocation2 + $0x354] sm:$0xf] }
 0x3a4   : > { %v2454_v35 = vmul.f32 %v8284_v41, %v2395_v49  ;;  %v2394_v11 = vsel %vm2389_vm5, %v2366_v18, %v8333_v7  ;;  %v4994_v18 = vor.u32 %v5709_v6, %v4991_v39  ;;  %v8348_v32 = vperm.slane %v8342_v44, 5 }
 0x3a5   : > { %v2446_v3 = vmul.f32 %v8284_v41, %v2394_v11  ;;  %v5405_v41 = vld [vmem:[#allocation2 + $0x350] sm:$0xf] }
 0x3a6   : > { %v2479_v34 = vpack.c.bf16 %v2454_v35, %v2453_v24  ;;  %v5442_v35 = vor.u32 %v5821_v38, %v5439_v51 }
 0x3a7   : > { %4032 = vmatpush.bf16.msrb.mxu0 %v5022_v63  ;;  %4089 = vmatpush.bf16.msrb.mxu3 %v5026_v56  ;;  %v2475_v37 = vpack.c.bf16 %v2446_v3, %v2445_v58  ;;  %v2220_v63 = vsel %vm2209_vm6, %v7987_v43, %v8260_v20 }
 0x3a8   : > { %2495 = vst [vmem:[#allocation2 + $0x330] sm:$0xff] %v2479_v34  ;;  %v5817_v13 = vld [vmem:[#allocation2 + $0x36c] sm:$0xf0]  ;;  %v2281_v11 = vmul.f32 %v8345_v1, %v2220_v63  ;;  %v5407_v40 = vld [vmem:[#allocation2 + $0x370] sm:$0xf0] }
 0x3a9   : > { %2491 = vst [vmem:[#allocation2 + $0x310] sm:$0xff] %v2475_v37  ;;  %v5406_v61 = vor.u32 %v5817_v13, %v5405_v41 }
 0x3aa   : > { %v8354_v49 = vpop.permute.xlu1 %2197  ;;  %v8360_v9 = vpop.permute.xlu2 %2725  ;;  %4001 = vmatmul.bf16.gmra.mxu2 %v8099_v57 }
 0x3ab   : > { %4033 = vmatpush.bf16.msrb.mxu0 %v4990_v28  ;;  %4090 = vmatpush.bf16.msrb.mxu3 %v4994_v18  ;;  %v2216_v56 = vsel %vm2209_vm6, %v8260_v20, %v8354_v49  ;;  %v2192_v24 = vpop.permute.xlu0 %2191  ;;  %v5410_v28 = vor.u32 %v5813_v33, %v5407_v40  ;;  %v8387_v40 = vperm.slane %v8214_v42, 6 }
 0x3ac   : > { %4047 = vmatpush.bf16.msrb.mxu1 %v5406_v61  ;;  %v2282_v43 = vmul.f32 %v8348_v32, %v2216_v56  ;;  %v2217_v39 = vsel %vm2209_vm6, %v2192_v24, %v8290_v48  ;;  %v2221_v4 = vsel %vm2209_vm6, %v8096_v46, %v2192_v24 }
 0x3ad   : > { %v2289_v20 = vmul.f32 %v8345_v1, %v2221_v4  ;;  %v2290_v58 = vmul.f32 %v8348_v32, %v2217_v39 }
 0x3ae   : > { %v2303_v3 = vpack.c.bf16 %v2282_v43, %v2281_v11  ;;  %4034 = vmatmul.bf16.vlgmr.msrb.gmra.mxu0 %v8034_v26  ;;  %5554 = vmatmul.msk.bf16.gmra.mxu3 %vm3791_vm8, %v8172_v2 }
 0x3af   : > { %4102 = vmatpush.bf16.msra.mxu0 %v5474_v54  ;;  %v2307_v34 = vpack.c.bf16 %v2290_v58, %v2289_v20  ;;  %v5809_v6 = vld [vmem:[#allocation2 + $0x32c] sm:$0xf0]  ;;  %v5375_v37 = vld [vmem:[#allocation2 + $0x330] sm:$0xf0]  ;;  %v8390_v20 = vperm.slane %v8214_v42, 7 }
 0x3b0   : > { %2319 = vst [vmem:[#allocation2 + $0x2d0] sm:$0xff] %v2303_v3  ;;  %v5373_v18 = vld [vmem:[#allocation2 + $0x310] sm:$0xf]  ;;  %v5805_v46 = vld [vmem:[#allocation2 + $0x314] sm:$0xf] }
 0x3b1   : > { %2323 = vst [vmem:[#allocation2 + $0x2f0] sm:$0xff] %v2307_v34  ;;  %v5374_v54 = vor.u32 %v5809_v6, %v5373_v18  ;;  %v5378_v13 = vor.u32 %v5805_v46, %v5375_v37 }
 0x3b2   : > { %v2188_v38 = vpop.permute.xlu1 %2187  ;;  %v8376_v51 = vpop.permute.xlu2 %2735 }
 0x3b3   : > { %4103 = vmatpush.bf16.msra.mxu0 %v5442_v35  ;;  %v2186_v41 = vpop.permute.xlu0 %2185  ;;  %4048 = vmatpush.bf16.msrb.mxu1 %v5374_v54 }
 0x3b4   : > { %v2214_v63 = vsel %vm2209_vm6, %v2186_v41, %v8303_v62  ;;  %v2218_v61 = vsel %vm2209_vm6, %v8128_v22, %v2186_v41  ;;  %v2219_v22 = vsel %vm2209_vm6, %v8120_v15, %v2188_v38  ;;  %v8411_v41 = vld [vmem:[#allocation9 + $0x40] sm:$0xff] }
 0x3b5   : > { %v2265_v56 = vmul.f32 %v8345_v1, %v2218_v61  ;;  %v2266_v24 = vmul.f32 %v8348_v32, %v2214_v63  ;;  %v2273_v15 = vmul.f32 %v8345_v1, %v2219_v22  ;;  %v2761_v1 = vsel %vm2749_vm7, %v8074_v8, %v8331_v59 }
 0x3b6   : > { %v8424_v63 = vperm.slane %v8281_v27, 7 }
 0x3b7   : > { %4104 = vmatpush.bf16.msra.mxu0 %v5410_v28  ;;  %v2295_v35 = vpack.c.bf16 %v2266_v24, %v2265_v56  ;;  %v5341_v11 = vld [vmem:[#allocation2 + $0x2d0] sm:$0xf]  ;;  %v5797_v43 = vld [vmem:[#allocation2 + $0x2d4] sm:$0xf] }
 0x3b8   : > { %v5801_v39 = vld [vmem:[#allocation2 + $0x2ec] sm:$0xf0]  ;;  %v5343_v4 = vld [vmem:[#allocation2 + $0x2f0] sm:$0xf0] }
 0x3b9   : > { %2311 = vst [vmem:[#allocation2 + $0x290] sm:$0xff] %v2295_v35  ;;  %v5342_v58 = vor.u32 %v5801_v39, %v5341_v11  ;;  %v5346_v3 = vor.u32 %v5797_v43, %v5343_v4 }
 0x3ba   : > { %v2730_v33 = vpop.permute.xlu1 %2729  ;;  %v2562_v34 = vpop.permute.xlu2 %2561 }
 0x3bb   : > { %4105 = vmatpush.bf16.msra.mxu0 %v5378_v13  ;;  %v8395_v28 = vpop.permute.xlu0 %2195  ;;  %4049 = vmatpush.bf16.msrb.mxu1 %v5342_v58  ;;  %v2570_v6 = vsel %vm2569_vm4, %v8254_v31, %v2562_v34  ;;  %v2598_v42 = vsel %vm2569_vm4, %v2562_v34, %v7655_v29  ;;  %v2789_v31 = vperm.slane %v8411_v41, 4  ;;  %v2760_v61 = vsel %vm2749_vm7, %v8151_v12, %v2730_v33 }
 0x3bc   : > { %v2215_v37 = vsel %vm2209_vm6, %v2188_v38, %v8395_v28  ;;  %v2627_v18 = vmul.f32 %v8387_v40, %v2570_v6  ;;  %v2628_v46 = vmul.f32 %v8390_v20, %v2598_v42  ;;  %v2790_v38 = vperm.slane %v8411_v41, 5 }
 0x3bd   : > { %v2274_v54 = vmul.f32 %v8348_v32, %v2215_v37  ;;  %v8421_v32 = vperm.slane %v8281_v27, 6  ;;  %v2829_v24 = vmul.f32 %v2789_v31, %v2761_v1  ;;  %v2821_v4 = vmul.f32 %v2789_v31, %v2760_v61 }
 0x3be   : > { %4039 = vmatmul.bf16.gmra.mxu0 %v8089_v17  ;;  %v2656_v13 = vpack.c.bf16 %v2628_v46, %v2627_v18  ;;  %4091 = vmatmul.bf16.vlgmr.msrb.gmra.mxu3 %v8034_v26  ;;  %v8456_v37 = vperm.slane %v8342_v44, 7 }
 0x3bf   : > { %4106 = vmatpush.bf16.msra.mxu0 %v5346_v3  ;;  %v2299_v29 = vpack.c.bf16 %v2274_v54, %v2273_v15 }
 0x3c0   : > { %2672 = vst [vmem:[#allocation2 + $0x398] sm:$0xff] %v2656_v13  ;;  %v5309_v42 = vld [vmem:[#allocation2 + $0x290] sm:$0xf] }
 0x3c1   : > { %2315 = vst [vmem:[#allocation2 + $0x2b0] sm:$0xff] %v2299_v29 }
 0x3c2   : > { %v8429_v56 = vpop.permute.xlu1 %2739  ;;  %v2388_v35 = vpop.permute.xlu2 %2387 }
 0x3c3   : > { %v2757_v8 = vsel %vm2749_vm7, %v8331_v59, %v8429_v56  ;;  %v8435_v11 = vpop.permute.xlu0 %2737  ;;  %v2393_v27 = vsel %vm2389_vm5, %v8305_v14, %v2388_v35  ;;  %v2421_v12 = vsel %vm2389_vm5, %v2388_v35, %v7636_v55  ;;  %v2758_v14 = vsel %vm2749_vm7, %v8094_v16, %v8360_v9 }
 0x3c4   : > { %v2830_v43 = vmul.f32 %v2790_v38, %v2757_v8  ;;  %v2756_v39 = vsel %vm2749_vm7, %v2730_v33, %v8435_v11  ;;  %v2471_v58 = vmul.f32 %v8421_v32, %v2393_v27  ;;  %v2472_v59 = vmul.f32 %v8424_v63, %v2421_v12  ;;  %v5789_v33 = vld [vmem:[#allocation2 + $0x294] sm:$0xf]  ;;  %v5277_v8 = vld [vmem:[#allocation2 + $0x250] sm:$0xf] }
 0x3c5   : > { %v2822_v3 = vmul.f32 %v2790_v38, %v2756_v39  ;;  %v8453_v55 = vperm.slane %v8342_v44, 6  ;;  %v2805_v16 = vmul.f32 %v2789_v31, %v2758_v14  ;;  %v5785_v44 = vld [vmem:[#allocation2 + $0x26c] sm:$0xf0]  ;;  %v5781_v39 = vld [vmem:[#allocation2 + $0x254] sm:$0xf] }
 0x3c6   : > { %v2847_v22 = vpack.c.bf16 %v2830_v43, %v2829_v24  ;;  %v2488_v34 = vpack.c.bf16 %v2472_v59, %v2471_v58  ;;  %v8460_v29 = vpop.f32.mrf.mxu0 }
 0x3c7   : > { %v2843_v6 = vpack.c.bf16 %v2822_v3, %v2821_v4  ;;  %v8475_v4 = vpop.f32.mrf.mxu1 }
 0x3c8   : > { %2863 = vst [vmem:[#allocation2 + $0x470] sm:$0xff] %v2847_v22  ;;  %v5793_v15 = vld [vmem:[#allocation2 + $0x2ac] sm:$0xf0]  ;;  %v5311_v18 = vld [vmem:[#allocation2 + $0x2b0] sm:$0xf0] }
 0x3c9   : > { %2504 = vst [vmem:[#allocation2 + $0x378] sm:$0xff] %v2488_v34  ;;  %v5310_v54 = vor.u32 %v5793_v15, %v5309_v42  ;;  %v5314_v13 = vor.u32 %v5789_v33, %v5311_v18  ;;  %v5278_v34 = vor.u32 %v5785_v44, %v5277_v8  ;;  %v5773_v15 = vld [vmem:[#allocation2 + $0x214] sm:$0xf] }
 0x3ca   : > { %2859 = vst [vmem:[#allocation2 + $0x450] sm:$0xff] %v2843_v6  ;;  %v8458_v46 = vpop.permute.xlu1 %2733  ;;  %v2206_v61 = vpop.permute.xlu2 %2205  ;;  %v5245_v6 = vld [vmem:[#allocation2 + $0x210] sm:$0xf] }
 0x3cb   : > { %v2754_v1 = vsel %vm2749_vm7, %v8360_v9, %v8458_v46  ;;  %v2728_v24 = vpop.permute.xlu0 %2727  ;;  %v2212_v43 = vsel %vm2209_vm6, %v8354_v49, %v2206_v61  ;;  %v2240_v27 = vsel %vm2209_vm6, %v2206_v61, %v7762_v10  ;;  %4050 = vmatpush.bf16.msrb.mxu1 %v5310_v54  ;;  %v5279_v9 = vld [vmem:[#allocation2 + $0x270] sm:$0xf0]  ;;  %4107 = vmatpush.bf16.msra.mxu0 %v5314_v13 }
 0x3cc   : > { %v2806_v35 = vmul.f32 %v2790_v38, %v2754_v1  ;;  %v2755_v12 = vsel %vm2749_vm7, %v2728_v24, %v8376_v51  ;;  %v2283_v58 = vmul.f32 %v8453_v55, %v2212_v43  ;;  %v2284_v59 = vmul.f32 %v8456_v37, %v2240_v27  ;;  %v5777_v1 = vld [vmem:[#allocation2 + $0x22c] sm:$0xf0]  ;;  %v5247_v61 = vld [vmem:[#allocation2 + $0x230] sm:$0xf0] }
 0x3cd   : > { %v2759_v49 = vsel %vm2749_vm7, %v8203_v36, %v2728_v24  ;;  %v2814_v3 = vmul.f32 %v2790_v38, %v2755_v12  ;;  %v5282_v42 = vor.u32 %v5781_v39, %v5279_v9  ;;  %v5246_v27 = vor.u32 %v5777_v1, %v5245_v6 }
 0x3ce   : > { %v2835_v10 = vpack.c.bf16 %v2806_v35, %v2805_v16  ;;  %v2813_v22 = vmul.f32 %v2789_v31, %v2759_v49  ;;  %v2304_v14 = vpack.c.bf16 %v2284_v59, %v2283_v58  ;;  %4096 = vmatmul.bf16.gmra.mxu3 %v8089_v17  ;;  %v8483_v24 = vpop.f32.mrf.mxu0  ;;  %v5250_v12 = vor.u32 %v5773_v15, %v5247_v61 }
 0x3cf   : > { %v5849_v33 = vld [vmem:[#allocation2 + $0x46c] sm:$0xf0]  ;;  %v5535_v18 = vld [vmem:[#allocation2 + $0x470] sm:$0xf0]  ;;  %4051 = vmatpush.bf16.msrb.mxu1 %v5278_v34  ;;  %4108 = vmatpush.bf16.msra.mxu0 %v5282_v42  ;;  %v8499_v59 = vpop.f32.mrf.mxu1  ;;  %v5770_v34 = vld [vmem:[#allocation2 + $0x1f4] sm:$0xf0] }
 0x3d0   : > { %2851 = vst [vmem:[#allocation2 + $0x410] sm:$0xff] %v2835_v10  ;;  %v2839_v54 = vpack.c.bf16 %v2814_v3, %v2813_v22 }
 0x3d1   : > { %2320 = vst [vmem:[#allocation2 + $0x2d8] sm:$0xff] %v2304_v14  ;;  %v5533_v36 = vld [vmem:[#allocation2 + $0x450] sm:$0xf]  ;;  %v5845_v38 = vld [vmem:[#allocation2 + $0x454] sm:$0xf] }
 0x3d2   : > { %2855 = vst [vmem:[#allocation2 + $0x430] sm:$0xff] %v2839_v54  ;;  %v2568_v31 = vpop.permute.xlu1 %2567  ;;  %v5534_v13 = vor.u32 %v5849_v33, %v5533_v36  ;;  %v5538_v16 = vor.u32 %v5845_v38, %v5535_v18  ;;  %v2204_v35 = vpop.permute.xlu2 %2203  ;;  %v5223_v33 = vld [vmem:[#allocation2 + $0x1f8] sm:$0xf0]  ;;  %v8516_v54 = vperm.slane %v8411_v41, 7 }
 0x3d3   : > { %v2573_v8 = vsel %vm2569_vm4, %v8231_v25, %v2568_v31  ;;  %v2601_v44 = vsel %vm2569_vm4, %v2568_v31, %v7544_v53  ;;  %v2566_v43 = vpop.permute.xlu0 %2565  ;;  %v2211_v58 = vsel %vm2209_vm6, %v8395_v28, %v2204_v35  ;;  %v2239_v25 = vsel %vm2209_vm6, %v2204_v35, %v7619_v19  ;;  %4052 = vmatpush.bf16.msrb.mxu1 %v5246_v27  ;;  %v5766_v18 = vld [vmem:[#allocation2 + $0x1dc] sm:$0xf] }
 0x3d4   : > { %v2651_v39 = vmul.f32 %v8387_v40, %v2573_v8  ;;  %v2652_v9 = vmul.f32 %v8390_v20, %v2601_v44  ;;  %4070 = vmatpush.bf16.msrb.mxu2 %v5534_v13  ;;  %v2275_v53 = vmul.f32 %v8453_v55, %v2211_v58  ;;  %v2276_v49 = vmul.f32 %v8456_v37, %v2239_v25 }
 0x3d5   : > { %v2572_v3 = vsel %vm2569_vm4, %v8240_v21, %v2566_v43  ;;  %v2600_v10 = vsel %vm2569_vm4, %v2566_v43, %v7615_v23  ;;  %4109 = vmatpush.bf16.msra.mxu0 %v5250_v12  ;;  %v8513_v21 = vperm.slane %v8411_v41, 6  ;;  %v5221_v23 = vld [vmem:[#allocation2 + $0x1d8] sm:$0xf]  ;;  %v5226_v43 = vor.u32 %v5766_v18, %v5223_v33 }
 0x3d6   : > { %v2668_v28 = vpack.c.bf16 %v2652_v9, %v2651_v39  ;;  %v2643_v22 = vmul.f32 %v8387_v40, %v2572_v3  ;;  %v2644_v19 = vmul.f32 %v8390_v20, %v2600_v10  ;;  %v2300_v6 = vpack.c.bf16 %v2276_v49, %v2275_v53  ;;  %4053 = vmatmul.bf16.vlgmr.msrb.gmra.mxu1 %v7887_v52  ;;  %v8519_v13 = vpop.f32.mrf.mxu0  ;;  %v8978_v53 = vld [vmem:[#allocation41_spill] sm:$0xff]  ;;  %v5758_v3 = vld [vmem:[#allocation2 + $0x19c] sm:$0xf]  ;;  %v5754_v33 = vld [vmem:[#allocation2 + $0x174] sm:$0xf0] }
 0x3d7   : > { %4127 = vmatpush.bf16.msra.mxu1 %v5538_v16  ;;  %v5501_v14 = vld [vmem:[#allocation2 + $0x410] sm:$0xf]  ;;  %v5837_v42 = vld [vmem:[#allocation2 + $0x414] sm:$0xf]  ;;  %v5222_v35 = vor.u32 %v5770_v34, %v5221_v23  ;;  %v5191_v34 = vld [vmem:[#allocation2 + $0x1b8] sm:$0xf0] }
 0x3d8   : > { %2684 = vst [vmem:[#allocation2 + $0x3f8] sm:$0xff] %v2668_v28  ;;  %v2664_v15 = vpack.c.bf16 %v2644_v19, %v2643_v22  ;;  %4110 = vmatmul.bf16.vlgmr.msra.gmra.mxu0 %v7887_v52  ;;  %v8535_v9 = vpop.f32.mrf.mxu1  ;;  %v5762_v19 = vld [vmem:[#allocation2 + $0x1b4] sm:$0xf0] }
 0x3d9   : > { %2316 = vst [vmem:[#allocation2 + $0x2b8] sm:$0xff] %v2300_v6  ;;  %v5841_v1 = vld [vmem:[#allocation2 + $0x42c] sm:$0xf0]  ;;  %v5503_v61 = vld [vmem:[#allocation2 + $0x430] sm:$0xf0] }
 0x3da   : > { %2680 = vst [vmem:[#allocation2 + $0x3d8] sm:$0xff] %v2664_v15  ;;  %v2386_v36 = vpop.permute.xlu1 %2385  ;;  %v5502_v38 = vor.u32 %v5841_v1, %v5501_v14  ;;  %v5506_v31 = vor.u32 %v5837_v42, %v5503_v61  ;;  %v2742_v41 = vpop.permute.xlu2 %2741  ;;  %v5194_v42 = vor.u32 %v5758_v3, %v5191_v34  ;;  %v5159_v15 = vld [vmem:[#allocation2 + $0x178] sm:$0xf0]  ;;  %v5157_v18 = vld [vmem:[#allocation2 + $0x158] sm:$0xf] }
 0x3db   : > { %v2392_v16 = vsel %vm2389_vm5, %v8201_v5, %v2386_v36  ;;  %v2420_v8 = vsel %vm2389_vm5, %v2386_v36, %v7691_v50  ;;  %v2564_v44 = vpop.permute.xlu0 %2563  ;;  %v2750_v39 = vsel %vm2749_vm7, %v8458_v46, %v2742_v41  ;;  %v2778_v5 = vsel %vm2749_vm7, %v2742_v41, %v7799_v0  ;;  %v5189_v46 = vld [vmem:[#allocation2 + $0x198] sm:$0xf]  ;;  %v5750_v1 = vld [vmem:[#allocation2 + $0x15c] sm:$0xf] }
 0x3dc   : > { %v2463_v27 = vmul.f32 %v8421_v32, %v2392_v16  ;;  %v2464_v12 = vmul.f32 %v8424_v63, %v2420_v8  ;;  %4071 = vmatpush.bf16.msrb.mxu2 %v5502_v38  ;;  %v2807_v50 = vmul.f32 %v8513_v21, %v2750_v39  ;;  %v2808_v58 = vmul.f32 %v8516_v54, %v2778_v5  ;;  %v8979_v38 = vld [vmem:[#allocation17_spill] sm:$0xff]  ;;  %v5738_v3 = vld [vmem:[#allocation2 + $0xf4] sm:$0xf0] }
 0x3dd   : > { %v2571_v25 = vsel %vm2569_vm4, %v8182_v30, %v2564_v44  ;;  %v2599_v49 = vsel %vm2569_vm4, %v2564_v44, %v8978_v53  ;;  %4128 = vmatpush.bf16.msra.mxu1 %v5506_v31  ;;  %v5190_v14 = vor.u32 %v5762_v19, %v5189_v46  ;;  %v5158_v8 = vor.u32 %v5754_v33, %v5157_v18  ;;  %v8569_v53 = vpop.f32.mrf.mxu2  ;;  %v5125_v46 = vld [vmem:[#allocation2 + $0x118] sm:$0xf] }
 0x3de   : > { %v2484_v10 = vpack.c.bf16 %v2464_v12, %v2463_v27  ;;  %v2635_v0 = vmul.f32 %v8387_v40, %v2571_v25  ;;  %v2636_v28 = vmul.f32 %v8390_v20, %v2599_v49  ;;  %v2836_v22 = vpack.c.bf16 %v2808_v58, %v2807_v50  ;;  %v8549_v61 = vpop.f32.mrf.mxu0  ;;  %v8980_v27 = vld [vmem:[#allocation31_spill] sm:$0xff]  ;;  %v5746_v50 = vld [vmem:[#allocation2 + $0x134] sm:$0xf0]  ;;  %v5127_v58 = vld [vmem:[#allocation2 + $0x138] sm:$0xf0] }
 0x3df   : > { %v5834_v6 = vld [vmem:[#allocation2 + $0x3f4] sm:$0xf0]  ;;  %5555 = vmatmul.msk.bf16.vlgmr.msrb.gmra.mxu2 %vm3791_vm8, %v7964_v60  ;;  %v5162_v41 = vor.u32 %v5750_v1, %v5159_v15  ;;  %v8981_v15 = vld [vmem:[#allocation33_spill] sm:$0xff] }
 0x3e0   : > { %4140 = vmatpush.bf16.msra.mxu2 %v5222_v35  ;;  %2500 = vst [vmem:[#allocation2 + $0x358] sm:$0xff] %v2484_v10  ;;  %v2660_v30 = vpack.c.bf16 %v2636_v28, %v2635_v0  ;;  %v8565_v12 = vpop.f32.mrf.mxu1  ;;  %v5126_v10 = vor.u32 %v5746_v50, %v5125_v46  ;;  %v5093_v28 = vld [vmem:[#allocation2 + $0xd8] sm:$0xf]  ;;  %v5726_v50 = vld [vmem:[#allocation2 + $0x9c] sm:$0xf] }
 0x3e1   : > { %4197 = vmatpush.bf16.msrb.mxu1 %v5226_v43  ;;  %2852 = vst [vmem:[#allocation2 + $0x418] sm:$0xff] %v2836_v22  ;;  %v5477_v23 = vld [vmem:[#allocation2 + $0x3d8] sm:$0xf]  ;;  %v8572_v22 = vpop.f32.mrf.mxu3 }
 0x3e2   : > { %2676 = vst [vmem:[#allocation2 + $0x3b8] sm:$0xff] %v2660_v30  ;;  %v2384_v40 = vpop.permute.xlu1 %2383  ;;  %v5478_v20 = vor.u32 %v5834_v6, %v5477_v23  ;;  %v5094_v30 = vor.u32 %v5738_v3, %v5093_v28  ;;  %v5722_v46 = vld [vmem:[#allocation2 + $0x74] sm:$0xf0]  ;;  %v5031_v3 = vld [vmem:[#allocation2 + $0x78] sm:$0xf0] }
 0x3e3   : > { %v2391_v36 = vsel %vm2389_vm5, %v8324_v47, %v2384_v40  ;;  %v2419_v31 = vsel %vm2389_vm5, %v2384_v40, %v8979_v38  ;;  %v2382_v16 = vpop.permute.xlu0 %2381 }
 0x3e4   : > { %4141 = vmatpush.bf16.msra.mxu2 %v5190_v14  ;;  %v2455_v44 = vmul.f32 %v8421_v32, %v2391_v36  ;;  %v2456_v35 = vmul.f32 %v8424_v63, %v2419_v31  ;;  %4159 = vmatpush.bf16.msra.mxu3 %v5478_v20  ;;  %v2390_v43 = vsel %vm2389_vm5, %v8333_v7, %v2382_v16  ;;  %v5742_v7 = vld [vmem:[#allocation2 + $0x11c] sm:$0xf] }
 0x3e5   : > { %4198 = vmatpush.bf16.msrb.mxu1 %v5194_v42  ;;  %v2418_v47 = vsel %vm2389_vm5, %v2382_v16, %v8980_v27  ;;  %v2447_v39 = vmul.f32 %v8421_v32, %v2390_v43  ;;  %v5130_v0 = vor.u32 %v5742_v7, %v5127_v58  ;;  %v5095_v32 = vld [vmem:[#allocation2 + $0xf8] sm:$0xf0]  ;;  %v8575_v42 = vpop.permute.xlu2 %3028  ;;  %v8982_v16 = vld [vmem:[#allocation26_spill] sm:$0xff]  ;;  %v5730_v43 = vld [vmem:[#allocation2 + $0xb4] sm:$0xf0]  ;;  %v3847_v58 = vpop.f32.mrf.mxu2 }
 0x3e6   : > { %v2448_v5 = vmul.f32 %v8424_v63, %v2418_v47  ;;  %v2480_v25 = vpack.c.bf16 %v2456_v35, %v2455_v44  ;;  %4058 = vmatmul.bf16.gmra.mxu1 %v8099_v57  ;;  %v5445_v63 = vld [vmem:[#allocation2 + $0x398] sm:$0xf]  ;;  %v5734_v14 = vld [vmem:[#allocation2 + $0xdc] sm:$0xf]  ;;  %v8583_v1 = vpop.f32.mrf.mxu0  ;;  %v3810_v36 = vadd.f32 %v8483_v24, %v8575_v42 }
 0x3e7   : > { %v5098_v20 = vor.u32 %v5734_v14, %v5095_v32  ;;  %v5413_v18 = vld [vmem:[#allocation2 + $0x358] sm:$0xf]  ;;  %v5063_v27 = vld [vmem:[#allocation2 + $0xb8] sm:$0xf0] }
 0x3e8   : > { %4142 = vmatpush.bf16.msra.mxu2 %v5158_v8  ;;  %v2476_v49 = vpack.c.bf16 %v2448_v5, %v2447_v39  ;;  %2496 = vst [vmem:[#allocation2 + $0x338] sm:$0xff] %v2480_v25  ;;  %4115 = vmatmul.bf16.gmra.mxu0 %v8099_v57  ;;  %v5818_v35 = vld [vmem:[#allocation2 + $0x374] sm:$0xf0]  ;;  %v3829_v47 = vadd.f32 %v8499_v59, %v3810_v36 }
 0x3e9   : > { %4199 = vmatpush.bf16.msrb.mxu1 %v5162_v41  ;;  %v5826_v19 = vld [vmem:[#allocation2 + $0x3b4] sm:$0xf0]  ;;  %v8596_v41 = vpop.f32.mrf.mxu1  ;;  %v5066_v7 = vor.u32 %v5726_v50, %v5063_v27 }
 0x3ea   : > { %2492 = vst [vmem:[#allocation2 + $0x318] sm:$0xff] %v2476_v49  ;;  %v2202_v34 = vpop.permute.xlu1 %2201  ;;  %v5446_v6 = vor.u32 %v5826_v19, %v5445_v63  ;;  %v5061_v5 = vld [vmem:[#allocation2 + $0x98] sm:$0xf]  ;;  %v5718_v19 = vld [vmem:[#allocation2 + $0x5c] sm:$0xf] }
 0x3eb   : > { %v2210_v33 = vsel %vm2209_vm6, %v8303_v62, %v2202_v34  ;;  %v2238_v23 = vsel %vm2209_vm6, %v2202_v34, %v8981_v15  ;;  %v2208_v40 = vpop.permute.xlu0 %2207  ;;  %v5029_v63 = vld [vmem:[#allocation2 + $0x58] sm:$0xf]  ;;  %v5034_v15 = vor.u32 %v5718_v19, %v5031_v3 }
 0x3ec   : > { %4143 = vmatpush.bf16.msra.mxu2 %v5126_v10  ;;  %v2267_v38 = vmul.f32 %v8453_v55, %v2210_v33  ;;  %v2268_v31 = vmul.f32 %v8456_v37, %v2238_v23  ;;  %4160 = vmatpush.bf16.msra.mxu3 %v5446_v6  ;;  %v2213_v62 = vsel %vm2209_vm6, %v8290_v48, %v2208_v40  ;;  %v3866_v10 = vpop.f32.mrf.mxu3  ;;  %v8983_v6 = vld [vmem:[#allocation28_spill] sm:$0xff] }
 0x3ed   : > { %4200 = vmatpush.bf16.msrb.mxu1 %v5130_v0  ;;  %v2241_v8 = vsel %vm2209_vm6, %v2208_v40, %v8982_v16  ;;  %v2291_v44 = vmul.f32 %v8453_v55, %v2213_v62  ;;  %v5414_v48 = vor.u32 %v5818_v35, %v5413_v18  ;;  %v3848_v55 = vadd.f32 %v3847_v58, %v3829_v47  ;;  %v8984_v36 = vld [vmem:[#allocation20_spill] sm:$0xff]  ;;  %v8625_v27 = vpop.f32.mrf.mxu2 }
 0x3ee   : > { %v2292_v24 = vmul.f32 %v8456_v37, %v2241_v8  ;;  %v2296_v39 = vpack.c.bf16 %v2268_v31, %v2267_v38  ;;  %v5062_v37 = vor.u32 %v5730_v43, %v5061_v5  ;;  %v3867_v28 = vadd.f32 %v3866_v10, %v8575_v42  ;;  %v3885_v23 = vpop.f32.mrf.mxu0  ;;  %v5714_v16 = vld [vmem:[#allocation2 + $0x34] sm:$0xf0]  ;;  %v4999_v8 = vld [vmem:[#allocation2 + $0x38] sm:$0xf0] }
 0x3ef   : > { %v5810_v49 = vld [vmem:[#allocation2 + $0x334] sm:$0xf0]  ;;  %5556 = vmatmul.msk.bf16.gmra.mxu2 %vm3791_vm8, %v8172_v2  ;;  %4262 = vst [vmem:[%s8606_s6 + $0x40] sm:$0xff] %v3848_v55  ;;  %v5030_v33 = vor.u32 %v5722_v46, %v5029_v63  ;;  %v5830_v35 = vld [vmem:[#allocation2 + $0x3dc] sm:$0xf] }
 0x3f0   : > { %4144 = vmatpush.bf16.msra.mxu2 %v5094_v30  ;;  %v2308_v25 = vpack.c.bf16 %v2292_v24, %v2291_v44  ;;  %2312 = vst [vmem:[#allocation2 + $0x298] sm:$0xff] %v2296_v39  ;;  %4161 = vmatpush.bf16.msra.mxu3 %v5414_v48  ;;  %v3886_v44 = vadd.f32 %v3885_v23, %v3867_v28  ;;  %v5479_v43 = vld [vmem:[#allocation2 + $0x3f8] sm:$0xf0]  ;;  %v4997_v47 = vld [vmem:[#allocation2 + $0x18] sm:$0xf] }
 0x3f1   : > { %4201 = vmatpush.bf16.msrb.mxu1 %v5098_v20  ;;  %v5381_v59 = vld [vmem:[#allocation2 + $0x318] sm:$0xf]  ;;  %v3904_v38 = vpop.f32.mrf.mxu1  ;;  %v5710_v39 = vld [vmem:[#allocation2 + $0x1c] sm:$0xf]  ;;  %v4998_v5 = vor.u32 %v5714_v16, %v4997_v47  ;;  %v5482_v46 = vor.u32 %v5830_v35, %v5479_v43 }
 0x3f2   : > { %2324 = vst [vmem:[#allocation2 + $0x2f8] sm:$0xff] %v2308_v25  ;;  %v5382_v0 = vor.u32 %v5810_v49, %v5381_v59  ;;  %v2748_v32 = vpop.permute.xlu1 %2747  ;;  %v3905_v48 = vadd.f32 %v3904_v38, %v3886_v44  ;;  %v5002_v50 = vor.u32 %v5710_v39, %v4999_v8  ;;  %v5349_v58 = vld [vmem:[#allocation2 + $0x2d8] sm:$0xf]  ;;  %v5822_v10 = vld [vmem:[#allocation2 + $0x39c] sm:$0xf] }
 0x3f3   : > { %v2753_v34 = vsel %vm2749_vm7, %v8429_v56, %v2748_v32  ;;  %v2781_v30 = vsel %vm2749_vm7, %v2748_v32, %v8983_v6  ;;  %v2746_v14 = vpop.permute.xlu0 %2745  ;;  %v5253_v16 = vld [vmem:[#allocation2 + $0x218] sm:$0xf]  ;;  %v5806_v8 = vld [vmem:[#allocation2 + $0x31c] sm:$0xf] }
 0x3f4   : > { %4145 = vmatpush.bf16.msra.mxu2 %v5062_v37  ;;  %v2831_v40 = vmul.f32 %v8513_v21, %v2753_v34  ;;  %v2832_v20 = vmul.f32 %v8516_v54, %v2781_v30  ;;  %4162 = vmatpush.bf16.msra.mxu3 %v5382_v0  ;;  %v2752_v18 = vsel %vm2749_vm7, %v8435_v11, %v2746_v14  ;;  %v3869_v49 = vpop.f32.mrf.mxu3  ;;  %v5447_v37 = vld [vmem:[#allocation2 + $0x3b8] sm:$0xf0]  ;;  %v5794_v0 = vld [vmem:[#allocation2 + $0x2b4] sm:$0xf0]  ;;  %v8985_v34 = vld [vmem:[#allocation19_spill] sm:$0xff] }
 0x3f5   : > { %4202 = vmatpush.bf16.msrb.mxu1 %v5066_v7  ;;  %v2780_v56 = vsel %vm2749_vm7, %v2746_v14, %v8984_v36  ;;  %v2823_v31 = vmul.f32 %v8513_v21, %v2752_v18  ;;  %4263 = vst [vmem:[%s8606_s6 + $0x48] sm:$0xff] %v3905_v48  ;;  %v5450_v30 = vor.u32 %v5822_v10, %v5447_v37  ;;  %v5786_v18 = vld [vmem:[#allocation2 + $0x274] sm:$0xf0]  ;;  %v3852_v36 = vpop.f32.mrf.mxu2  ;;  %v5383_v44 = vld [vmem:[#allocation2 + $0x338] sm:$0xf0] }
 0x3f6   : > { %v2824_v62 = vmul.f32 %v8516_v54, %v2780_v56  ;;  %v2848_v24 = vpack.c.bf16 %v2832_v20, %v2831_v40  ;;  %5557 = vmatmul.msk.bf16.vlgmr.msra.gmra.mxu1 %vm3791_vm8, %v7964_v60  ;;  %v3888_v63 = vpop.f32.mrf.mxu0  ;;  %v5814_v40 = vld [vmem:[#allocation2 + $0x35c] sm:$0xf]  ;;  %v5285_v20 = vld [vmem:[#allocation2 + $0x258] sm:$0xf] }
 0x3f7   : > { %v5317_v7 = vld [vmem:[#allocation2 + $0x298] sm:$0xf] }
 0x3f8   : > { %4146 = vmatpush.bf16.msra.mxu2 %v5030_v33  ;;  %v2844_v11 = vpack.c.bf16 %v2824_v62, %v2823_v31  ;;  %2864 = vst [vmem:[#allocation2 + $0x478] sm:$0xff] %v2848_v24  ;;  %v5318_v14 = vor.u32 %v5794_v0, %v5317_v7  ;;  %v5778_v24 = vld [vmem:[#allocation2 + $0x234] sm:$0xf0]  ;;  %v5798_v0 = vld [vmem:[#allocation2 + $0x2dc] sm:$0xf] }
 0x3f9   : > { %4203 = vmatpush.bf16.msrb.mxu1 %v5034_v15  ;;  %v5802_v25 = vld [vmem:[#allocation2 + $0x2f4] sm:$0xf0]  ;;  %v3907_v33 = vpop.f32.mrf.mxu1  ;;  %v5351_v7 = vld [vmem:[#allocation2 + $0x2f8] sm:$0xf0] }
 0x3fa   : > { %2860 = vst [vmem:[#allocation2 + $0x458] sm:$0xff] %v2844_v11  ;;  %v5350_v55 = vor.u32 %v5802_v25, %v5349_v58  ;;  %v8629_v59 = vpop.permute.xlu1 %3023  ;;  %v5254_v58 = vor.u32 %v5778_v24, %v5253_v16 }
 0x3fb   : > { %v2744_v3 = vpop.permute.xlu0 %2743  ;;  %v3808_v28 = vadd.f32 %v8460_v29, %v8629_v59  ;;  %v3865_v32 = vadd.f32 %v8572_v22, %v8629_v59 }
 0x3fc   : > { %4147 = vmatpush.bf16.msra.mxu2 %v4998_v5  ;;  %4163 = vmatpush.bf16.msra.mxu3 %v5350_v55  ;;  %v2751_v19 = vsel %vm2749_vm7, %v8376_v51, %v2744_v3  ;;  %v2779_v6 = vsel %vm2749_vm7, %v2744_v3, %v8985_v34 }
 0x3fd   : > { %4204 = vmatpush.bf16.msrb.mxu1 %v5002_v50  ;;  %v2815_v15 = vmul.f32 %v8513_v21, %v2751_v19  ;;  %v2816_v23 = vmul.f32 %v8516_v54, %v2779_v6  ;;  %v3827_v29 = vadd.f32 %v8475_v4, %v3808_v28  ;;  %v3884_v22 = vadd.f32 %v8583_v1, %v3865_v32  ;;  %v5415_v21 = vld [vmem:[#allocation2 + $0x378] sm:$0xf0]  ;;  %v3871_v4 = vpop.f32.mrf.mxu3  ;;  %v3921_v10 = vpop.f32.mrf.mxu2  ;;  %v5509_v28 = vld [vmem:[#allocation2 + $0x418] sm:$0xf] }
 0x3fe   : > { %v5418_v54 = vor.u32 %v5814_v40, %v5415_v21  ;;  %v5286_v1 = vor.u32 %v5786_v18, %v5285_v20  ;;  %v3890_v39 = vpop.f32.mrf.mxu0  ;;  %v5386_v50 = vor.u32 %v5806_v8, %v5383_v44  ;;  %v5354_v6 = vor.u32 %v5798_v0, %v5351_v7  ;;  %v5782_v40 = vld [vmem:[#allocation2 + $0x25c] sm:$0xf] }
 0x3ff   : > { %v2840_v51 = vpack.c.bf16 %v2816_v23, %v2815_v15  ;;  %v5850_v45 = vld [vmem:[#allocation2 + $0x474] sm:$0xf0]  ;;  %v3846_v56 = vadd.f32 %v8569_v53, %v3827_v29  ;;  %v3903_v38 = vadd.f32 %v8596_v41, %v3884_v22  ;;  %4148 = vmatmul.bf16.vlgmr.msra.gmra.mxu2 %v8034_v26  ;;  %v5543_v41 = vld [vmem:[#allocation2 + $0x478] sm:$0xf0]  ;;  %v3922_v23 = vadd.f32 %v3921_v10, %v8629_v59 }
 0x400   : > { %4216 = vmatpush.bf16.msrb.mxu2 %v5482_v46  ;;  %4164 = vmatpush.bf16.msra.mxu3 %v5318_v14  ;;  %v5790_v15 = vld [vmem:[#allocation2 + $0x29c] sm:$0xf] }
 0x401   : > { %v5541_v31 = vld [vmem:[#allocation2 + $0x458] sm:$0xf]  ;;  %2856 = vst [vmem:[#allocation2 + $0x438] sm:$0xff] %v2840_v51  ;;  %v5846_v53 = vld [vmem:[#allocation2 + $0x45c] sm:$0xf]  ;;  %v3909_v55 = vpop.f32.mrf.mxu1 }
 0x402   : > { %v5542_v62 = vor.u32 %v5850_v45, %v5541_v31  ;;  %4254 = vst [vmem:[%s8606_s6] sm:$0xff] %v3846_v56  ;;  %v8650_v35 = vpop.permute.xlu1 %3038  ;;  %v5546_v37 = vor.u32 %v5846_v53, %v5543_v41  ;;  %v5287_v20 = vld [vmem:[#allocation2 + $0x278] sm:$0xf0] }
 0x403   : > { %4255 = vst [vmem:[%s8606_s6 + $0x8] sm:$0xff] %v3903_v38  ;;  %v8653_v43 = vpop.permute.xlu0 %3033  ;;  %v3815_v11 = vadd.f32 %v8549_v61, %v8650_v35  ;;  %v3872_v47 = vadd.f32 %v3871_v4, %v8650_v35  ;;  %v5290_v56 = vor.u32 %v5782_v40, %v5287_v20  ;;  %v5774_v21 = vld [vmem:[#allocation2 + $0x21c] sm:$0xf] }
 0x404   : > { %4217 = vmatpush.bf16.msrb.mxu2 %v5450_v30  ;;  %4165 = vmatpush.bf16.msra.mxu3 %v5286_v1  ;;  %v3813_v48 = vadd.f32 %v8519_v13, %v8653_v43  ;;  %v3870_v5 = vadd.f32 %v3869_v49, %v8653_v43  ;;  %v5838_v49 = vld [vmem:[#allocation2 + $0x41c] sm:$0xf] }
 0x405   : > { %4184 = vmatpush.bf16.msrb.mxu0 %v5542_v62  ;;  %v3834_v25 = vadd.f32 %v8565_v12, %v3815_v11  ;;  %v3891_v46 = vadd.f32 %v3890_v39, %v3872_v47  ;;  %v3940_v34 = vpop.f32.mrf.mxu3  ;;  %v5255_v31 = vld [vmem:[#allocation2 + $0x238] sm:$0xf0] }
 0x406   : > { %v3832_v3 = vadd.f32 %v8535_v9, %v3813_v48  ;;  %v3889_v61 = vadd.f32 %v3888_v63, %v3870_v5  ;;  %5558 = vmatmul.msk.bf16.gmra.mxu1 %vm3791_vm8, %v8172_v2  ;;  %v5258_v1 = vor.u32 %v5774_v21, %v5255_v31 }
 0x407   : > { %v3853_v13 = vadd.f32 %v3852_v36, %v3834_v25  ;;  %v3910_v63 = vadd.f32 %v3909_v55, %v3891_v46  ;;  %v3923_v36 = vpop.f32.mrf.mxu2 }
 0x408   : > { %4218 = vmatpush.bf16.msrb.mxu2 %v5418_v54  ;;  %4166 = vmatpush.bf16.msra.mxu3 %v5254_v58  ;;  %v5842_v12 = vld [vmem:[#allocation2 + $0x434] sm:$0xf0]  ;;  %v5511_v32 = vld [vmem:[#allocation2 + $0x438] sm:$0xf0]  ;;  %v3851_v19 = vadd.f32 %v8625_v27, %v3832_v3  ;;  %v3908_v9 = vadd.f32 %v3907_v33, %v3889_v61  ;;  %v3941_v33 = vadd.f32 %v3940_v34, %v3922_v23 }
 0x409   : > { %v5510_v30 = vor.u32 %v5842_v12, %v5509_v28  ;;  %v5514_v14 = vor.u32 %v5838_v49, %v5511_v32  ;;  %4278 = vst [vmem:[%s8606_s6 + $0xc0] sm:$0xff] %v3853_v13  ;;  %v5319_v27 = vld [vmem:[#allocation2 + $0x2b8] sm:$0xf0]  ;;  %v3924_v51 = vadd.f32 %v3923_v36, %v8575_v42  ;;  %v3978_v24 = vpop.f32.mrf.mxu1 }
 0x40a   : > { %4270 = vst [vmem:[%s8606_s6 + $0x80] sm:$0xff] %v3851_v19  ;;  %v5322_v22 = vor.u32 %v5790_v15, %v5319_v27  ;;  %v3979_v48 = vadd.f32 %v3978_v24, %v8629_v59 }
 0x40b   : > { %4167 = vmatmul.bf16.vlgmr.msra.gmra.mxu3 %v7887_v52  ;;  %4185 = vmatpush.bf16.msrb.mxu0 %v5510_v30  ;;  %4271 = vst [vmem:[%s8606_s6 + $0x88] sm:$0xff] %v3908_v9  ;;  %v3959_v29 = vpop.f32.mrf.mxu0 }
 0x40c   : > { %4219 = vmatpush.bf16.msrb.mxu2 %v5386_v50  ;;  %4241 = vmatpush.bf16.msrb.mxu3 %v5546_v37  ;;  %4279 = vst [vmem:[%s8606_s6 + $0xc8] sm:$0xff] %v3910_v63  ;;  %v3960_v18 = vadd.f32 %v3959_v29, %v3941_v33 }
 0x40d   : > { %v3942_v45 = vpop.f32.mrf.mxu3 }
 0x40e   : > { %5559 = vmatmul.msk.bf16.vlgmr.msrb.gmra.mxu0 %vm3791_vm8, %v7964_v60  ;;  %4256 = vst [vmem:[%s8606_s6 + $0x10] sm:$0xff] %v3960_v18  ;;  %v3943_v38 = vadd.f32 %v3942_v45, %v3924_v51 }
 0x40f   : > { %4153 = vmatmul.bf16.gmra.mxu2 %v8089_v17  ;;  %v3926_v62 = vpop.f32.mrf.mxu2 }
 0x410   : > { %4220 = vmatpush.bf16.msrb.mxu2 %v5354_v6  ;;  %4242 = vmatpush.bf16.msrb.mxu3 %v5514_v14  ;;  %v3927_v8 = vadd.f32 %v3926_v62, %v8653_v43 }
 0x411   : > { %v3980_v58 = vpop.f32.mrf.mxu1 }
 0x413   : > { %v3961_v4 = vpop.f32.mrf.mxu0 }
 0x414   : > { %4221 = vmatpush.bf16.msrb.mxu2 %v5322_v22  ;;  %v3962_v54 = vadd.f32 %v3961_v4, %v3943_v38 }
 0x415   : > { %v3945_v16 = vpop.f32.mrf.mxu3 }
 0x416   : > { %4264 = vst [vmem:[%s8606_s6 + $0x50] sm:$0xff] %v3962_v54  ;;  %4205 = vmatmul.bf16.vlgmr.msrb.gmra.mxu1 %v8034_v26  ;;  %v3946_v53 = vadd.f32 %v3945_v16, %v3927_v8 }
 0x417   : > { %v3928_v11 = vpop.f32.mrf.mxu2 }
 0x418   : > { %4222 = vmatpush.bf16.msrb.mxu2 %v5290_v56  ;;  %v3929_v47 = vadd.f32 %v3928_v11, %v8650_v35 }
 0x41a   : > { %v3983_v61 = vpop.f32.mrf.mxu1 }
 0x41b   : > { %4172 = vmatmul.bf16.gmra.mxu3 %v8099_v57  ;;  %v3964_v44 = vpop.f32.mrf.mxu0 }
 0x41c   : > { %4223 = vmatpush.bf16.msrb.mxu2 %v5258_v1  ;;  %v3965_v41 = vadd.f32 %v3964_v44, %v3946_v53 }
 0x41d   : > { %v3947_v26 = vpop.f32.mrf.mxu3 }
 0x41e   : > { %5560 = vmatmul.msk.bf16.gmra.mxu0 %vm3791_vm8, %v8172_v2  ;;  %4272 = vst [vmem:[%s8606_s6 + $0x90] sm:$0xff] %v3965_v41  ;;  %v3948_v39 = vadd.f32 %v3947_v26, %v3929_v47 }
 0x41f   : > { %4224 = vmatmul.bf16.vlgmr.msrb.gmra.mxu2 %v7887_v52  ;;  %v3997_v25 = vpop.f32.mrf.mxu2  ;;  %v3981_v52 = vadd.f32 %v3980_v58, %v8575_v42 }
 0x420   : > { %v3998_v46 = vadd.f32 %v3997_v25, %v3979_v48 }
 0x422   : > { %v3985_v13 = vpop.f32.mrf.mxu1 }
 0x423   : > { %v3966_v5 = vpop.f32.mrf.mxu0  ;;  %v3986_v12 = vadd.f32 %v3985_v13, %v8650_v35 }
 0x424   : > { %v3967_v50 = vadd.f32 %v3966_v5, %v3948_v39 }
 0x425   : > { %v4016_v55 = vpop.f32.mrf.mxu3 }
 0x426   : > { %4280 = vst [vmem:[%s8606_s6 + $0xd0] sm:$0xff] %v3967_v50  ;;  %4210 = vmatmul.bf16.gmra.mxu1 %v8089_v17  ;;  %v4017_v37 = vadd.f32 %v4016_v55, %v3998_v46 }
 0x427   : > { %v3999_v7 = vpop.f32.mrf.mxu2 }
 0x428   : > { %4257 = vst [vmem:[%s8606_s6 + $0x18] sm:$0xff] %v4017_v37  ;;  %v4000_v3 = vadd.f32 %v3999_v7, %v3981_v52 }
 0x42b   : > { %5561 = vmatmul.msk.bf16.vlgmr.msrb.gmra.mxu3 %vm3791_vm8, %v7964_v60  ;;  %v3984_v60 = vadd.f32 %v3983_v61, %v8653_v43  ;;  %v4035_v49 = vpop.f32.mrf.mxu0 }
 0x42d   : > { %v4018_v10 = vpop.f32.mrf.mxu3 }
 0x42e   : > { %v4019_v0 = vadd.f32 %v4018_v10, %v4000_v3 }
 0x42f   : > { %4229 = vmatmul.bf16.gmra.mxu2 %v8099_v57  ;;  %v4002_v28 = vpop.f32.mrf.mxu2 }
 0x430   : > { %4265 = vst [vmem:[%s8606_s6 + $0x58] sm:$0xff] %v4019_v0  ;;  %v4003_v32 = vadd.f32 %v4002_v28, %v3984_v60 }
 0x433   : > { %v4037_v6 = vpop.f32.mrf.mxu0 }
 0x434   : > { %v4038_v33 = vadd.f32 %v4037_v6, %v8575_v42 }
 0x435   : > { %v4021_v17 = vpop.f32.mrf.mxu3 }
 0x436   : > { %v4022_v9 = vadd.f32 %v4021_v17, %v4003_v32 }
 0x437   : > { %v4004_v19 = vpop.f32.mrf.mxu2 }
 0x438   : > { %v4005_v57 = vadd.f32 %v4004_v19, %v3986_v12  ;;  %4273 = vst [vmem:[%s8606_s6 + $0x98] sm:$0xff] %v4022_v9 }
 0x43b   : > { %5562 = vmatmul.msk.bf16.gmra.mxu3 %vm3791_vm8, %v8172_v2  ;;  %v4040_v30 = vpop.f32.mrf.mxu0  ;;  %v4036_v2 = vadd.f32 %v4035_v49, %v8629_v59 }
 0x43c   : > { %v4041_v45 = vadd.f32 %v4040_v30, %v8653_v43 }
 0x43d   : > { %v4023_v63 = vpop.f32.mrf.mxu3 }
 0x43e   : > { %v4024_v34 = vadd.f32 %v4023_v63, %v4005_v57 }
 0x440   : > { %4281 = vst [vmem:[%s8606_s6 + $0xd8] sm:$0xff] %v4024_v34 }
 0x443   : > { %v4042_v15 = vpop.f32.mrf.mxu0 }
 0x444   : > { %v4043_v62 = vadd.f32 %v4042_v15, %v8650_v35 }
 0x445   : > { %v4092_v36 = vpop.f32.mrf.mxu3 }
 0x446   : > { %v4093_v4 = vadd.f32 %v4092_v36, %v8629_v59 }
 0x44d   : > { %v4094_v54 = vpop.f32.mrf.mxu3 }
 0x44e   : > { %v4095_v41 = vadd.f32 %v4094_v54, %v8575_v42 }
 0x453   : > { %v4054_v14 = vpop.f32.mrf.mxu1 }
 0x454   : > { %v4055_v29 = vadd.f32 %v4054_v14, %v4036_v2 }
 0x455   : > { %v4111_v20 = vpop.f32.mrf.mxu0  ;;  %v4097_v26 = vpop.f32.mrf.mxu3 }
 0x456   : > { %v4112_v8 = vadd.f32 %v4111_v20, %v4093_v4  ;;  %v4098_v58 = vadd.f32 %v4097_v26, %v8653_v43 }
 0x45b   : > { %v4056_v23 = vpop.f32.mrf.mxu1 }
 0x45c   : > { %v4057_v18 = vadd.f32 %v4056_v23, %v4038_v33 }
 0x45d   : > { %v4113_v31 = vpop.f32.mrf.mxu0  ;;  %v4099_v52 = vpop.f32.mrf.mxu3 }
 0x45e   : > { %v4114_v48 = vadd.f32 %v4113_v31, %v4095_v41  ;;  %v4100_v3 = vadd.f32 %v4099_v52, %v8650_v35 }
 0x462   : > { %v4073_v27 = vpop.f32.mrf.mxu2 }
 0x463   : > { %v4074_v22 = vadd.f32 %v4073_v27, %v4055_v29  ;;  %v4059_v40 = vpop.f32.mrf.mxu1 }
 0x464   : > { %v4060_v21 = vadd.f32 %v4059_v40, %v4041_v45 }
 0x465   : > { %4258 = vst [vmem:[%s8606_s6 + $0x20] sm:$0xff] %v4074_v22  ;;  %v4116_v11 = vpop.f32.mrf.mxu0 }
 0x466   : > { %v4117_v55 = vadd.f32 %v4116_v11, %v4098_v58 }
 0x46a   : > { %v4075_v51 = vpop.f32.mrf.mxu2 }
 0x46b   : > { %v4076_v56 = vadd.f32 %v4075_v51, %v4057_v18  ;;  %v4061_v38 = vpop.f32.mrf.mxu1 }
 0x46c   : > { %v4062_v53 = vadd.f32 %v4061_v38, %v4043_v62 }
 0x46d   : > { %4266 = vst [vmem:[%s8606_s6 + $0x60] sm:$0xff] %v4076_v56  ;;  %v4118_v25 = vpop.f32.mrf.mxu0 }
 0x46e   : > { %v4119_v28 = vadd.f32 %v4118_v25, %v4100_v3 }
 0x472   : > { %v4078_v1 = vpop.f32.mrf.mxu2 }
 0x473   : > { %v4079_v16 = vadd.f32 %v4078_v1, %v4060_v21  ;;  %v4130_v44 = vpop.f32.mrf.mxu1 }
 0x474   : > { %v4131_v24 = vadd.f32 %v4130_v44, %v4112_v8 }
 0x475   : > { %4274 = vst [vmem:[%s8606_s6 + $0xa0] sm:$0xff] %v4079_v16 }
 0x476   : > { %4259 = vst [vmem:[%s8606_s6 + $0x28] sm:$0xff] %v4131_v24 }
 0x47a   : > { %v4080_v47 = vpop.f32.mrf.mxu2 }
 0x47b   : > { %v4081_v39 = vadd.f32 %v4080_v47, %v4062_v53  ;;  %v4132_v5 = vpop.f32.mrf.mxu1 }
 0x47c   : > { %v4133_v50 = vadd.f32 %v4132_v5, %v4114_v48 }
 0x47d   : > { %4282 = vst [vmem:[%s8606_s6 + $0xe0] sm:$0xff] %v4081_v39 }
 0x47e   : > { %4267 = vst [vmem:[%s8606_s6 + $0x68] sm:$0xff] %v4133_v50 }
 0x482   : > { %v4149_v46 = vpop.f32.mrf.mxu2 }
 0x483   : > { %v4135_v37 = vpop.f32.mrf.mxu1  ;;  %v4150_v61 = vadd.f32 %v4149_v46, %v8629_v59 }
 0x484   : > { %v4136_v7 = vadd.f32 %v4135_v37, %v4117_v55 }
 0x486   : > { %4275 = vst [vmem:[%s8606_s6 + $0xa8] sm:$0xff] %v4136_v7 }
 0x48a   : > { %v4151_v0 = vpop.f32.mrf.mxu2 }
 0x48b   : > { %v4187_v10 = vpop.f32.mrf.mxu0  ;;  %v4137_v17 = vpop.f32.mrf.mxu1  ;;  %v4152_v57 = vadd.f32 %v4151_v0, %v8575_v42 }
 0x48c   : > { %v4138_v13 = vadd.f32 %v4137_v17, %v4119_v28 }
 0x48e   : > { %v4168_v60 = vpop.f32.mrf.mxu3  ;;  %4283 = vst [vmem:[%s8606_s6 + $0xe8] sm:$0xff] %v4138_v13 }
 0x48f   : > { %v4169_v12 = vadd.f32 %v4168_v60, %v4150_v61 }
 0x491   : > { %v4188_v49 = vadd.f32 %v4187_v10, %v4169_v12 }
 0x492   : > { %v4154_v19 = vpop.f32.mrf.mxu2 }
 0x493   : > { %4260 = vst [vmem:[%s8606_s6 + $0x30] sm:$0xff] %v4188_v49  ;;  %v4189_v32 = vpop.f32.mrf.mxu0  ;;  %v4155_v6 = vadd.f32 %v4154_v19, %v8653_v43  ;;  %v4206_v23 = vpop.f32.mrf.mxu1 }
 0x494   : > { %v4207_v18 = vadd.f32 %v4206_v23, %v8629_v59 }
 0x496   : > { %v4170_v9 = vpop.f32.mrf.mxu3 }
 0x497   : > { %v4171_v63 = vadd.f32 %v4170_v9, %v4152_v57 }
 0x499   : > { %v4190_v34 = vadd.f32 %v4189_v32, %v4171_v63 }
 0x49a   : > { %v4156_v14 = vpop.f32.mrf.mxu2 }
 0x49b   : > { %4268 = vst [vmem:[%s8606_s6 + $0x70] sm:$0xff] %v4190_v34  ;;  %v4192_v30 = vpop.f32.mrf.mxu0  ;;  %v4157_v33 = vadd.f32 %v4156_v14, %v8650_v35  ;;  %v4208_v51 = vpop.f32.mrf.mxu1 }
 0x49c   : > { %v4209_v31 = vadd.f32 %v4208_v51, %v8575_v42 }
 0x49e   : > { %v4173_v2 = vpop.f32.mrf.mxu3 }
 0x49f   : > { %v4174_v15 = vadd.f32 %v4173_v2, %v4155_v6 }
 0x4a1   : > { %v4193_v29 = vadd.f32 %v4192_v30, %v4174_v15 }
 0x4a2   : > { %v4225_v27 = vpop.f32.mrf.mxu2 }
 0x4a3   : > { %4276 = vst [vmem:[%s8606_s6 + $0xb0] sm:$0xff] %v4193_v29  ;;  %v4194_v40 = vpop.f32.mrf.mxu0  ;;  %v4226_v45 = vadd.f32 %v4225_v27, %v4207_v18  ;;  %v4211_v4 = vpop.f32.mrf.mxu1 }
 0x4a4   : > { %v4212_v59 = vadd.f32 %v4211_v4, %v8653_v43 }
 0x4a6   : > { %v4175_v22 = vpop.f32.mrf.mxu3 }
 0x4a7   : > { %v4176_v20 = vadd.f32 %v4175_v22, %v4157_v33 }
 0x4a9   : > { %v4195_v36 = vadd.f32 %v4194_v40, %v4176_v20 }
 0x4aa   : > { %v4227_v38 = vpop.f32.mrf.mxu2 }
 0x4ab   : > { %4284 = vst [vmem:[%s8606_s6 + $0xf0] sm:$0xff] %v4195_v36  ;;  %v4228_v54 = vadd.f32 %v4227_v38, %v4209_v31  ;;  %v4213_v24 = vpop.f32.mrf.mxu1 }
 0x4ac   : > { %v4214_v42 = vadd.f32 %v4213_v24, %v8650_v35 }
 0x4ae   : > { %v4244_v56 = vpop.f32.mrf.mxu3 }
 0x4af   : > { %v4245_v21 = vadd.f32 %v4244_v56, %v4226_v45 }
 0x4b1   : > { %4261 = vst [vmem:[%s8606_s6 + $0x38] sm:$0xff] %v4245_v21 }
 0x4b2   : > { %v4230_v16 = vpop.f32.mrf.mxu2 }
 0x4b3   : > { %v4231_v8 = vadd.f32 %v4230_v16, %v4212_v59 }
 0x4b6   : > { %v4246_v1 = vpop.f32.mrf.mxu3 }
 0x4b7   : > { %v4247_v62 = vadd.f32 %v4246_v1, %v4228_v54 }
 0x4b9   : > { %4269 = vst [vmem:[%s8606_s6 + $0x78] sm:$0xff] %v4247_v62 }
 0x4ba   : > { %v4232_v41 = vpop.f32.mrf.mxu2 }
 0x4bb   : > { %v4233_v43 = vadd.f32 %v4232_v41, %v4214_v42 }
 0x4be   : > { %v4249_v44 = vpop.f32.mrf.mxu3 }
 0x4bf   : > { %v4250_v53 = vadd.f32 %v4249_v44, %v4231_v8 }
 0x4c1   : > { %4277 = vst [vmem:[%s8606_s6 + $0xb8] sm:$0xff] %v4250_v53 }
 0x4c6   : > { %v4251_v11 = vpop.f32.mrf.mxu3 }
 0x4c7   : > { %v4252_v47 = vadd.f32 %v4251_v11, %v4233_v43 }
 0x4c9   : > { %4285 = vst [vmem:[%s8606_s6 + $0xf8] sm:$0xff] %v4252_v47 }
 0x4ca   : > { %6101 = shalt.err (!%p6098_p10)
}
 0x4cb   : > { %s6168_s26 = smov 1024   ;;  %s6169_s29 = smov 64  }
 0x4cc   : > { %5866 = dma.vmem_to_hbm [thread:$0]  (%p6285_p3), %s4300_s15, 4096, %s4302_s14, %s4287_s22, %s6168_s26, %s6168_s26, %s6169_s29  }
 0x4cd PF: > { %s4316_s6 = sand.u32 1, %s6136_s18   ;;  %p8986_p12 = scmp.ge.s32.totalorder %s6148_s21, 2 }
 0x4ce   : > { %s4317_s23 = scalar_lea.sflag [#allocation5], %s4316_s6 }
 0x4cf   : > { %p5883_p13 = pnand %p8986_p12, %p6235_p6 }
 0x4d1   : > { %p5884_p0 = pneg %p5883_p13 }
 0x4d3   : > { %6131 = dma.done.wait (%p5884_p0), %s4317_s23, 4096  }
 0x4d4   : > { %6133 = vsyncadd (%p5884_p0), %s4317_s23, 4294963200  ;;  %p20_p5 = scmp.ge.s32.totalorder %s6272_s8, 4   ;;  %s8987_s18 = smov %s6140_s19 }
 0x4d5   : > { %s8988_s19 = smov %s6144_s20  ;;  %s8989_s20 = smov %s6281_s11 }
 0x4d6   : > { %s8990_s21 = smov %s6272_s8  ;;  %22 = sbr.rel (!%p20_p5) target bundleno = 7 (0x7), region = 104 }
 0x4db   :  { %4323 = vsyncpa [#allocation4], 1 }
 0x4dc   :  { %4325 = vsyncpa [#allocation4 + $0x1], 1 }
 0x4dd   :  { %4326 = vsyncpa [#allocation7], 1 }
 0x4de   :  { %4327 = vsyncpa [#allocation10], 1 }
 0x4df   :  { %4328 = vsyncpa [#allocation5], 1 }
 0x4e0   :  { %4330 = vsyncpa [#allocation5 + $0x1], 1 }

</bundles_post_ra>
